<compile_context>
chip_gen: v6e
topology: v6e:2x2x1
jax: 0.10.0
libtpu: 0.0.40
codegen_flags: <defaults>
</compile_context>

<pallas_src>
import math
import numpy as np
import jax
import jax.numpy as jnp
from jax.experimental import pallas as pl
from jax.experimental.pallas import tpu as pltpu

KSIZE = 16  # Conv2d(kernel_size=16, stride=16, bias=False)


# ---------------- fused Pallas kernel ----------------

def _fused_highway_kernel(x_ref, y_ref, w_ref, b_ref, o_ref):
    """out[b] = y[b] + sigmoid(z[b] + bias) * (x[b] - y[b]),
       z[b, c] = sum_{ci, p} x[b, ci, p] * W[ci, c, p].

    Shapes (everything resident in VMEM, single invocation, no grid):
      x_ref, y_ref, o_ref : (B, C, HW)
      w_ref               : (C_in, C_gate, HW)   lane-dense folded weight
      b_ref               : (C_gate, 1)
    """
    B = x_ref.shape[0]
    C = x_ref.shape[1]
    bias = b_ref[...]                                     # (C, 1)
    for b in range(B):                                    # B is tiny & static
        xb = x_ref[b]                                     # (C, HW)
        yb = y_ref[b]                                     # (C, HW)
        # Gate logits on the VPU: acc[c, p] = sum_ci x[b, ci, p] * W[ci, c, p]
        acc = xb[0:1, :] * w_ref[0]                       # (C, HW)
        for ci in range(1, C):
            acc = acc + xb[ci:ci + 1, :] * w_ref[ci]
        z = jnp.sum(acc, axis=-1, keepdims=True) + bias   # (C, 1) lane reduce (XLU)
        g = 1.0 / (1.0 + jnp.exp(-z))                     # exact sigmoid (EUP exp)
        o_ref[b] = yb + g * (xb - yb)                     # y + g*(x - y)


# ---------------- trace-time weight folding (hoisted, once per weight set) ----

def _adaptive_pool_matrix(L, out_size):
    """Matrix M (L, out) so that flat @ M == F.adaptive_avg_pool1d(flat, out)."""
    pool = np.zeros((L, out_size), np.float32)
    for i in range(out_size):
        s = (i * L) // out_size
        e = -((-(i + 1) * L) // out_size)  # ceil((i+1)*L/out)
        pool[s:e, i] = 1.0 / (e - s)
    return pool


def fold_gate_params(conv_w, t_w, t_b, H, W):
    """Fold Conv(16,16,no-bias) -> PyTorch .view(B,-1) flatten ->
    AdaptiveAvgPool1d -> Linear into a lane-dense tensor W3 (C_in, C_gate, H*W)
    plus bias (C_gate, 1), so z[b, c] = sum_{ci, p} x[b, ci, p]*W3[ci, c, p] + b[c].
    Call once per weight set (hoisted out of the per-forward path)."""
    C_out, C_in, _, _ = conv_w.shape
    Ho, Wo = H // KSIZE, W // KSIZE
    Cd, HC = t_w.shape
    pool = jnp.asarray(_adaptive_pool_matrix(C_out * Ho * Wo, HC))   # (C_out*P, HC)
    m1 = (pool @ t_w.T).reshape(C_out, Ho, Wo, Cd)                   # (C_out,Ho,Wo,Cd)
    # W3[ci, d, ho*K+kh, wo*K+kw] = sum_o conv_w[o, ci, kh, kw] * m1[o, ho, wo, d]
    w_full = jnp.einsum("ockl,oxyd->cdxkyl", conv_w, m1)             # (Ci,Cd,Ho,K,Wo,K)
    w3 = w_full.reshape(C_in, Cd, H * W).astype(jnp.float32)         # lane-dense
    b2 = t_b.reshape(Cd, 1).astype(jnp.float32)
    return w3, b2


# ---------------- forward (the concrete lambda) ----------------

def highway_gate_forward(x, y, w_folded, b_folded):
    B, C, H, W = x.shape
    HW = H * W

    # VMEM working set (sublane dim pads C -> 8): x, y, out + folded W (+ tiny bias).
    pad_c = -(-C // 8) * 8
    vmem_bytes = 4 * HW * (3 * B * pad_c + C * pad_c) + 4 * 8 * 128
    # TODO(synk): for shapes whose working set exceeds VMEM, fall back to a
    # K-tiled gate reduction + tiled elementwise-apply pipeline.
    assert vmem_bytes < 12 * 1024 * 1024, (
        f"fused highway gate needs ~{vmem_bytes} B of VMEM; add the tiled path")

    x3 = x.reshape(B, C, HW)   # contiguous reshape: free
    y3 = y.reshape(B, C, HW)

    out3 = pl.pallas_call(
        _fused_highway_kernel,
        out_shape=jax.ShapeDtypeStruct((B, C, HW), jnp.float32),
        in_specs=[
            pl.BlockSpec(memory_space=pltpu.MemorySpace.VMEM),   # x
            pl.BlockSpec(memory_space=pltpu.MemorySpace.VMEM),   # y
            pl.BlockSpec(memory_space=pltpu.MemorySpace.VMEM),   # folded W
            pl.BlockSpec(memory_space=pltpu.MemorySpace.VMEM),   # bias
        ],
        out_specs=pl.BlockSpec(memory_space=pltpu.MemorySpace.VMEM),
    )(x3, y3, w_folded, b_folded)
    return out3.reshape(B, C, H, W)


# ---------------- LambdaLayer equivalent ----------------

def lambda_layer_forward(x, lambd):
    """LambdaLayer.forward(x) == lambd(x)."""
    # TODO(synk): LambdaLayer wraps an arbitrary Python callable; only
    # JAX-traceable lambdas (like the Pallas-backed gate above) can be lowered.
    return lambd(x)


# ---------------- pure-JAX reference (for sanity check) ----------------

def highway_gate_ref(x, y, conv_w, t_w, t_b):
    B, C, H, W = x.shape
    HC = t_w.shape[1]
    xp = jax.lax.conv_general_dilated(
        x, conv_w, window_strides=(KSIZE, KSIZE), padding="VALID",
        dimension_numbers=("NCHW", "OIHW", "NCHW"))
    flat = xp.reshape(B, -1)
    pool = jnp.asarray(_adaptive_pool_matrix(flat.shape[1], HC))
    pooled = flat @ pool
    proj = pooled @ t_w.T + t_b
    g = (1.0 / (1.0 + jnp.exp(-proj)))[:, :, None, None]
    return x * g + (1.0 - g) * y


if __name__ == "__main__":
    B, C, H, W = 2, 4, 64, 64
    HC = max(C, 32)

    key = jax.random.PRNGKey(0)
    kx, ky, kc, kt = jax.random.split(key, 4)
    x = jax.random.normal(kx, (B, C, H, W), jnp.float32)
    y = jax.random.normal(ky, (B, C, H, W), jnp.float32)

    conv_w = jax.random.normal(kc, (C, C, KSIZE, KSIZE), jnp.float32) / math.sqrt(C * KSIZE * KSIZE)
    t_w = jax.random.normal(kt, (C, HC), jnp.float32) / math.sqrt(HC)   # Linear weight
    t_b = jnp.full((C,), -3.0, jnp.float32)                             # bias.fill_(-3.0)

    # Weight fold is hoisted out of the per-forward path (once per weight set).
    w3, b2 = fold_gate_params(conv_w, t_w, t_b, H, W)
    fwd = jax.jit(highway_gate_forward)

    # LambdaLayer wraps the Pallas-backed highway-gate lambda.
    lambd = lambda inp: fwd(inp, y, w3, b2)
    out = jax.block_until_ready(lambda_layer_forward(x, lambd))

    ref = highway_gate_ref(x, y, conv_w, t_w, t_b)
    assert out.shape == (B, C, H, W) and out.dtype == jnp.float32
    np.testing.assert_allclose(np.asarray(out), np.asarray(ref), rtol=1e-2, atol=1e-2)
    print("KERNEL_OK")
</pallas_src>

<mosaic_0001>
module attributes {stable_mosaic.version = 11 : i64} {
  func.func @_fused_highway_kernel(%arg0: memref<2x4x4096xf32, #tpu.memory_space<vmem>>, %arg1: memref<2x4x4096xf32, #tpu.memory_space<vmem>>, %arg2: memref<4x4x4096xf32, #tpu.memory_space<vmem>>, %arg3: memref<4x1xf32, #tpu.memory_space<vmem>>, %arg4: memref<2x4x4096xf32, #tpu.memory_space<vmem>>) attributes {dimension_semantics = [], scalar_prefetch = 0 : i64, scratch_operands = 0 : i64, tpu.core_type = #tpu.core_type<tc>} {
    %c0 = arith.constant 0 : index
    %c0_0 = arith.constant 0 : index
    %0 = vector.load %arg3[%c0, %c0_0] : memref<4x1xf32, #tpu.memory_space<vmem>>, vector<4x1xf32>
    %c0_1 = arith.constant 0 : index
    %c0_2 = arith.constant 0 : index
    %c0_3 = arith.constant 0 : index
    %1 = vector.load %arg0[%c0_1, %c0_2, %c0_3] : memref<2x4x4096xf32, #tpu.memory_space<vmem>>, vector<1x4x4096xf32>
    %2 = vector.shape_cast %1 : vector<1x4x4096xf32> to vector<4x4096xf32>
    %c0_4 = arith.constant 0 : index
    %c0_5 = arith.constant 0 : index
    %c0_6 = arith.constant 0 : index
    %3 = vector.load %arg1[%c0_4, %c0_5, %c0_6] : memref<2x4x4096xf32, #tpu.memory_space<vmem>>, vector<1x4x4096xf32>
    %4 = vector.shape_cast %3 : vector<1x4x4096xf32> to vector<4x4096xf32>
    %5 = vector.extract_strided_slice %2 {offsets = [0, 0], sizes = [1, 4096], strides = [1, 1]} : vector<4x4096xf32> to vector<1x4096xf32>
    %c0_7 = arith.constant 0 : index
    %c0_8 = arith.constant 0 : index
    %c0_9 = arith.constant 0 : index
    %6 = vector.load %arg2[%c0_7, %c0_8, %c0_9] : memref<4x4x4096xf32, #tpu.memory_space<vmem>>, vector<1x4x4096xf32>
    %7 = vector.shape_cast %6 : vector<1x4x4096xf32> to vector<4x4096xf32>
    %8 = vector.broadcast %5 : vector<1x4096xf32> to vector<4x4096xf32>
    %9 = arith.mulf %8, %7 : vector<4x4096xf32>
    %10 = vector.extract_strided_slice %2 {offsets = [1, 0], sizes = [1, 4096], strides = [1, 1]} : vector<4x4096xf32> to vector<1x4096xf32>
    %c1 = arith.constant 1 : index
    %c0_10 = arith.constant 0 : index
    %c0_11 = arith.constant 0 : index
    %11 = vector.load %arg2[%c1, %c0_10, %c0_11] : memref<4x4x4096xf32, #tpu.memory_space<vmem>>, vector<1x4x4096xf32>
    %12 = vector.shape_cast %11 : vector<1x4x4096xf32> to vector<4x4096xf32>
    %13 = vector.broadcast %10 : vector<1x4096xf32> to vector<4x4096xf32>
    %14 = arith.mulf %13, %12 : vector<4x4096xf32>
    %15 = arith.addf %9, %14 : vector<4x4096xf32>
    %16 = vector.extract_strided_slice %2 {offsets = [2, 0], sizes = [1, 4096], strides = [1, 1]} : vector<4x4096xf32> to vector<1x4096xf32>
    %c2 = arith.constant 2 : index
    %c0_12 = arith.constant 0 : index
    %c0_13 = arith.constant 0 : index
    %17 = vector.load %arg2[%c2, %c0_12, %c0_13] : memref<4x4x4096xf32, #tpu.memory_space<vmem>>, vector<1x4x4096xf32>
    %18 = vector.shape_cast %17 : vector<1x4x4096xf32> to vector<4x4096xf32>
    %19 = vector.broadcast %16 : vector<1x4096xf32> to vector<4x4096xf32>
    %20 = arith.mulf %19, %18 : vector<4x4096xf32>
    %21 = arith.addf %15, %20 : vector<4x4096xf32>
    %22 = vector.extract_strided_slice %2 {offsets = [3, 0], sizes = [1, 4096], strides = [1, 1]} : vector<4x4096xf32> to vector<1x4096xf32>
    %c3 = arith.constant 3 : index
    %c0_14 = arith.constant 0 : index
    %c0_15 = arith.constant 0 : index
    %23 = vector.load %arg2[%c3, %c0_14, %c0_15] : memref<4x4x4096xf32, #tpu.memory_space<vmem>>, vector<1x4x4096xf32>
    %24 = vector.shape_cast %23 : vector<1x4x4096xf32> to vector<4x4096xf32>
    %25 = vector.broadcast %22 : vector<1x4096xf32> to vector<4x4096xf32>
    %26 = arith.mulf %25, %24 : vector<4x4096xf32>
    %27 = arith.addf %21, %26 : vector<4x4096xf32>
    %cst = arith.constant dense<0.000000e+00> : vector<4xf32>
    %28 = vector.multi_reduction <add>, %27, %cst [1] : vector<4x4096xf32> to vector<4xf32>
    %29 = vector.shape_cast %28 : vector<4xf32> to vector<4x1xf32>
    %30 = arith.addf %29, %0 : vector<4x1xf32>
    %cst_16 = arith.constant 0.000000e+00 : f32
    %31 = vector.broadcast %cst_16 : f32 to vector<4x1xf32>
    %32 = arith.subf %31, %30 : vector<4x1xf32>
    %33 = math.exp %32 : vector<4x1xf32>
    %cst_17 = arith.constant 1.000000e+00 : f32
    %34 = vector.broadcast %cst_17 : f32 to vector<4x1xf32>
    %35 = arith.addf %34, %33 : vector<4x1xf32>
    %cst_18 = arith.constant 1.000000e+00 : f32
    %36 = vector.broadcast %cst_18 : f32 to vector<4x1xf32>
    %37 = arith.divf %36, %35 : vector<4x1xf32>
    %38 = arith.subf %2, %4 : vector<4x4096xf32>
    %39 = vector.broadcast %37 : vector<4x1xf32> to vector<4x4096xf32>
    %40 = arith.mulf %39, %38 : vector<4x4096xf32>
    %41 = arith.addf %4, %40 : vector<4x4096xf32>
    %c0_19 = arith.constant 0 : index
    %c0_20 = arith.constant 0 : index
    %c0_21 = arith.constant 0 : index
    %42 = vector.load %arg4[%c0_19, %c0_20, %c0_21] : memref<2x4x4096xf32, #tpu.memory_space<vmem>>, vector<1x4x4096xf32>
    %43 = vector.shape_cast %42 : vector<1x4x4096xf32> to vector<4x4096xf32>
    %44 = vector.shape_cast %41 : vector<4x4096xf32> to vector<1x4x4096xf32>
    tpu.vector_store %arg4[%c0_19, %c0_20, %c0_21], %44 {strides = array<i32>} : memref<2x4x4096xf32, #tpu.memory_space<vmem>>, vector<1x4x4096xf32>,
    %c1_22 = arith.constant 1 : index
    %c0_23 = arith.constant 0 : index
    %c0_24 = arith.constant 0 : index
    %45 = vector.load %arg0[%c1_22, %c0_23, %c0_24] : memref<2x4x4096xf32, #tpu.memory_space<vmem>>, vector<1x4x4096xf32>
    %46 = vector.shape_cast %45 : vector<1x4x4096xf32> to vector<4x4096xf32>
    %c1_25 = arith.constant 1 : index
    %c0_26 = arith.constant 0 : index
    %c0_27 = arith.constant 0 : index
    %47 = vector.load %arg1[%c1_25, %c0_26, %c0_27] : memref<2x4x4096xf32, #tpu.memory_space<vmem>>, vector<1x4x4096xf32>
    %48 = vector.shape_cast %47 : vector<1x4x4096xf32> to vector<4x4096xf32>
    %49 = vector.extract_strided_slice %46 {offsets = [0, 0], sizes = [1, 4096], strides = [1, 1]} : vector<4x4096xf32> to vector<1x4096xf32>
    %c0_28 = arith.constant 0 : index
    %c0_29 = arith.constant 0 : index
    %c0_30 = arith.constant 0 : index
    %50 = vector.load %arg2[%c0_28, %c0_29, %c0_30] : memref<4x4x4096xf32, #tpu.memory_space<vmem>>, vector<1x4x4096xf32>
    %51 = vector.shape_cast %50 : vector<1x4x4096xf32> to vector<4x4096xf32>
    %52 = vector.broadcast %49 : vector<1x4096xf32> to vector<4x4096xf32>
    %53 = arith.mulf %52, %51 : vector<4x4096xf32>
    %54 = vector.extract_strided_slice %46 {offsets = [1, 0], sizes = [1, 4096], strides = [1, 1]} : vector<4x4096xf32> to vector<1x4096xf32>
    %c1_31 = arith.constant 1 : index
    %c0_32 = arith.constant 0 : index
    %c0_33 = arith.constant 0 : index
    %55 = vector.load %arg2[%c1_31, %c0_32, %c0_33] : memref<4x4x4096xf32, #tpu.memory_space<vmem>>, vector<1x4x4096xf32>
    %56 = vector.shape_cast %55 : vector<1x4x4096xf32> to vector<4x4096xf32>
    %57 = vector.broadcast %54 : vector<1x4096xf32> to vector<4x4096xf32>
    %58 = arith.mulf %57, %56 : vector<4x4096xf32>
    %59 = arith.addf %53, %58 : vector<4x4096xf32>
    %60 = vector.extract_strided_slice %46 {offsets = [2, 0], sizes = [1, 4096], strides = [1, 1]} : vector<4x4096xf32> to vector<1x4096xf32>
    %c2_34 = arith.constant 2 : index
    %c0_35 = arith.constant 0 : index
    %c0_36 = arith.constant 0 : index
    %61 = vector.load %arg2[%c2_34, %c0_35, %c0_36] : memref<4x4x4096xf32, #tpu.memory_space<vmem>>, vector<1x4x4096xf32>
    %62 = vector.shape_cast %61 : vector<1x4x4096xf32> to vector<4x4096xf32>
    %63 = vector.broadcast %60 : vector<1x4096xf32> to vector<4x4096xf32>
    %64 = arith.mulf %63, %62 : vector<4x4096xf32>
    %65 = arith.addf %59, %64 : vector<4x4096xf32>
    %66 = vector.extract_strided_slice %46 {offsets = [3, 0], sizes = [1, 4096], strides = [1, 1]} : vector<4x4096xf32> to vector<1x4096xf32>
    %c3_37 = arith.constant 3 : index
    %c0_38 = arith.constant 0 : index
    %c0_39 = arith.constant 0 : index
    %67 = vector.load %arg2[%c3_37, %c0_38, %c0_39] : memref<4x4x4096xf32, #tpu.memory_space<vmem>>, vector<1x4x4096xf32>
    %68 = vector.shape_cast %67 : vector<1x4x4096xf32> to vector<4x4096xf32>
    %69 = vector.broadcast %66 : vector<1x4096xf32> to vector<4x4096xf32>
    %70 = arith.mulf %69, %68 : vector<4x4096xf32>
    %71 = arith.addf %65, %70 : vector<4x4096xf32>
    %cst_40 = arith.constant dense<0.000000e+00> : vector<4xf32>
    %72 = vector.multi_reduction <add>, %71, %cst_40 [1] : vector<4x4096xf32> to vector<4xf32>
    %73 = vector.shape_cast %72 : vector<4xf32> to vector<4x1xf32>
    %74 = arith.addf %73, %0 : vector<4x1xf32>
    %cst_41 = arith.constant 0.000000e+00 : f32
    %75 = vector.broadcast %cst_41 : f32 to vector<4x1xf32>
    %76 = arith.subf %75, %74 : vector<4x1xf32>
    %77 = math.exp %76 : vector<4x1xf32>
    %cst_42 = arith.constant 1.000000e+00 : f32
    %78 = vector.broadcast %cst_42 : f32 to vector<4x1xf32>
    %79 = arith.addf %78, %77 : vector<4x1xf32>
    %cst_43 = arith.constant 1.000000e+00 : f32
    %80 = vector.broadcast %cst_43 : f32 to vector<4x1xf32>
    %81 = arith.divf %80, %79 : vector<4x1xf32>
    %82 = arith.subf %46, %48 : vector<4x4096xf32>
    %83 = vector.broadcast %81 : vector<4x1xf32> to vector<4x4096xf32>
    %84 = arith.mulf %83, %82 : vector<4x4096xf32>
    %85 = arith.addf %48, %84 : vector<4x4096xf32>
    %c1_44 = arith.constant 1 : index
    %c0_45 = arith.constant 0 : index
    %c0_46 = arith.constant 0 : index
    %86 = vector.load %arg4[%c1_44, %c0_45, %c0_46] : memref<2x4x4096xf32, #tpu.memory_space<vmem>>, vector<1x4x4096xf32>
    %87 = vector.shape_cast %86 : vector<1x4x4096xf32> to vector<4x4096xf32>
    %88 = vector.shape_cast %85 : vector<4x4096xf32> to vector<1x4x4096xf32>
    tpu.vector_store %arg4[%c1_44, %c0_45, %c0_46], %88 {strides = array<i32>} : memref<2x4x4096xf32, #tpu.memory_space<vmem>>, vector<1x4x4096xf32>,
    return
  }
}

</mosaic_0001>

<bundles_post_ra>
// kernel: highway_gate_forward.1
= control target key start
LH: loop header
LB: loop body
LE: loop exit
PB: predicated region body
PF: predicated region fallthrough
CT: control target
= control target key end

     0   :  { %v82_v0 = vlaneseq  ;;  %vm1701_vm0 = vcmask 1043456   ;;  %s7132_s0 = inlined_call_operand.vmem [shape: f32[2,4,4096], index: 0, kind: input, shape index: {}]   ;;  %s7133_s2 = inlined_call_operand.vmem [shape: f32[4,4,4096], index: 2, kind: input, shape index: {}]   ;;  %s7134_s3 = inlined_call_operand.vmem [shape: f32[4,1], index: 3, kind: input, shape index: {}]   ;;  %s7135_s1 = inlined_call_operand.vmem [shape: f32[2,4,4096], index: 1, kind: input, shape index: {}]   ;;  %s7136_s4 = inlined_call_operand.vmem [shape: f32[2,4,4096], index: 4, kind: output, shape index: {}]  }
   0x1   :  { %v4288_v4 = vld [vmem:[%s7132_s0] sm:$0xff]  ;;  %v4293_v5 = vld [vmem:[%s7132_s0 + $0x8] sm:$0xff]  ;;  %v4298_v6 = vld [vmem:[%s7132_s0 + $0x10] sm:$0xff] }
   0x2   :  { %v4277_v1 = vshrl.u32 %v82_v0, 7  ;;  %7291 = vst [vmem:[#allocation5_spill] sm:$0xff] %v4288_v4  ;;  %7292 = vst [vmem:[#allocation6_spill] sm:$0xff] %v4293_v5  ;;  %v4303_v7 = vld [vmem:[%s7132_s0 + $0x18] sm:$0xff]  ;;  %v4308_v8 = vld [vmem:[%s7132_s0 + $0x20] sm:$0xff] }
   0x3   :  { %7293 = vst [vmem:[#allocation7_spill] sm:$0xff] %v4298_v6  ;;  %7294 = vst [vmem:[#allocation8_spill] sm:$0xff] %v4303_v7  ;;  %v4319_v11 = vld [vmem:[%s7132_s0 + $0x28] sm:$0xff]  ;;  %v4324_v12 = vld [vmem:[%s7132_s0 + $0x30] sm:$0xff] }
   0x4   :  { %7288 = vst [vmem:[#allocation2_spill] sm:$0xff] %v4277_v1  ;;  %v4280_v2 = vsub.s32 0, %v4277_v1  ;;  %v4283_v3 = vsub.s32 4, %v4277_v1  ;;  %7295 = vst [vmem:[#allocation9_spill] sm:$0xff] %v4308_v8  ;;  %v4311_v9 = vsub.s32 1, %v4277_v1  ;;  %v4314_v10 = vsub.s32 5, %v4277_v1 }
   0x5   :  { %7298 = vst [vmem:[#allocation12_spill] sm:$0xff] %v4319_v11  ;;  %7299 = vst [vmem:[#allocation13_spill] sm:$0xff] %v4324_v12  ;;  %v4331_v15 = vsub.s32 2, %v4277_v1  ;;  %v4334_v16 = vsub.s32 6, %v4277_v1  ;;  %v4339_v17 = vld [vmem:[%s7132_s0 + $0x38] sm:$0xff]  ;;  %v4344_v18 = vld [vmem:[%s7132_s0 + $0x40] sm:$0xff] }
   0x6   :  { %7289 = vst [vmem:[#allocation3_spill] sm:$0xff] %v4280_v2  ;;  %7290 = vst [vmem:[#allocation4_spill] sm:$0xff] %v4283_v3  ;;  %v85_v13 = vrot.slane %v4288_v4, %v4280_v2  ;;  %v89_v14 = vrot.slane %v4288_v4, %v4283_v3  ;;  %v93_v19 = vrot.slane %v4293_v5, %v4280_v2  ;;  %v4357_v23 = vld [vmem:[%s7132_s0 + $0x48] sm:$0xff]  ;;  %v4362_v24 = vld [vmem:[%s7132_s0 + $0x50] sm:$0xff] }
   0x7   :  { %7296 = vst [vmem:[#allocation10_spill] sm:$0xff] %v4311_v9  ;;  %7297 = vst [vmem:[#allocation11_spill] sm:$0xff] %v4314_v10  ;;  %v97_v20 = vrot.slane %v4293_v5, %v4283_v3  ;;  %v101_v21 = vrot.slane %v4298_v6, %v4280_v2  ;;  %v105_v22 = vrot.slane %v4298_v6, %v4283_v3  ;;  %v4375_v29 = vld [vmem:[%s7132_s0 + $0x58] sm:$0xff]  ;;  %v4380_v30 = vld [vmem:[%s7132_s0 + $0x60] sm:$0xff] }
   0x8   :  { %7300 = vst [vmem:[#allocation14_spill] sm:$0xff] %v4331_v15  ;;  %7301 = vst [vmem:[#allocation15_spill] sm:$0xff] %v4334_v16  ;;  %v109_v25 = vrot.slane %v4303_v7, %v4280_v2  ;;  %v113_v26 = vrot.slane %v4303_v7, %v4283_v3  ;;  %v117_v27 = vrot.slane %v4308_v8, %v4280_v2  ;;  %v4393_v35 = vld [vmem:[%s7132_s0 + $0x68] sm:$0xff]  ;;  %v4398_v36 = vld [vmem:[%s7132_s0 + $0x70] sm:$0xff] }
   0x9   :  { %7302 = vst [vmem:[#allocation16_spill] sm:$0xff] %v4339_v17  ;;  %7303 = vst [vmem:[#allocation17_spill] sm:$0xff] %v4344_v18  ;;  %v121_v28 = vrot.slane %v4308_v8, %v4283_v3  ;;  %v125_v31 = vrot.slane %v4319_v11, %v4280_v2  ;;  %v129_v32 = vrot.slane %v4319_v11, %v4283_v3  ;;  %v4411_v41 = vld [vmem:[%s7132_s0 + $0x78] sm:$0xff]  ;;  %v56_v1 = vld [vmem:[%s7133_s2 + $0x30] sm:$0xff] }
   0xa   :  { %7304 = vst [vmem:[#allocation18_spill] sm:$0xff] %v4357_v23  ;;  %7305 = vst [vmem:[#allocation19_spill] sm:$0xff] %v4362_v24  ;;  %v133_v33 = vrot.slane %v4324_v12, %v4280_v2  ;;  %v137_v34 = vrot.slane %v4324_v12, %v4283_v3  ;;  %v141_v37 = vrot.slane %v4339_v17, %v4280_v2  ;;  %v57_v16 = vld [vmem:[%s7133_s2 + $0x38] sm:$0xff]  ;;  %v58_v15 = vld [vmem:[%s7133_s2 + $0x40] sm:$0xff] }
   0xb   :  { %7306 = vst [vmem:[#allocation20_spill] sm:$0xff] %v4375_v29  ;;  %7307 = vst [vmem:[#allocation21_spill] sm:$0xff] %v4380_v30  ;;  %v145_v38 = vrot.slane %v4339_v17, %v4283_v3  ;;  %v149_v39 = vrot.slane %v4344_v18, %v4280_v2  ;;  %v153_v40 = vrot.slane %v4344_v18, %v4283_v3 }
   0xc   :  { %7308 = vst [vmem:[#allocation22_spill] sm:$0xff] %v4393_v35  ;;  %7309 = vst [vmem:[#allocation23_spill] sm:$0xff] %v4398_v36  ;;  %v157_v42 = vrot.slane %v4357_v23, %v4280_v2  ;;  %v161_v43 = vrot.slane %v4357_v23, %v4283_v3  ;;  %v165_v44 = vrot.slane %v4362_v24, %v4280_v2  ;;  %v65_v23 = vld [vmem:[%s7133_s2 + $0x78] sm:$0xff] }
   0xd   :  { %7310 = vst [vmem:[#allocation24_spill] sm:$0xff] %v4411_v41  ;;  %v169_v45 = vrot.slane %v4362_v24, %v4283_v3  ;;  %v173_v46 = vrot.slane %v4375_v29, %v4280_v2  ;;  %v177_v47 = vrot.slane %v4375_v29, %v4283_v3  ;;  %v181_v48 = vrot.slane %v4380_v30, %v4280_v2  ;;  %v63_v29 = vld [vmem:[%s7133_s2 + $0x68] sm:$0xff] }
   0xe   :  { %v185_v49 = vrot.slane %v4380_v30, %v4283_v3  ;;  %v189_v50 = vrot.slane %v4393_v35, %v4280_v2  ;;  %v193_v51 = vrot.slane %v4393_v35, %v4283_v3  ;;  %v197_v52 = vrot.slane %v4398_v36, %v4280_v2  ;;  %v61_v35 = vld [vmem:[%s7133_s2 + $0x58] sm:$0xff]  ;;  %v62_v30 = vld [vmem:[%s7133_s2 + $0x60] sm:$0xff] }
   0xf   :  { %v201_v53 = vrot.slane %v4398_v36, %v4283_v3  ;;  %v205_v54 = vrot.slane %v4411_v41, %v4280_v2  ;;  %v209_v55 = vrot.slane %v4411_v41, %v4283_v3  ;;  %v4442_v56 = vrot.slane %v85_v13, %v4280_v2  ;;  %v55_v3 = vld [vmem:[%s7133_s2 + $0x28] sm:$0xff]  ;;  %v60_v36 = vld [vmem:[%s7133_s2 + $0x50] sm:$0xff] }
  0x10   :  { %v4445_v57 = vrot.slane %v89_v14, %v4280_v2  ;;  %v4448_v58 = vrot.slane %v93_v19, %v4280_v2  ;;  %v4451_v59 = vrot.slane %v97_v20, %v4280_v2  ;;  %v4454_v60 = vrot.slane %v101_v21, %v4280_v2  ;;  %v59_v41 = vld [vmem:[%s7133_s2 + $0x48] sm:$0xff] }
  0x11   :  { %v4457_v61 = vrot.slane %v105_v22, %v4280_v2  ;;  %v4460_v62 = vrot.slane %v109_v25, %v4280_v2  ;;  %v4463_v63 = vrot.slane %v113_v26, %v4280_v2  ;;  %v4466_v0 = vrot.slane %v117_v27, %v4280_v2  ;;  %v50_v22 = vld [vmem:[%s7133_s2] sm:$0xff]  ;;  %v51_v25 = vld [vmem:[%s7133_s2 + $0x8] sm:$0xff] }
  0x12   :  { %v4469_v13 = vrot.slane %v121_v28, %v4280_v2  ;;  %v4472_v14 = vrot.slane %v125_v31, %v4280_v2  ;;  %v4475_v19 = vrot.slane %v129_v32, %v4280_v2  ;;  %v4478_v20 = vrot.slane %v133_v33, %v4280_v2  ;;  %v52_v32 = vld [vmem:[%s7133_s2 + $0x10] sm:$0xff]  ;;  %v53_v33 = vld [vmem:[%s7133_s2 + $0x18] sm:$0xff] }
  0x13   :  { %7311 = vst [vmem:[#allocation25_spill] sm:$0xff] %v4463_v63  ;;  %7312 = vst [vmem:[#allocation26_spill] sm:$0xff] %v4466_v0  ;;  %v4481_v21 = vrot.slane %v137_v34, %v4280_v2  ;;  %v301_v26 = vrot.slane %v141_v37, %v4280_v2  ;;  %v305_v27 = vrot.slane %v145_v38, %v4280_v2  ;;  %v54_v34 = vld [vmem:[%s7133_s2 + $0x20] sm:$0xff] }
  0x14   :  { %7313 = vst [vmem:[#allocation27_spill] sm:$0xff] %v4469_v13  ;;  %7314 = vst [vmem:[#allocation28_spill] sm:$0xff] %v4472_v14  ;;  %v309_v28 = vrot.slane %v149_v39, %v4280_v2  ;;  %v313_v31 = vrot.slane %v153_v40, %v4280_v2  ;;  %v317_v37 = vrot.slane %v157_v42, %v4280_v2 }
  0x15   :  { %7315 = vst [vmem:[#allocation29_spill] sm:$0xff] %v4475_v19  ;;  %7316 = vst [vmem:[#allocation30_spill] sm:$0xff] %v4478_v20  ;;  %v321_v38 = vrot.slane %v161_v43, %v4280_v2  ;;  %v325_v39 = vrot.slane %v165_v44, %v4280_v2  ;;  %v329_v40 = vrot.slane %v169_v45, %v4280_v2 }
  0x16   :  { %7317 = vst [vmem:[#allocation31_spill] sm:$0xff] %v4481_v21  ;;  %v333_v42 = vrot.slane %v173_v46, %v4280_v2  ;;  %v337_v43 = vrot.slane %v177_v47, %v4280_v2  ;;  %v341_v44 = vrot.slane %v181_v48, %v4280_v2  ;;  %v345_v45 = vrot.slane %v185_v49, %v4280_v2 }
  0x17   :  { %v349_v46 = vrot.slane %v189_v50, %v4280_v2  ;;  %v353_v47 = vrot.slane %v193_v51, %v4280_v2  ;;  %v357_v48 = vrot.slane %v197_v52, %v4280_v2  ;;  %v361_v49 = vrot.slane %v201_v53, %v4280_v2  ;;  %v64_v53 = vld [vmem:[%s7133_s2 + $0x70] sm:$0xff] }
  0x18   :  { %v365_v50 = vrot.slane %v205_v54, %v4280_v2  ;;  %v369_v51 = vrot.slane %v209_v55, %v4280_v2  ;;  %v386_v24 = vcombine.high %v50_v22, %v50_v22  ;;  %v387_v52 = vcombine.high %v51_v25, %v51_v25 }
  0x19   :  { %v388_v18 = vcombine.high %v52_v32, %v52_v32  ;;  %v389_v17 = vcombine.high %v53_v33, %v53_v33  ;;  %v390_v12 = vcombine.high %v54_v34, %v54_v34  ;;  %v391_v11 = vcombine.high %v55_v3, %v55_v3 }
  0x1a   :  { %v392_v8 = vcombine.high %v56_v1, %v56_v1  ;;  %v393_v7 = vcombine.high %v57_v16, %v57_v16  ;;  %v394_v6 = vcombine.high %v58_v15, %v58_v15  ;;  %v395_v54 = vcombine.high %v59_v41, %v59_v41 }
  0x1b   :  { %v396_v5 = vcombine.high %v60_v36, %v60_v36  ;;  %v397_v55 = vcombine.high %v61_v35, %v61_v35  ;;  %v398_v2 = vcombine.high %v62_v30, %v62_v30  ;;  %v399_v10 = vcombine.high %v63_v29, %v63_v29 }
  0x1c   :  { %v400_v4 = vcombine.high %v64_v53, %v64_v53  ;;  %v401_v9 = vcombine.high %v65_v23, %v65_v23  ;;  %v4550_v21 = vmul.f32 %v4442_v56, %v50_v22  ;;  %v4553_v20 = vmul.f32 %v386_v24, %v4445_v57  ;;  %v7325_v56 = vld [vmem:[#allocation25_spill] sm:$0xff]  ;;  %v7327_v24 = vld [vmem:[#allocation26_spill] sm:$0xff] }
  0x1d   :  { %v4556_v19 = vmul.f32 %v4448_v58, %v51_v25  ;;  %v4559_v14 = vmul.f32 %v387_v52, %v4451_v59  ;;  %v4562_v13 = vmul.f32 %v4454_v60, %v52_v32  ;;  %v4565_v0 = vmul.f32 %v388_v18, %v4457_v61  ;;  %v7329_v58 = vld [vmem:[#allocation27_spill] sm:$0xff]  ;;  %v7331_v59 = vld [vmem:[#allocation28_spill] sm:$0xff]  ;;  %v7333_v60 = vld [vmem:[#allocation29_spill] sm:$0xff] }
  0x1e   :  { %7318 = vst [vmem:[#allocation32_spill] sm:$0xff] %v4550_v21  ;;  %7319 = vst [vmem:[#allocation33_spill] sm:$0xff] %v4553_v20  ;;  %v4568_v63 = vmul.f32 %v4460_v62, %v53_v33  ;;  %v4571_v22 = vmul.f32 %v389_v17, %v7325_v56  ;;  %v4574_v57 = vmul.f32 %v7327_v24, %v54_v34  ;;  %v7335_v18 = vld [vmem:[#allocation30_spill] sm:$0xff]  ;;  %v7337_v62 = vld [vmem:[#allocation31_spill] sm:$0xff] }
  0x1f   :  { %7320 = vst [vmem:[#allocation34_spill] sm:$0xff] %v4556_v19  ;;  %7321 = vst [vmem:[#allocation35_spill] sm:$0xff] %v4559_v14  ;;  %v4577_v25 = vmul.f32 %v390_v12, %v7329_v58  ;;  %v4580_v52 = vmul.f32 %v7331_v59, %v55_v3  ;;  %v4583_v32 = vmul.f32 %v391_v11, %v7333_v60  ;;  %v7368_v60 = vld [vmem:[#allocation18_spill] sm:$0xff] }
  0x20   :  { %7322 = vst [vmem:[#allocation36_spill] sm:$0xff] %v4562_v13  ;;  %7323 = vst [vmem:[#allocation37_spill] sm:$0xff] %v4565_v0  ;;  %v4586_v61 = vmul.f32 %v7335_v18, %v56_v1  ;;  %v4589_v33 = vmul.f32 %v392_v8, %v7337_v62  ;;  %v4591_v17 = vmul.f32 %v301_v26, %v57_v16 }
  0x21   :  { %7324 = vst [vmem:[#allocation38_spill] sm:$0xff] %v4568_v63  ;;  %7326 = vst [vmem:[#allocation25_spill] sm:$0xff] %v4571_v22  ;;  %v4593_v56 = vmul.f32 %v393_v7, %v305_v27  ;;  %v4595_v34 = vmul.f32 %v309_v28, %v58_v15  ;;  %v4597_v12 = vmul.f32 %v394_v6, %v313_v31  ;;  %v7358_v27 = vld [vmem:[#allocation5_spill] sm:$0xff]  ;;  %v7359_v31 = vld [vmem:[#allocation11_spill] sm:$0xff] }
  0x22   :  { %7328 = vst [vmem:[#allocation26_spill] sm:$0xff] %v4574_v57  ;;  %7330 = vst [vmem:[#allocation27_spill] sm:$0xff] %v4577_v25  ;;  %v4599_v24 = vmul.f32 %v317_v37, %v59_v41  ;;  %v4601_v3 = vmul.f32 %v395_v54, %v321_v38  ;;  %v4603_v11 = vmul.f32 %v325_v39, %v60_v36  ;;  %v7361_v37 = vld [vmem:[#allocation7_spill] sm:$0xff]  ;;  %v7367_v54 = vld [vmem:[#allocation17_spill] sm:$0xff] }
  0x23   :  { %7332 = vst [vmem:[#allocation28_spill] sm:$0xff] %v4580_v52  ;;  %7334 = vst [vmem:[#allocation29_spill] sm:$0xff] %v4583_v32  ;;  %v4605_v58 = vmul.f32 %v396_v5, %v329_v40  ;;  %v4607_v1 = vmul.f32 %v333_v42, %v61_v35  ;;  %v4609_v8 = vmul.f32 %v397_v55, %v337_v43  ;;  %v7357_v35 = vld [vmem:[#allocation10_spill] sm:$0xff]  ;;  %v7363_v40 = vld [vmem:[#allocation9_spill] sm:$0xff] }
  0x24   :  { %7336 = vst [vmem:[#allocation30_spill] sm:$0xff] %v4586_v61  ;;  %7338 = vst [vmem:[#allocation31_spill] sm:$0xff] %v4589_v33  ;;  %v4611_v16 = vmul.f32 %v341_v44, %v62_v30  ;;  %v4613_v7 = vmul.f32 %v398_v2, %v345_v45  ;;  %v4615_v15 = vmul.f32 %v349_v46, %v63_v29  ;;  %v7360_v2 = vld [vmem:[#allocation6_spill] sm:$0xff]  ;;  %v7364_v44 = vld [vmem:[#allocation12_spill] sm:$0xff] }
  0x25   :  { %7339 = vst [vmem:[#allocation39_spill] sm:$0xff] %v4591_v17  ;;  %7340 = vst [vmem:[#allocation40_spill] sm:$0xff] %v4593_v56  ;;  %v4617_v6 = vmul.f32 %v399_v10, %v353_v47  ;;  %v4619_v41 = vmul.f32 %v357_v48, %v64_v53  ;;  %v4621_v26 = vmul.f32 %v400_v4, %v361_v49  ;;  %v7365_v47 = vld [vmem:[#allocation13_spill] sm:$0xff]  ;;  %v3939_v17 = vld [vmem:[%s7133_s2 + $0xe0] sm:$0xff] }
  0x26   :  { %7341 = vst [vmem:[#allocation41_spill] sm:$0xff] %v4595_v34  ;;  %7342 = vst [vmem:[#allocation42_spill] sm:$0xff] %v4597_v12  ;;  %v4623_v36 = vmul.f32 %v365_v50, %v65_v23  ;;  %v4625_v5 = vmul.f32 %v401_v9, %v369_v51  ;;  %v470_v28 = vrot.slane %v7358_v27, %v7357_v35  ;;  %v7362_v9 = vld [vmem:[#allocation8_spill] sm:$0xff]  ;;  %v3936_v12 = vld [vmem:[%s7133_s2 + $0xc8] sm:$0xff] }
  0x27   :  { %7343 = vst [vmem:[#allocation43_spill] sm:$0xff] %v4599_v24  ;;  %7344 = vst [vmem:[#allocation44_spill] sm:$0xff] %v4601_v3  ;;  %v474_v30 = vrot.slane %v7358_v27, %v7359_v31  ;;  %v478_v29 = vrot.slane %v7360_v2, %v7357_v35  ;;  %v482_v10 = vrot.slane %v7360_v2, %v7359_v31  ;;  %v7366_v50 = vld [vmem:[#allocation16_spill] sm:$0xff]  ;;  %v3934_v3 = vld [vmem:[%s7133_s2 + $0xb8] sm:$0xff] }
  0x28   :  { %7345 = vst [vmem:[#allocation45_spill] sm:$0xff] %v4603_v11  ;;  %7346 = vst [vmem:[#allocation46_spill] sm:$0xff] %v4605_v58  ;;  %v486_v4 = vrot.slane %v7361_v37, %v7357_v35  ;;  %v490_v23 = vrot.slane %v7361_v37, %v7359_v31  ;;  %v494_v38 = vrot.slane %v7362_v9, %v7357_v35  ;;  %v3932_v58 = vld [vmem:[%s7133_s2 + $0xa8] sm:$0xff]  ;;  %v3933_v11 = vld [vmem:[%s7133_s2 + $0xb0] sm:$0xff] }
  0x29   :  { %7347 = vst [vmem:[#allocation47_spill] sm:$0xff] %v4607_v1  ;;  %7348 = vst [vmem:[#allocation48_spill] sm:$0xff] %v4609_v8  ;;  %v498_v39 = vrot.slane %v7362_v9, %v7359_v31  ;;  %v502_v42 = vrot.slane %v7363_v40, %v7357_v35  ;;  %v506_v43 = vrot.slane %v7363_v40, %v7359_v31  ;;  %v3931_v1 = vld [vmem:[%s7133_s2 + $0xa0] sm:$0xff]  ;;  %v3937_v34 = vld [vmem:[%s7133_s2 + $0xd0] sm:$0xff] }
  0x2a   :  { %7349 = vst [vmem:[#allocation49_spill] sm:$0xff] %v4611_v16  ;;  %7350 = vst [vmem:[#allocation50_spill] sm:$0xff] %v4613_v7  ;;  %v510_v45 = vrot.slane %v7364_v44, %v7357_v35  ;;  %v514_v46 = vrot.slane %v7364_v44, %v7359_v31  ;;  %v518_v48 = vrot.slane %v7365_v47, %v7357_v35  ;;  %v3935_v24 = vld [vmem:[%s7133_s2 + $0xc0] sm:$0xff]  ;;  %v3938_v56 = vld [vmem:[%s7133_s2 + $0xd8] sm:$0xff] }
  0x2b   :  { %7351 = vst [vmem:[#allocation51_spill] sm:$0xff] %v4615_v15  ;;  %7352 = vst [vmem:[#allocation52_spill] sm:$0xff] %v4617_v6  ;;  %v522_v49 = vrot.slane %v7365_v47, %v7359_v31  ;;  %v526_v51 = vrot.slane %v7366_v50, %v7357_v35  ;;  %v530_v53 = vrot.slane %v7366_v50, %v7359_v31  ;;  %v7369_v47 = vld [vmem:[#allocation19_spill] sm:$0xff]  ;;  %v7370_v50 = vld [vmem:[#allocation20_spill] sm:$0xff] }
  0x2c   :  { %7353 = vst [vmem:[#allocation53_spill] sm:$0xff] %v4619_v41  ;;  %7354 = vst [vmem:[#allocation54_spill] sm:$0xff] %v4621_v26  ;;  %v534_v55 = vrot.slane %v7367_v54, %v7357_v35  ;;  %v538_v59 = vrot.slane %v7367_v54, %v7359_v31  ;;  %v542_v18 = vrot.slane %v7368_v60, %v7357_v35  ;;  %v7371_v54 = vld [vmem:[#allocation21_spill] sm:$0xff]  ;;  %v3940_v33 = vld [vmem:[%s7133_s2 + $0xe8] sm:$0xff] }
  0x2d   :  { %7355 = vst [vmem:[#allocation55_spill] sm:$0xff] %v4623_v36  ;;  %7356 = vst [vmem:[#allocation56_spill] sm:$0xff] %v4625_v5  ;;  %v546_v62 = vrot.slane %v7368_v60, %v7359_v31  ;;  %v550_v44 = vrot.slane %v7369_v47, %v7357_v35  ;;  %v554_v40 = vrot.slane %v7369_v47, %v7359_v31  ;;  %v7372_v60 = vld [vmem:[#allocation22_spill] sm:$0xff]  ;;  %v7373_v47 = vld [vmem:[#allocation23_spill] sm:$0xff] }
  0x2e   :  { %v558_v9 = vrot.slane %v7370_v50, %v7357_v35  ;;  %v562_v37 = vrot.slane %v7370_v50, %v7359_v31  ;;  %v566_v2 = vrot.slane %v7371_v54, %v7357_v35  ;;  %v570_v27 = vrot.slane %v7371_v54, %v7359_v31  ;;  %v7374_v50 = vld [vmem:[#allocation24_spill] sm:$0xff]  ;;  %v3942_v32 = vld [vmem:[%s7133_s2 + $0xf8] sm:$0xff] }
  0x2f   :  { %v574_v5 = vrot.slane %v7372_v60, %v7357_v35  ;;  %v578_v36 = vrot.slane %v7372_v60, %v7359_v31  ;;  %v582_v26 = vrot.slane %v7373_v47, %v7357_v35  ;;  %v586_v41 = vrot.slane %v7373_v47, %v7359_v31 }
  0x30   :  { %v590_v6 = vrot.slane %v7374_v50, %v7357_v35  ;;  %v594_v15 = vrot.slane %v7374_v50, %v7359_v31  ;;  %v4692_v54 = vrot.slane %v470_v28, %v7357_v35  ;;  %v4695_v7 = vrot.slane %v474_v30, %v7357_v35  ;;  %v3930_v50 = vld [vmem:[%s7133_s2 + $0x98] sm:$0xff] }
  0x31   :  { %v4698_v60 = vrot.slane %v478_v29, %v7357_v35  ;;  %v4701_v16 = vrot.slane %v482_v10, %v7357_v35  ;;  %v4704_v47 = vrot.slane %v486_v4, %v7357_v35  ;;  %v4707_v8 = vrot.slane %v490_v23, %v7357_v35 }
  0x32   :  { %v4710_v31 = vrot.slane %v494_v38, %v7357_v35  ;;  %v4713_v28 = vrot.slane %v498_v39, %v7357_v35  ;;  %v4716_v30 = vrot.slane %v502_v42, %v7357_v35  ;;  %v4719_v29 = vrot.slane %v506_v43, %v7357_v35  ;;  %v3927_v39 = vld [vmem:[%s7133_s2 + $0x80] sm:$0xff]  ;;  %v3928_v42 = vld [vmem:[%s7133_s2 + $0x88] sm:$0xff] }
  0x33   :  { %v4722_v10 = vrot.slane %v510_v45, %v7357_v35  ;;  %v4725_v4 = vrot.slane %v514_v46, %v7357_v35  ;;  %v4728_v23 = vrot.slane %v518_v48, %v7357_v35  ;;  %v4731_v38 = vrot.slane %v522_v49, %v7357_v35  ;;  %v3929_v49 = vld [vmem:[%s7133_s2 + $0x90] sm:$0xff] }
  0x34   :  { %7375 = vst [vmem:[#allocation57_spill] sm:$0xff] %v4713_v28  ;;  %7376 = vst [vmem:[#allocation58_spill] sm:$0xff] %v4716_v30  ;;  %v686_v43 = vrot.slane %v526_v51, %v7357_v35  ;;  %v690_v45 = vrot.slane %v530_v53, %v7357_v35  ;;  %v694_v46 = vrot.slane %v534_v55, %v7357_v35 }
  0x35   :  { %7377 = vst [vmem:[#allocation59_spill] sm:$0xff] %v4719_v29  ;;  %7378 = vst [vmem:[#allocation60_spill] sm:$0xff] %v4722_v10  ;;  %v698_v48 = vrot.slane %v538_v59, %v7357_v35  ;;  %v702_v51 = vrot.slane %v542_v18, %v7357_v35  ;;  %v706_v53 = vrot.slane %v546_v62, %v7357_v35 }
  0x36   :  { %7379 = vst [vmem:[#allocation61_spill] sm:$0xff] %v4725_v4  ;;  %7380 = vst [vmem:[#allocation62_spill] sm:$0xff] %v4728_v23  ;;  %v710_v55 = vrot.slane %v550_v44, %v7357_v35  ;;  %v714_v59 = vrot.slane %v554_v40, %v7357_v35  ;;  %v718_v18 = vrot.slane %v558_v9, %v7357_v35 }
  0x37   :  { %7381 = vst [vmem:[#allocation63_spill] sm:$0xff] %v4731_v38  ;;  %v722_v62 = vrot.slane %v562_v37, %v7357_v35  ;;  %v726_v44 = vrot.slane %v566_v2, %v7357_v35  ;;  %v730_v40 = vrot.slane %v570_v27, %v7357_v35  ;;  %v734_v9 = vrot.slane %v574_v5, %v7357_v35 }
  0x38   :  { %v738_v37 = vrot.slane %v578_v36, %v7357_v35  ;;  %v742_v2 = vrot.slane %v582_v26, %v7357_v35  ;;  %v746_v27 = vrot.slane %v586_v41, %v7357_v35  ;;  %v750_v5 = vrot.slane %v590_v6, %v7357_v35  ;;  %v3941_v41 = vld [vmem:[%s7133_s2 + $0xf0] sm:$0xff] }
  0x39   :  { %v754_v36 = vrot.slane %v594_v15, %v7357_v35  ;;  %v771_v61 = vcombine.high %v3927_v39, %v3927_v39  ;;  %v772_v26 = vcombine.high %v3928_v42, %v3928_v42  ;;  %v773_v52 = vcombine.high %v3929_v49, %v3929_v49 }
  0x3a   :  { %v774_v25 = vcombine.high %v3930_v50, %v3930_v50  ;;  %v775_v57 = vcombine.high %v3931_v1, %v3931_v1  ;;  %v776_v22 = vcombine.high %v3932_v58, %v3932_v58  ;;  %v777_v63 = vcombine.high %v3933_v11, %v3933_v11 }
  0x3b   :  { %v778_v0 = vcombine.high %v3934_v3, %v3934_v3  ;;  %v779_v13 = vcombine.high %v3935_v24, %v3935_v24  ;;  %v780_v6 = vcombine.high %v3936_v12, %v3936_v12  ;;  %v781_v14 = vcombine.high %v3937_v34, %v3937_v34 }
  0x3c   :  { %v782_v15 = vcombine.high %v3938_v56, %v3938_v56  ;;  %v783_v35 = vcombine.high %v3939_v17, %v3939_v17  ;;  %v784_v19 = vcombine.high %v3940_v33, %v3940_v33  ;;  %v785_v20 = vcombine.high %v3941_v41, %v3941_v41 }
  0x3d   :  { %v786_v21 = vcombine.high %v3942_v32, %v3942_v32  ;;  %v803_v38 = vmul.f32 %v3927_v39, %v4692_v54  ;;  %v804_v23 = vmul.f32 %v771_v61, %v4695_v7  ;;  %v805_v4 = vmul.f32 %v3928_v42, %v4698_v60  ;;  %v7382_v39 = vld [vmem:[#allocation57_spill] sm:$0xff]  ;;  %v7383_v7 = vld [vmem:[#allocation58_spill] sm:$0xff]  ;;  %v7384_v42 = vld [vmem:[#allocation59_spill] sm:$0xff] }
  0x3e   :  { %v806_v10 = vmul.f32 %v772_v26, %v4701_v16  ;;  %v807_v29 = vmul.f32 %v3929_v49, %v4704_v47  ;;  %v808_v30 = vmul.f32 %v773_v52, %v4707_v8  ;;  %v809_v28 = vmul.f32 %v3930_v50, %v4710_v31  ;;  %v7385_v16 = vld [vmem:[#allocation60_spill] sm:$0xff]  ;;  %v7386_v47 = vld [vmem:[#allocation61_spill] sm:$0xff]  ;;  %v7387_v8 = vld [vmem:[#allocation62_spill] sm:$0xff] }
  0x3f   :  { %v810_v54 = vmul.f32 %v774_v25, %v7382_v39  ;;  %v811_v61 = vmul.f32 %v3931_v1, %v7383_v7  ;;  %v812_v60 = vmul.f32 %v775_v57, %v7384_v42  ;;  %v813_v26 = vmul.f32 %v3932_v58, %v7385_v16  ;;  %v7388_v31 = vld [vmem:[#allocation63_spill] sm:$0xff] }
  0x40   :  { %v814_v49 = vmul.f32 %v776_v22, %v7386_v47  ;;  %v815_v52 = vmul.f32 %v3933_v11, %v7387_v8  ;;  %v816_v50 = vmul.f32 %v777_v63, %v7388_v31  ;;  %v817_v25 = vmul.f32 %v3934_v3, %v686_v43 }
  0x41   :  { %v818_v39 = vmul.f32 %v778_v0, %v690_v45  ;;  %v819_v1 = vmul.f32 %v3935_v24, %v694_v46  ;;  %v820_v7 = vmul.f32 %v779_v13, %v698_v48  ;;  %v821_v42 = vmul.f32 %v3936_v12, %v702_v51  ;;  %v7389_v24 = vld [vmem:[#allocation32_spill] sm:$0xff]  ;;  %v7391_v13 = vld [vmem:[#allocation33_spill] sm:$0xff]  ;;  %v7393_v12 = vld [vmem:[#allocation34_spill] sm:$0xff] }
  0x42   :  { %v822_v57 = vmul.f32 %v780_v6, %v706_v53  ;;  %v823_v16 = vmul.f32 %v3937_v34, %v710_v55  ;;  %v824_v58 = vmul.f32 %v781_v14, %v714_v59  ;;  %v825_v22 = vmul.f32 %v3938_v56, %v718_v18  ;;  %v7395_v14 = vld [vmem:[#allocation35_spill] sm:$0xff] }
  0x43   :  { %v826_v47 = vmul.f32 %v782_v15, %v722_v62  ;;  %v827_v8 = vmul.f32 %v3939_v17, %v726_v44  ;;  %v828_v11 = vmul.f32 %v783_v35, %v730_v40  ;;  %v829_v31 = vmul.f32 %v3940_v33, %v734_v9  ;;  %v7397_v17 = vld [vmem:[#allocation36_spill] sm:$0xff]  ;;  %v7417_v44 = vld [vmem:[#allocation39_spill] sm:$0xff] }
  0x44   :  { %v830_v63 = vmul.f32 %v784_v19, %v738_v37  ;;  %v831_v3 = vmul.f32 %v3941_v41, %v742_v2  ;;  %v832_v43 = vmul.f32 %v785_v20, %v746_v27  ;;  %v833_v0 = vmul.f32 %v3942_v32, %v750_v5  ;;  %v7399_v19 = vld [vmem:[#allocation37_spill] sm:$0xff]  ;;  %v7401_v20 = vld [vmem:[#allocation38_spill] sm:$0xff]  ;;  %v7419_v9 = vld [vmem:[#allocation40_spill] sm:$0xff] }
  0x45   :  { %v834_v45 = vmul.f32 %v786_v21, %v754_v36  ;;  %v4814_v46 = vadd.f32 %v803_v38, %v7389_v24  ;;  %v4817_v48 = vadd.f32 %v804_v23, %v7391_v13  ;;  %v4820_v51 = vadd.f32 %v805_v4, %v7393_v12  ;;  %v7403_v32 = vld [vmem:[#allocation25_spill] sm:$0xff]  ;;  %v7405_v23 = vld [vmem:[#allocation26_spill] sm:$0xff]  ;;  %v7407_v4 = vld [vmem:[#allocation27_spill] sm:$0xff] }
  0x46   :  { %v4823_v56 = vadd.f32 %v806_v10, %v7395_v14  ;;  %v4826_v34 = vadd.f32 %v807_v29, %v7397_v17  ;;  %v4829_v33 = vadd.f32 %v808_v30, %v7399_v19  ;;  %v4832_v21 = vadd.f32 %v809_v28, %v7401_v20  ;;  %v7409_v10 = vld [vmem:[#allocation28_spill] sm:$0xff]  ;;  %v7411_v29 = vld [vmem:[#allocation29_spill] sm:$0xff]  ;;  %v7413_v30 = vld [vmem:[#allocation30_spill] sm:$0xff] }
  0x47   :  { %7390 = vst [vmem:[#allocation57_spill] sm:$0xff] %v4814_v46  ;;  %7392 = vst [vmem:[#allocation58_spill] sm:$0xff] %v4817_v48  ;;  %v4835_v35 = vadd.f32 %v810_v54, %v7403_v32  ;;  %v4838_v38 = vadd.f32 %v811_v61, %v7405_v23  ;;  %v4841_v53 = vadd.f32 %v812_v60, %v7407_v4  ;;  %v7415_v28 = vld [vmem:[#allocation31_spill] sm:$0xff]  ;;  %v7421_v2 = vld [vmem:[#allocation41_spill] sm:$0xff] }
  0x48   :  { %7394 = vst [vmem:[#allocation59_spill] sm:$0xff] %v4820_v51  ;;  %7396 = vst [vmem:[#allocation60_spill] sm:$0xff] %v4823_v56  ;;  %v4844_v55 = vadd.f32 %v813_v26, %v7409_v10  ;;  %v4847_v59 = vadd.f32 %v814_v49, %v7411_v29  ;;  %v4850_v18 = vadd.f32 %v815_v52, %v7413_v30  ;;  %v7423_v5 = vld [vmem:[#allocation42_spill] sm:$0xff]  ;;  %v7425_v41 = vld [vmem:[#allocation43_spill] sm:$0xff] }
  0x49   :  { %7398 = vst [vmem:[#allocation61_spill] sm:$0xff] %v4826_v34  ;;  %7400 = vst [vmem:[#allocation62_spill] sm:$0xff] %v4829_v33  ;;  %v4853_v62 = vadd.f32 %v816_v50, %v7415_v28  ;;  %v4856_v40 = vadd.f32 %v817_v25, %v7417_v44  ;;  %v4859_v37 = vadd.f32 %v818_v39, %v7419_v9  ;;  %v7427_v15 = vld [vmem:[#allocation44_spill] sm:$0xff]  ;;  %v7429_v61 = vld [vmem:[#allocation45_spill] sm:$0xff] }
  0x4a   :  { %7402 = vst [vmem:[#allocation63_spill] sm:$0xff] %v4832_v21  ;;  %7404 = vst [vmem:[#allocation32_spill] sm:$0xff] %v4835_v35  ;;  %v4862_v27 = vadd.f32 %v819_v1, %v7421_v2  ;;  %v4865_v36 = vadd.f32 %v820_v7, %v7423_v5  ;;  %v4868_v6 = vadd.f32 %v821_v42, %v7425_v41  ;;  %v7431_v26 = vld [vmem:[#allocation46_spill] sm:$0xff]  ;;  %v7433_v52 = vld [vmem:[#allocation47_spill] sm:$0xff] }
  0x4b   :  { %7406 = vst [vmem:[#allocation33_spill] sm:$0xff] %v4838_v38  ;;  %7408 = vst [vmem:[#allocation34_spill] sm:$0xff] %v4841_v53  ;;  %v4871_v54 = vadd.f32 %v822_v57, %v7427_v15  ;;  %v4874_v60 = vadd.f32 %v823_v16, %v7429_v61  ;;  %v4877_v49 = vadd.f32 %v824_v58, %v7431_v26  ;;  %v7435_v25 = vld [vmem:[#allocation48_spill] sm:$0xff]  ;;  %v7437_v1 = vld [vmem:[#allocation49_spill] sm:$0xff] }
  0x4c   :  { %7410 = vst [vmem:[#allocation35_spill] sm:$0xff] %v4844_v55  ;;  %7412 = vst [vmem:[#allocation36_spill] sm:$0xff] %v4847_v59  ;;  %v4880_v50 = vadd.f32 %v825_v22, %v7433_v52  ;;  %v4883_v39 = vadd.f32 %v826_v47, %v7435_v25  ;;  %v4886_v7 = vadd.f32 %v827_v8, %v7437_v1  ;;  %v7439_v42 = vld [vmem:[#allocation50_spill] sm:$0xff]  ;;  %v7441_v57 = vld [vmem:[#allocation51_spill] sm:$0xff] }
  0x4d   :  { %7414 = vst [vmem:[#allocation37_spill] sm:$0xff] %v4850_v18  ;;  %7416 = vst [vmem:[#allocation38_spill] sm:$0xff] %v4853_v62  ;;  %v4889_v24 = vadd.f32 %v828_v11, %v7439_v42  ;;  %v4892_v13 = vadd.f32 %v829_v31, %v7441_v57  ;;  %v7443_v16 = vld [vmem:[#allocation52_spill] sm:$0xff]  ;;  %v7445_v58 = vld [vmem:[#allocation53_spill] sm:$0xff] }
  0x4e   :  { %7418 = vst [vmem:[#allocation25_spill] sm:$0xff] %v4856_v40  ;;  %7420 = vst [vmem:[#allocation26_spill] sm:$0xff] %v4859_v37  ;;  %v4895_v12 = vadd.f32 %v830_v63, %v7443_v16  ;;  %v4898_v14 = vadd.f32 %v831_v3, %v7445_v58  ;;  %v7447_v22 = vld [vmem:[#allocation54_spill] sm:$0xff]  ;;  %v7449_v47 = vld [vmem:[#allocation55_spill] sm:$0xff] }
  0x4f   :  { %7422 = vst [vmem:[#allocation27_spill] sm:$0xff] %v4862_v27  ;;  %7424 = vst [vmem:[#allocation28_spill] sm:$0xff] %v4865_v36  ;;  %v4901_v17 = vadd.f32 %v832_v43, %v7447_v22  ;;  %v4904_v19 = vadd.f32 %v833_v0, %v7449_v47  ;;  %v7451_v8 = vld [vmem:[#allocation56_spill] sm:$0xff]  ;;  %v7453_v11 = vld [vmem:[#allocation14_spill] sm:$0xff] }
  0x50   :  { %7426 = vst [vmem:[#allocation29_spill] sm:$0xff] %v4868_v6  ;;  %7428 = vst [vmem:[#allocation30_spill] sm:$0xff] %v4871_v54  ;;  %v4907_v20 = vadd.f32 %v834_v45, %v7451_v8  ;;  %v7454_v32 = vld [vmem:[#allocation5_spill] sm:$0xff]  ;;  %v7455_v31 = vld [vmem:[#allocation15_spill] sm:$0xff] }
  0x51   :  { %7430 = vst [vmem:[#allocation31_spill] sm:$0xff] %v4874_v60  ;;  %7432 = vst [vmem:[#allocation39_spill] sm:$0xff] %v4877_v49  ;;  %v887_v23 = vrot.slane %v7454_v32, %v7453_v11  ;;  %v891_v4 = vrot.slane %v7454_v32, %v7455_v31  ;;  %v7456_v63 = vld [vmem:[#allocation6_spill] sm:$0xff]  ;;  %v7457_v43 = vld [vmem:[#allocation7_spill] sm:$0xff] }
  0x52   :  { %7434 = vst [vmem:[#allocation40_spill] sm:$0xff] %v4880_v50  ;;  %7436 = vst [vmem:[#allocation41_spill] sm:$0xff] %v4883_v39  ;;  %v895_v10 = vrot.slane %v7456_v63, %v7453_v11  ;;  %v899_v3 = vrot.slane %v7456_v63, %v7455_v31  ;;  %v903_v29 = vrot.slane %v7457_v43, %v7453_v11  ;;  %v7458_v45 = vld [vmem:[#allocation8_spill] sm:$0xff]  ;;  %v7459_v44 = vld [vmem:[#allocation9_spill] sm:$0xff] }
  0x53   :  { %7438 = vst [vmem:[#allocation42_spill] sm:$0xff] %v4886_v7  ;;  %7440 = vst [vmem:[#allocation43_spill] sm:$0xff] %v4889_v24  ;;  %v907_v0 = vrot.slane %v7457_v43, %v7455_v31  ;;  %v911_v30 = vrot.slane %v7458_v45, %v7453_v11  ;;  %v915_v28 = vrot.slane %v7458_v45, %v7455_v31  ;;  %v7460_v5 = vld [vmem:[#allocation12_spill] sm:$0xff]  ;;  %v7461_v61 = vld [vmem:[#allocation13_spill] sm:$0xff] }
  0x54   :  { %7442 = vst [vmem:[#allocation44_spill] sm:$0xff] %v4892_v13  ;;  %7444 = vst [vmem:[#allocation45_spill] sm:$0xff] %v4895_v12  ;;  %v919_v9 = vrot.slane %v7459_v44, %v7453_v11  ;;  %v923_v2 = vrot.slane %v7459_v44, %v7455_v31  ;;  %v927_v41 = vrot.slane %v7460_v5, %v7453_v11  ;;  %v7462_v25 = vld [vmem:[#allocation16_spill] sm:$0xff]  ;;  %v7463_v57 = vld [vmem:[#allocation17_spill] sm:$0xff] }
  0x55   :  { %7446 = vst [vmem:[#allocation46_spill] sm:$0xff] %v4898_v14  ;;  %7448 = vst [vmem:[#allocation47_spill] sm:$0xff] %v4901_v17  ;;  %v931_v15 = vrot.slane %v7460_v5, %v7455_v31  ;;  %v935_v26 = vrot.slane %v7461_v61, %v7453_v11  ;;  %v939_v52 = vrot.slane %v7461_v61, %v7455_v31  ;;  %v7464_v22 = vld [vmem:[#allocation18_spill] sm:$0xff]  ;;  %v7466_v14 = vld [vmem:[#allocation20_spill] sm:$0xff] }
  0x56   :  { %7450 = vst [vmem:[#allocation48_spill] sm:$0xff] %v4904_v19  ;;  %7452 = vst [vmem:[#allocation49_spill] sm:$0xff] %v4907_v20  ;;  %v943_v1 = vrot.slane %v7462_v25, %v7453_v11  ;;  %v947_v42 = vrot.slane %v7462_v25, %v7455_v31  ;;  %v951_v16 = vrot.slane %v7463_v57, %v7453_v11  ;;  %v7465_v20 = vld [vmem:[#allocation19_spill] sm:$0xff]  ;;  %v3949_v62 = vld [vmem:[%s7133_s2 + $0x130] sm:$0xff] }
  0x57   :  { %v955_v58 = vrot.slane %v7463_v57, %v7455_v31  ;;  %v959_v47 = vrot.slane %v7464_v22, %v7453_v11  ;;  %v963_v8 = vrot.slane %v7464_v22, %v7455_v31  ;;  %v967_v19 = vrot.slane %v7465_v20, %v7453_v11  ;;  %v7467_v57 = vld [vmem:[#allocation21_spill] sm:$0xff]  ;;  %v7468_v22 = vld [vmem:[#allocation22_spill] sm:$0xff]  ;;  %v3948_v25 = vld [vmem:[%s7133_s2 + $0x128] sm:$0xff] }
  0x58   :  { %v971_v17 = vrot.slane %v7465_v20, %v7455_v31  ;;  %v975_v12 = vrot.slane %v7466_v14, %v7453_v11  ;;  %v979_v13 = vrot.slane %v7466_v14, %v7455_v31  ;;  %v983_v24 = vrot.slane %v7467_v57, %v7453_v11  ;;  %v7469_v20 = vld [vmem:[#allocation23_spill] sm:$0xff]  ;;  %v7470_v14 = vld [vmem:[#allocation24_spill] sm:$0xff]  ;;  %v3951_v59 = vld [vmem:[%s7133_s2 + $0x140] sm:$0xff] }
  0x59   :  { %v987_v7 = vrot.slane %v7467_v57, %v7455_v31  ;;  %v991_v39 = vrot.slane %v7468_v22, %v7453_v11  ;;  %v995_v50 = vrot.slane %v7468_v22, %v7455_v31  ;;  %v999_v49 = vrot.slane %v7469_v20, %v7453_v11  ;;  %v3952_v61 = vld [vmem:[%s7133_s2 + $0x148] sm:$0xff]  ;;  %v3954_v53 = vld [vmem:[%s7133_s2 + $0x158] sm:$0xff]  ;;  %v3955_v38 = vld [vmem:[%s7133_s2 + $0x160] sm:$0xff] }
  0x5a   :  { %v1003_v60 = vrot.slane %v7469_v20, %v7455_v31  ;;  %v1007_v54 = vrot.slane %v7470_v14, %v7453_v11  ;;  %v1011_v6 = vrot.slane %v7470_v14, %v7455_v31  ;;  %v4974_v57 = vrot.slane %v887_v23, %v7453_v11  ;;  %v3946_v31 = vld [vmem:[%s7133_s2 + $0x118] sm:$0xff]  ;;  %v5114_v35 = vld [vmem:[%s7133_s2 + $0x170] sm:$0xff]  ;;  %v7483_v46 = vld [vmem:[#allocation2_spill] sm:$0xff] }
  0x5b   :  { %v4977_v36 = vrot.slane %v891_v4, %v7453_v11  ;;  %v4980_v22 = vrot.slane %v895_v10, %v7453_v11  ;;  %v4983_v27 = vrot.slane %v899_v3, %v7453_v11  ;;  %v4986_v20 = vrot.slane %v903_v29, %v7453_v11  ;;  %7481 = vst [vmem:[#allocation18_spill] sm:$0xff] %v5114_v35  ;;  %v5119_v21 = vld [vmem:[%s7133_s2 + $0x178] sm:$0xff] }
  0x5c   :  { %v4989_v37 = vrot.slane %v907_v0, %v7453_v11  ;;  %v4992_v14 = vrot.slane %v911_v30, %v7453_v11  ;;  %v4995_v23 = vrot.slane %v915_v28, %v7453_v11  ;;  %v4998_v4 = vrot.slane %v919_v9, %v7453_v11  ;;  %v3943_v28 = vld [vmem:[%s7133_s2 + $0x100] sm:$0xff]  ;;  %v3944_v9 = vld [vmem:[%s7133_s2 + $0x108] sm:$0xff]  ;;  %7482 = vst [vmem:[#allocation19_spill] sm:$0xff] %v5119_v21 }
  0x5d   :  { %v5001_v10 = vrot.slane %v923_v2, %v7453_v11  ;;  %v5004_v3 = vrot.slane %v927_v41, %v7453_v11  ;;  %v5007_v29 = vrot.slane %v931_v15, %v7453_v11  ;;  %v5010_v0 = vrot.slane %v935_v26, %v7453_v11 }
  0x5e   :  { %v5013_v30 = vrot.slane %v939_v52, %v7453_v11  ;;  %v5022_v2 = vrot.slane %v943_v1, %v7453_v11  ;;  %v5025_v41 = vrot.slane %v947_v42, %v7453_v11  ;;  %v5028_v15 = vrot.slane %v951_v16, %v7453_v11  ;;  %v3945_v52 = vld [vmem:[%s7133_s2 + $0x110] sm:$0xff]  ;;  %v3947_v1 = vld [vmem:[%s7133_s2 + $0x120] sm:$0xff] }
  0x5f   :  { %v5031_v26 = vrot.slane %v955_v58, %v7453_v11  ;;  %v5043_v42 = vrot.slane %v959_v47, %v7453_v11  ;;  %v5046_v16 = vrot.slane %v963_v8, %v7453_v11  ;;  %v5049_v58 = vrot.slane %v967_v19, %v7453_v11  ;;  %v3950_v47 = vld [vmem:[%s7133_s2 + $0x138] sm:$0xff] }
  0x60   :  { %v5052_v40 = vrot.slane %v971_v17, %v7453_v11  ;;  %v5064_v8 = vrot.slane %v975_v12, %v7453_v11  ;;  %v5067_v19 = vrot.slane %v979_v13, %v7453_v11  ;;  %v5070_v17 = vrot.slane %v983_v24, %v7453_v11  ;;  %v3953_v12 = vld [vmem:[%s7133_s2 + $0x150] sm:$0xff] }
  0x61   :  { %v5073_v18 = vrot.slane %v987_v7, %v7453_v11  ;;  %v5085_v13 = vrot.slane %v991_v39, %v7453_v11  ;;  %v5088_v24 = vrot.slane %v995_v50, %v7453_v11  ;;  %v5091_v7 = vrot.slane %v999_v49, %v7453_v11  ;;  %v3956_v39 = vld [vmem:[%s7133_s2 + $0x168] sm:$0xff] }
  0x62   :  { %7471 = vst [vmem:[#allocation50_spill] sm:$0xff] %v5064_v8  ;;  %7472 = vst [vmem:[#allocation51_spill] sm:$0xff] %v5067_v19  ;;  %v5094_v55 = vrot.slane %v1003_v60, %v7453_v11  ;;  %v5106_v50 = vrot.slane %v1007_v54, %v7453_v11  ;;  %v5109_v49 = vrot.slane %v1011_v6, %v7453_v11 }
  0x63   :  { %7473 = vst [vmem:[#allocation52_spill] sm:$0xff] %v5070_v17  ;;  %7474 = vst [vmem:[#allocation53_spill] sm:$0xff] %v5073_v18  ;;  %v1188_v60 = vcombine.high %v3943_v28, %v3943_v28  ;;  %v1189_v5 = vcombine.high %v3944_v9, %v3944_v9  ;;  %v1190_v33 = vcombine.high %v3945_v52, %v3945_v52 }
  0x64   :  { %7475 = vst [vmem:[#allocation54_spill] sm:$0xff] %v5085_v13  ;;  %7476 = vst [vmem:[#allocation55_spill] sm:$0xff] %v5088_v24  ;;  %v1191_v44 = vcombine.high %v3946_v31, %v3946_v31  ;;  %v1192_v34 = vcombine.high %v3947_v1, %v3947_v1  ;;  %v1193_v54 = vcombine.high %v3948_v25, %v3948_v25  ;;  %v5126_v24 = vsub.s32 3, %v7483_v46 }
  0x65   :  { %7477 = vst [vmem:[#allocation56_spill] sm:$0xff] %v5091_v7  ;;  %7478 = vst [vmem:[#allocation5_spill] sm:$0xff] %v5094_v55  ;;  %v1194_v56 = vcombine.high %v3949_v62, %v3949_v62  ;;  %v1196_v6 = vcombine.high %v3951_v59, %v3951_v59  ;;  %v1197_v11 = vcombine.high %v3952_v61, %v3952_v61  ;;  %v5129_v13 = vsub.s32 7, %v7483_v46 }
  0x66   :  { %7479 = vst [vmem:[#allocation6_spill] sm:$0xff] %v5106_v50  ;;  %7480 = vst [vmem:[#allocation17_spill] sm:$0xff] %v5109_v49  ;;  %v1195_v50 = vcombine.high %v3950_v47, %v3950_v47  ;;  %v1198_v49 = vcombine.high %v3953_v12, %v3953_v12  ;;  %v1199_v55 = vcombine.high %v3954_v53, %v3954_v53 }
  0x67   :  { %v1200_v7 = vcombine.high %v3955_v38, %v3955_v38  ;;  %v1201_v45 = vcombine.high %v3956_v39, %v3956_v39  ;;  %v1202_v51 = vcombine.high %v5114_v35, %v5114_v35  ;;  %7484 = vst [vmem:[#allocation20_spill] sm:$0xff] %v5126_v24  ;;  %7485 = vst [vmem:[#allocation21_spill] sm:$0xff] %v5129_v13 }
  0x68   :  { %v1220_v18 = vmul.f32 %v3943_v28, %v4974_v57  ;;  %v1221_v17 = vmul.f32 %v1188_v60, %v4977_v36  ;;  %v1222_v19 = vmul.f32 %v3944_v9, %v4980_v22  ;;  %v1223_v43 = vmul.f32 %v1189_v5, %v4983_v27 }
  0x69   :  { %v1224_v8 = vmul.f32 %v3945_v52, %v4986_v20  ;;  %v5137_v35 = vmul.f32 %v1190_v33, %v4989_v37  ;;  %v5140_v48 = vmul.f32 %v3946_v31, %v4992_v14  ;;  %v5143_v21 = vmul.f32 %v1191_v44, %v4995_v23  ;;  %v3959_v37 = vld [vmem:[%s7133_s2 + $0x180] sm:$0xff]  ;;  %v7488_v28 = vld [vmem:[#allocation51_spill] sm:$0xff] }
  0x6a   :  { %v5146_v46 = vmul.f32 %v3947_v1, %v4998_v4  ;;  %v5149_v36 = vmul.f32 %v1192_v34, %v5001_v10  ;;  %v5152_v57 = vmul.f32 %v3948_v25, %v5004_v3  ;;  %v5155_v27 = vmul.f32 %v1193_v54, %v5007_v29  ;;  %v7489_v9 = vld [vmem:[#allocation52_spill] sm:$0xff] }
  0x6b   :  { %v5158_v33 = vmul.f32 %v3949_v62, %v5010_v0  ;;  %v1304_v31 = vrot.slane %v7454_v32, %v5126_v24  ;;  %v1308_v34 = vrot.slane %v7454_v32, %v5129_v13  ;;  %v1312_v44 = vrot.slane %v7456_v63, %v5126_v24  ;;  %v7492_v52 = vld [vmem:[#allocation55_spill] sm:$0xff] }
  0x6c   :  { %v5170_v5 = vmul.f32 %v1194_v56, %v5013_v30  ;;  %v5173_v25 = vmul.f32 %v3950_v47, %v5022_v2  ;;  %v5176_v62 = vmul.f32 %v1195_v50, %v5025_v41  ;;  %v5179_v22 = vmul.f32 %v3951_v59, %v5028_v15  ;;  %v7486_v59 = vld [vmem:[#allocation50_spill] sm:$0xff]  ;;  %v7490_v2 = vld [vmem:[#allocation53_spill] sm:$0xff]  ;;  %v7495_v50 = vld [vmem:[#allocation59_spill] sm:$0xff] }
  0x6d   :  { %v5182_v20 = vmul.f32 %v1196_v6, %v5031_v26  ;;  %v5185_v32 = vmul.f32 %v3952_v61, %v5043_v42  ;;  %v5188_v14 = vmul.f32 %v1197_v11, %v5046_v16  ;;  %v1316_v56 = vrot.slane %v7456_v63, %v5129_v13  ;;  %v3960_v61 = vld [vmem:[%s7133_s2 + $0x188] sm:$0xff]  ;;  %v7491_v15 = vld [vmem:[#allocation54_spill] sm:$0xff] }
  0x6e   :  { %v5193_v23 = vmul.f32 %v3953_v12, %v5049_v58  ;;  %v5196_v4 = vmul.f32 %v1198_v49, %v5052_v40  ;;  %v5199_v10 = vmul.f32 %v3954_v53, %v7486_v59  ;;  %v1605_v3 = vcombine.high %v3959_v37, %v3959_v37  ;;  %v7487_v11 = vld [vmem:[#allocation7_spill] sm:$0xff]  ;;  %v7494_v12 = vld [vmem:[#allocation58_spill] sm:$0xff] }
  0x6f   :  { %v1320_v29 = vrot.slane %v7487_v11, %v5126_v24  ;;  %v1464_v0 = vrot.slane %v1304_v31, %v5126_v24  ;;  %v1468_v63 = vrot.slane %v1308_v34, %v5126_v24  ;;  %v1472_v30 = vrot.slane %v1312_v44, %v5126_v24  ;;  %v7497_v34 = vld [vmem:[#allocation56_spill] sm:$0xff]  ;;  %v7498_v44 = vld [vmem:[#allocation18_spill] sm:$0xff]  ;;  %v7501_v59 = vld [vmem:[#allocation19_spill] sm:$0xff] }
  0x70   :  { %v5210_v40 = vmul.f32 %v1199_v55, %v7488_v28  ;;  %v5213_v53 = vmul.f32 %v3955_v38, %v7489_v9  ;;  %v5216_v41 = vmul.f32 %v1200_v7, %v7490_v2  ;;  %v5219_v26 = vmul.f32 %v3956_v39, %v7491_v15  ;;  %v7493_v55 = vld [vmem:[#allocation57_spill] sm:$0xff]  ;;  %v3961_v7 = vld [vmem:[%s7133_s2 + $0x190] sm:$0xff] }
  0x71   :  { %v5222_v1 = vmul.f32 %v1201_v45, %v7492_v52  ;;  %v1324_v42 = vrot.slane %v7487_v11, %v5129_v13  ;;  %v1476_v16 = vrot.slane %v1316_v56, %v5126_v24  ;;  %v1606_v58 = vcombine.high %v3960_v61, %v3960_v61  ;;  %v7496_v39 = vld [vmem:[#allocation8_spill] sm:$0xff]  ;;  %v7505_v2 = vld [vmem:[#allocation61_spill] sm:$0xff] }
  0x72   :  { %v1252_v47 = vadd.f32 %v1220_v18, %v7493_v55  ;;  %v1253_v38 = vadd.f32 %v1221_v17, %v7494_v12  ;;  %v1254_v49 = vadd.f32 %v1222_v19, %v7495_v50  ;;  %v1328_v45 = vrot.slane %v7496_v39, %v5126_v24  ;;  %v7499_v18 = vld [vmem:[#allocation5_spill] sm:$0xff]  ;;  %v7500_v19 = vld [vmem:[#allocation6_spill] sm:$0xff]  ;;  %v7502_v28 = vld [vmem:[#allocation60_spill] sm:$0xff] }
  0x73   :  { %v1480_v60 = vrot.slane %v1320_v29, %v5126_v24  ;;  %v1637_v54 = vmul.f32 %v3959_v37, %v1464_v0  ;;  %v1638_v6 = vmul.f32 %v1605_v3, %v1468_v63  ;;  %v1639_v31 = vmul.f32 %v3960_v61, %v1472_v30  ;;  %v3962_v29 = vld [vmem:[%s7133_s2 + $0x198] sm:$0xff] }
  0x74   :  { %v5238_v56 = vmul.f32 %v7498_v44, %v7497_v34  ;;  %v5241_v17 = vmul.f32 %v1202_v51, %v7499_v18  ;;  %v5245_v11 = vmul.f32 %v7501_v59, %v7500_v19  ;;  %v1255_v9 = vadd.f32 %v1223_v43, %v7502_v28  ;;  %v7503_v63 = vld [vmem:[#allocation17_spill] sm:$0xff]  ;;  %v7509_v18 = vld [vmem:[#allocation32_spill] sm:$0xff] }
  0x75   :  { %v1332_v37 = vrot.slane %v7496_v39, %v5129_v13  ;;  %v1484_v61 = vrot.slane %v1324_v42, %v5126_v24  ;;  %v1607_v3 = vcombine.high %v3961_v7, %v3961_v7  ;;  %v1640_v0 = vmul.f32 %v1606_v58, %v1476_v16  ;;  %v7506_v43 = vld [vmem:[#allocation9_spill] sm:$0xff]  ;;  %v7507_v42 = vld [vmem:[#allocation62_spill] sm:$0xff]  ;;  %v7508_v58 = vld [vmem:[#allocation63_spill] sm:$0xff] }
  0x76   :  { %v7504_v51 = vcombine.high %v7501_v59, %v7501_v59  ;;  %v1256_v15 = vadd.f32 %v1224_v8, %v7505_v2  ;;  %v1336_v52 = vrot.slane %v7506_v43, %v5126_v24  ;;  %v1488_v55 = vrot.slane %v1328_v45, %v5126_v24  ;;  %v3963_v8 = vld [vmem:[%s7133_s2 + $0x1a0] sm:$0xff]  ;;  %v7511_v28 = vld [vmem:[#allocation33_spill] sm:$0xff] }
  0x77   :  { %v1641_v12 = vmul.f32 %v3961_v7, %v1480_v60  ;;  %v1669_v50 = vadd.f32 %v1637_v54, %v1252_v47  ;;  %v1670_v39 = vadd.f32 %v1638_v6, %v1253_v38  ;;  %v1671_v34 = vadd.f32 %v1639_v31, %v1254_v49 }
  0x78   :  { %v5258_v30 = vmul.f32 %v7504_v51, %v7503_v63  ;;  %v1257_v16 = vadd.f32 %v5137_v35, %v7507_v42  ;;  %v1258_v44 = vadd.f32 %v5140_v48, %v7508_v58  ;;  %v1259_v19 = vadd.f32 %v5143_v21, %v7509_v18  ;;  %v7510_v35 = vld [vmem:[#allocation12_spill] sm:$0xff] }
  0x79   :  { %v1608_v59 = vcombine.high %v3962_v29, %v3962_v29  ;;  %v1340_v7 = vrot.slane %v7506_v43, %v5129_v13  ;;  %v1492_v47 = vrot.slane %v1332_v37, %v5126_v24  ;;  %v1642_v38 = vmul.f32 %v1607_v3, %v1484_v61  ;;  %v7515_v18 = vld [vmem:[#allocation36_spill] sm:$0xff] }
  0x7a   :  { %v1672_v49 = vadd.f32 %v1640_v0, %v1255_v9  ;;  %v1344_v45 = vrot.slane %v7510_v35, %v5126_v24  ;;  %v1496_v48 = vrot.slane %v1336_v52, %v5126_v24  ;;  %v1643_v60 = vmul.f32 %v3962_v29, %v1488_v55  ;;  %v3964_v29 = vld [vmem:[%s7133_s2 + $0x1a8] sm:$0xff]  ;;  %v7514_v55 = vld [vmem:[#allocation13_spill] sm:$0xff] }
  0x7b   :  { %v1673_v21 = vadd.f32 %v1641_v12, %v1256_v15  ;;  %v1702_v54 = vsel %vm1701_vm0, %v1669_v50, 0.0  ;;  %v1703_v6 = vsel %vm1701_vm0, %v1670_v39, 0.0  ;;  %v1705_v31 = vsel %vm1701_vm0, %v1671_v34, 0.0  ;;  %v7512_v15 = vld [vmem:[#allocation34_spill] sm:$0xff]  ;;  %v7513_v52 = vld [vmem:[#allocation35_spill] sm:$0xff] }
  0x7c   :  { %v1260_v63 = vadd.f32 %v5146_v46, %v7511_v28  ;;  %v1348_v9 = vrot.slane %v7510_v35, %v5129_v13  ;;  %v1609_v37 = vcombine.high %v3963_v8, %v3963_v8  ;;  %v1704_v61 = vadd.f32 %v1703_v6, %v1702_v54  ;;  %v7516_v35 = vld [vmem:[#allocation37_spill] sm:$0xff] }
  0x7d   :  { %v1500_v3 = vrot.slane %v1340_v7, %v5126_v24  ;;  %v1644_v0 = vmul.f32 %v1608_v59, %v1492_v47  ;;  %v1674_v51 = vadd.f32 %v1642_v38, %v1257_v16  ;;  %v1707_v2 = vsel %vm1701_vm0, %v1672_v49, 0.0  ;;  %v7519_v28 = vld [vmem:[#allocation25_spill] sm:$0xff] }
  0x7e   :  { %v1261_v43 = vadd.f32 %v5149_v36, %v7512_v15  ;;  %v1262_v46 = vadd.f32 %v5152_v57, %v7513_v52  ;;  %v1352_v12 = vrot.slane %v7514_v55, %v5126_v24  ;;  %v1706_v50 = vadd.f32 %v1705_v31, %v1704_v61  ;;  %v7521_v15 = vld [vmem:[#allocation27_spill] sm:$0xff]  ;;  %v3966_v52 = vld [vmem:[%s7133_s2 + $0x1b8] sm:$0xff] }
  0x7f   :  { %v1504_v39 = vrot.slane %v1344_v45, %v5126_v24  ;;  %v1645_v34 = vmul.f32 %v3963_v8, %v1496_v48  ;;  %v1675_v42 = vadd.f32 %v1643_v60, %v1258_v44  ;;  %v1709_v58 = vsel %vm1701_vm0, %v1673_v21, 0.0  ;;  %v7517_v44 = vld [vmem:[#allocation38_spill] sm:$0xff]  ;;  %v7518_v48 = vld [vmem:[#allocation16_spill] sm:$0xff] }
  0x80   :  { %v1263_v16 = vadd.f32 %v5155_v27, %v7515_v18  ;;  %v1356_v59 = vrot.slane %v7514_v55, %v5129_v13  ;;  %v1610_v36 = vcombine.high %v3964_v29, %v3964_v29  ;;  %v1708_v7 = vadd.f32 %v1707_v2, %v1706_v50  ;;  %v3965_v27 = vld [vmem:[%s7133_s2 + $0x1b0] sm:$0xff]  ;;  %v4211_v55 = vld [vmem:[%s7132_s0 + $0x40] sm:$0xff] }
  0x81   :  { %v1508_v57 = vrot.slane %v1348_v9, %v5126_v24  ;;  %v1646_v47 = vmul.f32 %v1609_v37, %v1500_v3  ;;  %v1676_v38 = vadd.f32 %v1644_v0, %v1259_v19  ;;  %v1711_v49 = vsel %vm1701_vm0, %v1674_v51, 0.0 }
  0x82   :  { %v1264_v8 = vadd.f32 %v5158_v33, %v7516_v35  ;;  %v1265_v45 = vadd.f32 %v5170_v5, %v7517_v44  ;;  %v1360_v60 = vrot.slane %v7518_v48, %v5126_v24  ;;  %v1710_v21 = vadd.f32 %v1709_v58, %v1708_v7  ;;  %v4210_v5 = vld [vmem:[%s7132_s0 + $0x38] sm:$0xff]  ;;  %v7524_v35 = vld [vmem:[#allocation30_spill] sm:$0xff]  ;;  %v4212_v44 = vld [vmem:[%s7132_s0 + $0x48] sm:$0xff] }
  0x83   :  { %v1512_v54 = vrot.slane %v1352_v12, %v5126_v24  ;;  %v1647_v6 = vmul.f32 %v3964_v29, %v1504_v39  ;;  %v1677_v19 = vadd.f32 %v1645_v34, %v1260_v63  ;;  %v1713_v31 = vsel %vm1701_vm0, %v1675_v42, 0.0  ;;  %v7520_v63 = vld [vmem:[#allocation26_spill] sm:$0xff]  ;;  %v7522_v42 = vld [vmem:[#allocation28_spill] sm:$0xff] }
  0x84   :  { %v1266_v33 = vadd.f32 %v5173_v25, %v7519_v28  ;;  %v1364_v9 = vrot.slane %v4210_v5, %v5129_v13  ;;  %v1516_v37 = vrot.slane %v1356_v59, %v5126_v24  ;;  %v1712_v61 = vadd.f32 %v1711_v49, %v1710_v21 }
  0x85   :  { %v1611_v3 = vcombine.high %v3965_v27, %v3965_v27  ;;  %v1648_v0 = vmul.f32 %v1610_v36, %v1508_v57  ;;  %v1678_v51 = vadd.f32 %v1646_v47, %v1261_v43  ;;  %v1715_v29 = vsel %vm1701_vm0, %v1676_v38, 0.0  ;;  %v7523_v38 = vld [vmem:[#allocation29_spill] sm:$0xff] }
  0x86   :  { %v1267_v2 = vadd.f32 %v5176_v62, %v7520_v63  ;;  %v1268_v25 = vadd.f32 %v5179_v22, %v7521_v15  ;;  %v1368_v12 = vrot.slane %v4211_v55, %v5126_v24  ;;  %v1714_v50 = vadd.f32 %v1713_v31, %v1712_v61  ;;  %v7526_v61 = vld [vmem:[#allocation39_spill] sm:$0xff] }
  0x87   :  { %v1520_v43 = vrot.slane %v1360_v60, %v5126_v24  ;;  %v1649_v39 = vmul.f32 %v3965_v27, %v1512_v54  ;;  %v1679_v34 = vadd.f32 %v1647_v6, %v1262_v46  ;;  %v1717_v62 = vsel %vm1701_vm0, %v1677_v19, 0.0  ;;  %v7525_v54 = vld [vmem:[#allocation31_spill] sm:$0xff] }
  0x88   :  { %v1269_v22 = vadd.f32 %v5182_v20, %v7522_v42  ;;  %v1372_v58 = vrot.slane %v4211_v55, %v5129_v13  ;;  %v1524_v18 = vrot.slane %v1364_v9, %v5126_v24  ;;  %v1716_v59 = vadd.f32 %v1715_v29, %v1714_v50  ;;  %v3967_v20 = vld [vmem:[%s7133_s2 + $0x1c0] sm:$0xff]  ;;  %v7528_v55 = vld [vmem:[#allocation41_spill] sm:$0xff] }
  0x89   :  { %v1612_v36 = vcombine.high %v3966_v52, %v3966_v52  ;;  %v1650_v7 = vmul.f32 %v1611_v3, %v1516_v37  ;;  %v1680_v57 = vadd.f32 %v1648_v0, %v1263_v16  ;;  %v1719_v47 = vsel %vm1701_vm0, %v1678_v51, 0.0  ;;  %v4213_v51 = vld [vmem:[%s7132_s0 + $0x50] sm:$0xff] }
  0x8a   :  { %v1270_v49 = vadd.f32 %v5185_v32, %v7523_v38  ;;  %v5346_v46 = vadd.f32 %v5188_v14, %v7524_v35  ;;  %v1376_v27 = vrot.slane %v4212_v44, %v5126_v24  ;;  %v1718_v16 = vadd.f32 %v1717_v62, %v1716_v59  ;;  %v7531_v35 = vld [vmem:[#allocation44_spill] sm:$0xff] }
  0x8b   :  { %v1528_v48 = vrot.slane %v1368_v12, %v5126_v24  ;;  %v1651_v60 = vmul.f32 %v3966_v52, %v1520_v43  ;;  %v1681_v21 = vadd.f32 %v1649_v39, %v1264_v8  ;;  %v1721_v32 = vsel %vm1701_vm0, %v1679_v34, 0.0  ;;  %v7527_v8 = vld [vmem:[#allocation40_spill] sm:$0xff] }
  0x8c   :  { %v5359_v14 = vadd.f32 %v5193_v23, %v7525_v54  ;;  %v1380_v6 = vrot.slane %v4212_v44, %v5129_v13  ;;  %v1532_v19 = vrot.slane %v1372_v58, %v5126_v24  ;;  %v1720_v31 = vadd.f32 %v1719_v47, %v1718_v16  ;;  %v3968_v23 = vld [vmem:[%s7133_s2 + $0x1c8] sm:$0xff]  ;;  %v7529_v58 = vld [vmem:[#allocation42_spill] sm:$0xff] }
  0x8d   :  { %v1613_v28 = vcombine.high %v3967_v20, %v3967_v20  ;;  %v1652_v5 = vmul.f32 %v1612_v36, %v1524_v18  ;;  %v1682_v9 = vadd.f32 %v1650_v7, %v1265_v45  ;;  %v1723_v37 = vsel %vm1701_vm0, %v1680_v57, 0.0  ;;  %v4214_v36 = vld [vmem:[%s7132_s0 + $0x58] sm:$0xff] }
  0x8e   :  { %v5366_v3 = vadd.f32 %v5196_v4, %v7526_v61  ;;  %v5370_v0 = vadd.f32 %v5199_v10, %v7527_v8  ;;  %v1384_v45 = vrot.slane %v4213_v51, %v5126_v24  ;;  %v1722_v29 = vadd.f32 %v1721_v32, %v1720_v31  ;;  %v7532_v32 = vld [vmem:[#allocation45_spill] sm:$0xff] }
  0x8f   :  { %v1536_v63 = vrot.slane %v1376_v27, %v5126_v24  ;;  %v1653_v15 = vmul.f32 %v3967_v20, %v1528_v48  ;;  %v1683_v4 = vadd.f32 %v1651_v60, %v1266_v33  ;;  %v1725_v52 = vsel %vm1701_vm0, %v1681_v21, 0.0  ;;  %v7530_v33 = vld [vmem:[#allocation43_spill] sm:$0xff] }
  0x90   :  { %v5383_v10 = vadd.f32 %v5210_v40, %v7528_v55  ;;  %v1388_v12 = vrot.slane %v4213_v51, %v5129_v13  ;;  %v1540_v50 = vrot.slane %v1380_v6, %v5126_v24  ;;  %v1724_v43 = vadd.f32 %v1723_v37, %v1722_v29  ;;  %v3969_v40 = vld [vmem:[%s7133_s2 + $0x1d0] sm:$0xff]  ;;  %v4218_v55 = vld [vmem:[%s7132_s0 + $0x78] sm:$0xff] }
  0x91   :  { %v1614_v39 = vcombine.high %v3968_v23, %v3968_v23  ;;  %v1654_v34 = vmul.f32 %v1613_v28, %v1532_v19  ;;  %v1684_v62 = vadd.f32 %v1652_v5, %v1267_v2  ;;  %v1727_v42 = vsel %vm1701_vm0, %v1682_v9, 0.0  ;;  %v4216_v9 = vld [vmem:[%s7132_s0 + $0x68] sm:$0xff] }
  0x92   :  { %v5390_v18 = vadd.f32 %v5213_v53, %v7529_v58  ;;  %v5394_v59 = vadd.f32 %v5216_v41, %v7530_v33  ;;  %v1392_v2 = vrot.slane %v4214_v36, %v5126_v24  ;;  %v1726_v7 = vadd.f32 %v1725_v52, %v1724_v43 }
  0x93   :  { %v1544_v57 = vrot.slane %v1384_v45, %v5126_v24  ;;  %v1655_v47 = vmul.f32 %v3968_v23, %v1536_v63  ;;  %v1685_v53 = vadd.f32 %v1653_v15, %v1268_v25  ;;  %v1729_v38 = vsel %vm1701_vm0, %v1683_v4, 0.0  ;;  %v3970_v25 = vld [vmem:[%s7133_s2 + $0x1d8] sm:$0xff]  ;;  %v4217_v15 = vld [vmem:[%s7132_s0 + $0x70] sm:$0xff] }
  0x94   :  { %v5407_v41 = vadd.f32 %v5219_v26, %v7531_v35  ;;  %v1396_v20 = vrot.slane %v4214_v36, %v5129_v13  ;;  %v1548_v44 = vrot.slane %v1388_v12, %v5126_v24  ;;  %v1728_v27 = vadd.f32 %v1727_v42, %v1726_v7  ;;  %v4215_v26 = vld [vmem:[%s7132_s0 + $0x60] sm:$0xff]  ;;  %v3973_v36 = vld [vmem:[%s7133_s2 + $0x1f0] sm:$0xff] }
  0x95   :  { %v1615_v16 = vcombine.high %v3969_v40, %v3969_v40  ;;  %v1656_v48 = vmul.f32 %v1614_v39, %v1540_v50  ;;  %v1686_v60 = vadd.f32 %v1654_v34, %v1269_v22  ;;  %v1731_v21 = vsel %vm1701_vm0, %v1684_v62, 0.0 }
  0x96   :  { %v5414_v54 = vadd.f32 %v5222_v1, %v7532_v32  ;;  %v1400_v6 = vrot.slane %v4215_v26, %v5126_v24  ;;  %v1404_v19 = vrot.slane %v4215_v26, %v5129_v13  ;;  %v1730_v31 = vadd.f32 %v1729_v38, %v1728_v27 }
  0x97   :  { %v1552_v22 = vrot.slane %v1392_v2, %v5126_v24  ;;  %v1657_v28 = vmul.f32 %v3969_v40, %v1544_v57  ;;  %v1687_v5 = vadd.f32 %v1655_v47, %v1270_v49  ;;  %v1733_v1 = vsel %vm1701_vm0, %v1685_v53, 0.0  ;;  %v3971_v49 = vld [vmem:[%s7133_s2 + $0x1e0] sm:$0xff]  ;;  %v3972_v40 = vld [vmem:[%s7133_s2 + $0x1e8] sm:$0xff]  ;;  %v3974_v47 = vld [vmem:[%s7133_s2 + $0x1f8] sm:$0xff] }
  0x98   :  { %v1408_v37 = vrot.slane %v4216_v9, %v5126_v24  ;;  %v1412_v61 = vrot.slane %v4216_v9, %v5129_v13  ;;  %v1556_v8 = vrot.slane %v1396_v20, %v5126_v24  ;;  %v1732_v23 = vadd.f32 %v1731_v21, %v1730_v31  ;;  %v7533_v31 = vld [vmem:[#allocation46_spill] sm:$0xff] }
  0x99   :  { %v1616_v51 = vcombine.high %v3970_v25, %v3970_v25  ;;  %v1658_v45 = vmul.f32 %v1615_v16, %v1548_v44  ;;  %v1688_v29 = vadd.f32 %v1656_v48, %v5346_v46  ;;  %v1735_v63 = vsel %vm1701_vm0, %v1686_v60, 0.0 }
  0x9a   :  { %v1416_v4 = vrot.slane %v4217_v15, %v5126_v24  ;;  %v1420_v52 = vrot.slane %v4217_v15, %v5129_v13  ;;  %v1424_v46 = vrot.slane %v4218_v55, %v5126_v24  ;;  %v1734_v12 = vadd.f32 %v1733_v1, %v1732_v23 }
  0x9b   :  { %v1560_v50 = vrot.slane %v1400_v6, %v5126_v24  ;;  %v1659_v43 = vmul.f32 %v3970_v25, %v1552_v22  ;;  %v1689_v39 = vadd.f32 %v1657_v28, %v5359_v14  ;;  %v1737_v34 = vsel %vm1701_vm0, %v1687_v5, 0.0  ;;  %v7534_v28 = vld [vmem:[#allocation47_spill] sm:$0xff] }
  0x9c   :  { %v1428_v62 = vrot.slane %v4218_v55, %v5129_v13  ;;  %v1564_v42 = vrot.slane %v1404_v19, %v5126_v24  ;;  %v1568_v58 = vrot.slane %v1408_v37, %v5126_v24  ;;  %v1736_v33 = vadd.f32 %v1735_v63, %v1734_v12  ;;  %v7536_v37 = vld [vmem:[#allocation49_spill] sm:$0xff]  ;;  %v5490_v12 = vld [vmem:[%s7132_s0 + $0x80] sm:$0xff]  ;;  %v2014_v13 = vld [vmem:[%s7133_s2 + $0x48] sm:$0xff] }
  0x9d   :  { %v1617_v2 = vcombine.high %v3971_v49, %v3971_v49  ;;  %v1660_v7 = vmul.f32 %v1616_v51, %v1556_v8  ;;  %v1690_v14 = vadd.f32 %v1658_v45, %v5366_v3  ;;  %v1739_v57 = vsel %vm1701_vm0, %v1688_v29, 0.0  ;;  %7537 = vst [vmem:[#allocation22_spill] sm:$0xff] %v5490_v12 }
  0x9e   :  { %v1572_v53 = vrot.slane %v1412_v61, %v5126_v24  ;;  %v1576_v38 = vrot.slane %v1416_v4, %v5126_v24  ;;  %v1580_v35 = vrot.slane %v1420_v52, %v5126_v24  ;;  %v1738_v20 = vadd.f32 %v1737_v34, %v1736_v33  ;;  %v5502_v34 = vld [vmem:[%s7132_s0 + $0x90] sm:$0xff] }
  0x9f   :  { %v1584_v44 = vrot.slane %v1424_v46, %v5126_v24  ;;  %v1661_v27 = vmul.f32 %v3971_v49, %v1560_v50  ;;  %v1691_v16 = vadd.f32 %v1659_v43, %v5370_v0  ;;  %v1741_v3 = vsel %vm1701_vm0, %v1689_v39, 0.0  ;;  %v7535_v0 = vld [vmem:[#allocation48_spill] sm:$0xff]  ;;  %7539 = vst [vmem:[#allocation24_spill] sm:$0xff] %v5502_v34 }
  0xa0   :  { %v1588_v48 = vrot.slane %v1428_v62, %v5126_v24  ;;  %v1618_v60 = vcombine.high %v3972_v40, %v3972_v40  ;;  %v1619_v21 = vcombine.high %v3973_v36, %v3973_v36  ;;  %v1740_v32 = vadd.f32 %v1739_v57, %v1738_v20  ;;  %v7540_v62 = vld [vmem:[#allocation3_spill] sm:$0xff]  ;;  %v2015_v24 = vld [vmem:[%s7133_s2 + $0x50] sm:$0xff] }
  0xa1   :  { %v1620_v25 = vcombine.high %v3974_v47, %v3974_v47  ;;  %v1662_v26 = vmul.f32 %v1617_v2, %v1564_v42  ;;  %v1692_v6 = vadd.f32 %v1660_v7, %v5383_v10  ;;  %v1743_v19 = vsel %vm1701_vm0, %v1690_v14, 0.0  ;;  %v5512_v2 = vld [vmem:[%s7132_s0 + $0x98] sm:$0xff]  ;;  %v5517_v7 = vld [vmem:[%s7132_s0 + $0xa0] sm:$0xff] }
  0xa2   :  { %v1280_v22 = vadd.f32 %v5238_v56, %v7533_v31  ;;  %v1281_v5 = vadd.f32 %v5241_v17, %v7534_v28  ;;  %v1282_v1 = vadd.f32 %v5245_v11, %v7535_v0  ;;  %v1742_v9 = vadd.f32 %v1741_v3, %v1740_v32  ;;  %7541 = vst [vmem:[#allocation2_spill] sm:$0xff] %v5512_v2  ;;  %v5567_v31 = vld [vmem:[%s7132_s0 + $0xd0] sm:$0xff] }
  0xa3   :  { %v1283_v61 = vadd.f32 %v5258_v30, %v7536_v37  ;;  %v1663_v8 = vmul.f32 %v3972_v40, %v1568_v58  ;;  %v1693_v23 = vadd.f32 %v1661_v27, %v5390_v18  ;;  %v1745_v10 = vsel %vm1701_vm0, %v1691_v16, 0.0  ;;  %7542 = vst [vmem:[#allocation50_spill] sm:$0xff] %v5517_v7  ;;  %v5538_v27 = vld [vmem:[%s7132_s0 + $0xb8] sm:$0xff]  ;;  %v5543_v16 = vld [vmem:[%s7132_s0 + $0xc0] sm:$0xff]  ;;  %7549 = vst [vmem:[#allocation55_spill] sm:$0xff] %v5567_v31 }
  0xa4   :  { %v1664_v51 = vmul.f32 %v1618_v60, %v1572_v53  ;;  %v1665_v45 = vmul.f32 %v3973_v36, %v1576_v38  ;;  %v1666_v29 = vmul.f32 %v1619_v21, %v1580_v35  ;;  %v1744_v63 = vadd.f32 %v1743_v19, %v1742_v9  ;;  %v5529_v53 = vld [vmem:[%s7132_s0 + $0xb0] sm:$0xff]  ;;  %7546 = vst [vmem:[#allocation52_spill] sm:$0xff] %v5538_v27  ;;  %v5554_v21 = vld [vmem:[%s7132_s0 + $0xc8] sm:$0xff] }
  0xa5   :  { %v1667_v56 = vmul.f32 %v3974_v47, %v1584_v44  ;;  %v1668_v49 = vmul.f32 %v1620_v25, %v1588_v48  ;;  %v1694_v17 = vadd.f32 %v1662_v26, %v5394_v59  ;;  %v1747_v15 = vsel %vm1701_vm0, %v1692_v6, 0.0  ;;  %v5524_v47 = vld [vmem:[%s7132_s0 + $0xa8] sm:$0xff]  ;;  %7544 = vst [vmem:[#allocation51_spill] sm:$0xff] %v5529_v53  ;;  %v7545_v38 = vld [vmem:[#allocation4_spill] sm:$0xff]  ;;  %7547 = vst [vmem:[#allocation53_spill] sm:$0xff] %v5543_v16 }
  0xa6   :  { %v1746_v11 = vadd.f32 %v1745_v10, %v1744_v63  ;;  %v1695_v4 = vadd.f32 %v1663_v8, %v5407_v41  ;;  %v1749_v30 = vsel %vm1701_vm0, %v1693_v23, 0.0  ;;  %v1696_v52 = vadd.f32 %v1664_v51, %v5414_v54  ;;  %v5496_v41 = vld [vmem:[%s7132_s0 + $0x88] sm:$0xff]  ;;  %7543 = vst [vmem:[#allocation7_spill] sm:$0xff] %v5524_v47  ;;  %7548 = vst [vmem:[#allocation54_spill] sm:$0xff] %v5554_v21  ;;  %v5601_v51 = vld [vmem:[%s7132_s0 + $0xf0] sm:$0xff] }
  0xa7   :  { %v1697_v18 = vadd.f32 %v1665_v45, %v1280_v22  ;;  %v1698_v55 = vadd.f32 %v1666_v29, %v1281_v5  ;;  %v1699_v50 = vadd.f32 %v1667_v56, %v1282_v1  ;;  %v1700_v43 = vadd.f32 %v1668_v49, %v1283_v61  ;;  %7538 = vst [vmem:[#allocation23_spill] sm:$0xff] %v5496_v41  ;;  %v5572_v22 = vld [vmem:[%s7132_s0 + $0xd8] sm:$0xff]  ;;  %v5583_v1 = vld [vmem:[%s7132_s0 + $0xe0] sm:$0xff]  ;;  %v5588_v9 = vld [vmem:[%s7132_s0 + $0xe8] sm:$0xff] }
  0xa8   :  { %v1748_v46 = vadd.f32 %v1747_v15, %v1746_v11  ;;  %v1751_v59 = vsel %vm1701_vm0, %v1694_v17, 0.0  ;;  %v1753_v54 = vsel %vm1701_vm0, %v1695_v4, 0.0  ;;  %v2040_v42 = vrot.slane %v5490_v12, %v7540_v62  ;;  %7550 = vst [vmem:[#allocation57_spill] sm:$0xff] %v5572_v22  ;;  %7551 = vst [vmem:[#allocation58_spill] sm:$0xff] %v5583_v1  ;;  %v5606_v45 = vld [vmem:[%s7132_s0 + $0xf8] sm:$0xff] }
  0xa9   :  { %v1755_v33 = vsel %vm1701_vm0, %v1696_v52, 0.0  ;;  %v1757_v40 = vsel %vm1701_vm0, %v1697_v18, 0.0  ;;  %v1759_v36 = vsel %vm1701_vm0, %v1698_v55, 0.0  ;;  %v1761_v14 = vsel %vm1701_vm0, %v1699_v50, 0.0  ;;  %7552 = vst [vmem:[#allocation59_spill] sm:$0xff] %v5588_v9  ;;  %7553 = vst [vmem:[#allocation8_spill] sm:$0xff] %v5601_v51 }
  0xaa   :  { %v1750_v39 = vadd.f32 %v1749_v30, %v1748_v46  ;;  %v1763_v57 = vsel %vm1701_vm0, %v1700_v43, 0.0  ;;  %v2044_v35 = vrot.slane %v5490_v12, %v7545_v38  ;;  %v2048_v20 = vrot.slane %v5496_v41, %v7540_v62  ;;  %7554 = vst [vmem:[#allocation56_spill] sm:$0xff] %v5606_v45 }
  0xab   :  { %v2052_v3 = vrot.slane %v5496_v41, %v7545_v38  ;;  %v2056_v48 = vrot.slane %v5502_v34, %v7540_v62  ;;  %v2060_v60 = vrot.slane %v5502_v34, %v7545_v38  ;;  %v2064_v32 = vrot.slane %v5512_v2, %v7540_v62 }
  0xac   :  { %v1752_v58 = vadd.f32 %v1751_v59, %v1750_v39  ;;  %v2068_v25 = vrot.slane %v5512_v2, %v7545_v38  ;;  %v2072_v26 = vrot.slane %v5517_v7, %v7540_v62  ;;  %v2076_v6 = vrot.slane %v5517_v7, %v7545_v38 }
  0xad   :  { %v2080_v28 = vrot.slane %v5524_v47, %v7540_v62  ;;  %v2084_v5 = vrot.slane %v5524_v47, %v7545_v38  ;;  %v2088_v0 = vrot.slane %v5529_v53, %v7540_v62  ;;  %v2092_v37 = vrot.slane %v5529_v53, %v7545_v38 }
  0xae   :  { %v1754_v44 = vadd.f32 %v1753_v54, %v1752_v58  ;;  %v2096_v61 = vrot.slane %v5538_v27, %v7540_v62  ;;  %v2100_v8 = vrot.slane %v5538_v27, %v7545_v38  ;;  %v2104_v23 = vrot.slane %v5543_v16, %v7540_v62 }
  0xaf   :  { %v2108_v29 = vrot.slane %v5543_v16, %v7545_v38  ;;  %v2112_v63 = vrot.slane %v5554_v21, %v7540_v62  ;;  %v2116_v56 = vrot.slane %v5554_v21, %v7545_v38  ;;  %v2120_v49 = vrot.slane %v5567_v31, %v7540_v62 }
  0xb0   :  { %v1756_v19 = vadd.f32 %v1755_v33, %v1754_v44  ;;  %v2124_v17 = vrot.slane %v5567_v31, %v7545_v38  ;;  %v2128_v15 = vrot.slane %v5572_v22, %v7540_v62  ;;  %v2132_v11 = vrot.slane %v5572_v22, %v7545_v38  ;;  %v2020_v22 = vld [vmem:[%s7133_s2 + $0x78] sm:$0xff] }
  0xb1   :  { %v2136_v30 = vrot.slane %v5583_v1, %v7540_v62  ;;  %v2140_v52 = vrot.slane %v5583_v1, %v7545_v38  ;;  %v2144_v18 = vrot.slane %v5588_v9, %v7540_v62  ;;  %v2148_v55 = vrot.slane %v5588_v9, %v7545_v38  ;;  %v2019_v1 = vld [vmem:[%s7133_s2 + $0x70] sm:$0xff] }
  0xb2   :  { %v1758_v10 = vadd.f32 %v1757_v40, %v1756_v19  ;;  %v2152_v46 = vrot.slane %v5601_v51, %v7540_v62  ;;  %v2156_v50 = vrot.slane %v5601_v51, %v7545_v38  ;;  %v2160_v43 = vrot.slane %v5606_v45, %v7540_v62  ;;  %v2006_v19 = vld [vmem:[%s7133_s2 + $0x8] sm:$0xff]  ;;  %v2017_v51 = vld [vmem:[%s7133_s2 + $0x60] sm:$0xff] }
  0xb3   :  { %v2164_v39 = vrot.slane %v5606_v45, %v7545_v38  ;;  %v5639_v54 = vrot.slane %v2040_v42, %v7540_v62  ;;  %v5642_v58 = vrot.slane %v2044_v35, %v7540_v62  ;;  %v5645_v33 = vrot.slane %v2048_v20, %v7540_v62  ;;  %v2016_v45 = vld [vmem:[%s7133_s2 + $0x58] sm:$0xff] }
  0xb4   :  { %v1760_v4 = vadd.f32 %v1759_v36, %v1758_v10  ;;  %v5648_v40 = vrot.slane %v2052_v3, %v7540_v62  ;;  %v5651_v36 = vrot.slane %v2056_v48, %v7540_v62  ;;  %v5657_v38 = vrot.slane %v2064_v32, %v7540_v62  ;;  %v2010_v10 = vld [vmem:[%s7133_s2 + $0x28] sm:$0xff] }
  0xb5   :  { %v5660_v42 = vrot.slane %v2068_v25, %v7540_v62  ;;  %v5663_v35 = vrot.slane %v2072_v26, %v7540_v62  ;;  %v5666_v20 = vrot.slane %v2076_v6, %v7540_v62  ;;  %v5669_v3 = vrot.slane %v2080_v28, %v7540_v62  ;;  %v2007_v28 = vld [vmem:[%s7133_s2 + $0x10] sm:$0xff] }
  0xb6   :  { %v1762_v59 = vadd.f32 %v1761_v14, %v1760_v4  ;;  %v5654_v14 = vrot.slane %v2060_v60, %v7540_v62  ;;  %v5672_v48 = vrot.slane %v2084_v5, %v7540_v62  ;;  %v2005_v60 = vld [vmem:[%s7133_s2] sm:$0xff]  ;;  %v5681_v32 = vrot.slane %v2092_v37, %v7540_v62  ;;  %v2008_v5 = vld [vmem:[%s7133_s2 + $0x18] sm:$0xff]  ;;  %v2011_v4 = vld [vmem:[%s7133_s2 + $0x30] sm:$0xff] }
  0xb7   :  { %7555 = vst [vmem:[#allocation18_spill] sm:$0xff] %v5669_v3  ;;  %v5684_v25 = vrot.slane %v2096_v61, %v7540_v62  ;;  %v5687_v26 = vrot.slane %v2100_v8, %v7540_v62  ;;  %v5690_v6 = vrot.slane %v2104_v23, %v7540_v62  ;;  %v2272_v37 = vrot.slane %v2112_v63, %v7540_v62  ;;  %v2009_v23 = vld [vmem:[%s7133_s2 + $0x20] sm:$0xff] }
  0xb8   :  { %v1764_v44 = vadd.f32 %v1763_v57, %v1762_v59  ;;  %7556 = vst [vmem:[#allocation5_spill] sm:$0xff] %v5672_v48  ;;  %v5675_v57 = vrot.slane %v2088_v0, %v7540_v62  ;;  %7558 = vst [vmem:[#allocation19_spill] sm:$0xff] %v5681_v32  ;;  %v2268_v0 = vrot.slane %v2108_v29, %v7540_v62  ;;  %v2012_v59 = vld [vmem:[%s7133_s2 + $0x38] sm:$0xff] }
  0xb9   :  { %7559 = vst [vmem:[#allocation60_spill] sm:$0xff] %v5684_v25  ;;  %7560 = vst [vmem:[#allocation17_spill] sm:$0xff] %v5687_v26  ;;  %v2276_v61 = vrot.slane %v2116_v56, %v7540_v62  ;;  %v2280_v8 = vrot.slane %v2120_v49, %v7540_v62  ;;  %v2284_v29 = vrot.slane %v2124_v17, %v7540_v62 }
  0xba   :  { %7557 = vst [vmem:[#allocation6_spill] sm:$0xff] %v5675_v57  ;;  %1765 = vadd.xlane.f32.xlu0 %v1764_v44  ;;  %7561 = vst [vmem:[#allocation61_spill] sm:$0xff] %v5690_v6  ;;  %v2288_v63 = vrot.slane %v2128_v15, %v7540_v62  ;;  %v2292_v56 = vrot.slane %v2132_v11, %v7540_v62  ;;  %v2296_v49 = vrot.slane %v2136_v30, %v7540_v62  ;;  %v2013_v44 = vld [vmem:[%s7133_s2 + $0x40] sm:$0xff] }
  0xbb   :  { %v2300_v17 = vrot.slane %v2140_v52, %v7540_v62  ;;  %v2304_v15 = vrot.slane %v2144_v18, %v7540_v62  ;;  %v2308_v11 = vrot.slane %v2148_v55, %v7540_v62  ;;  %v2312_v30 = vrot.slane %v2152_v46, %v7540_v62  ;;  %v2018_v46 = vld [vmem:[%s7133_s2 + $0x68] sm:$0xff] }
  0xbc   :  { %v2316_v52 = vrot.slane %v2156_v50, %v7540_v62  ;;  %v2320_v18 = vrot.slane %v2160_v43, %v7540_v62  ;;  %v2324_v55 = vrot.slane %v2164_v39, %v7540_v62  ;;  %v2341_v9 = vcombine.high %v2005_v60, %v2005_v60 }
  0xbd   :  { %v2342_v31 = vcombine.high %v2006_v19, %v2006_v19  ;;  %v2343_v21 = vcombine.high %v2007_v28, %v2007_v28  ;;  %v2344_v50 = vcombine.high %v2008_v5, %v2008_v5  ;;  %v2345_v16 = vcombine.high %v2009_v23, %v2009_v23 }
  0xbe   :  { %v2346_v43 = vcombine.high %v2010_v10, %v2010_v10  ;;  %v2347_v27 = vcombine.high %v2011_v4, %v2011_v4  ;;  %v2348_v62 = vcombine.high %v2012_v59, %v2012_v59  ;;  %v2349_v39 = vcombine.high %v2013_v44, %v2013_v44 }
  0xbf   :  { %v2350_v53 = vcombine.high %v2014_v13, %v2014_v13  ;;  %v2351_v47 = vcombine.high %v2015_v24, %v2015_v24  ;;  %v2352_v7 = vcombine.high %v2016_v45, %v2016_v45  ;;  %v2353_v2 = vcombine.high %v2017_v51, %v2017_v51 }
  0xc0   :  { %v2354_v34 = vcombine.high %v2018_v46, %v2018_v46  ;;  %v2355_v41 = vcombine.high %v2019_v1, %v2019_v1  ;;  %v2356_v12 = vcombine.high %v2020_v22, %v2020_v22  ;;  %v5753_v6 = vmul.f32 %v5639_v54, %v2005_v60 }
  0xc1   :  { %v5756_v26 = vmul.f32 %v2341_v9, %v5642_v58  ;;  %v5759_v25 = vmul.f32 %v5645_v33, %v2006_v19  ;;  %v5762_v32 = vmul.f32 %v2342_v31, %v5648_v40  ;;  %v5765_v57 = vmul.f32 %v5651_v36, %v2007_v28  ;;  %v7572_v31 = vld [vmem:[#allocation18_spill] sm:$0xff]  ;;  %v7574_v40 = vld [vmem:[#allocation5_spill] sm:$0xff] }
  0xc2   :  { %7562 = vst [vmem:[#allocation9_spill] sm:$0xff] %v5753_v6  ;;  %v5768_v48 = vmul.f32 %v2343_v21, %v5654_v14  ;;  %v5771_v3 = vmul.f32 %v5657_v38, %v2008_v5  ;;  %v5774_v54 = vmul.f32 %v2344_v50, %v5660_v42  ;;  %v5777_v9 = vmul.f32 %v5663_v35, %v2009_v23  ;;  %v7576_v21 = vld [vmem:[#allocation6_spill] sm:$0xff]  ;;  %v7578_v38 = vld [vmem:[#allocation19_spill] sm:$0xff]  ;;  %v7580_v42 = vld [vmem:[#allocation60_spill] sm:$0xff] }
  0xc3   :  { %7563 = vst [vmem:[#allocation62_spill] sm:$0xff] %v5756_v26  ;;  %7564 = vst [vmem:[#allocation63_spill] sm:$0xff] %v5759_v25  ;;  %v5780_v58 = vmul.f32 %v2345_v16, %v5666_v20  ;;  %v5783_v33 = vmul.f32 %v7572_v31, %v2010_v10  ;;  %v5786_v36 = vmul.f32 %v2346_v43, %v7574_v40  ;;  %v7582_v35 = vld [vmem:[#allocation17_spill] sm:$0xff] }
  0xc4   :  { %7565 = vst [vmem:[#allocation32_spill] sm:$0xff] %v5762_v32  ;;  %7566 = vst [vmem:[#allocation12_spill] sm:$0xff] %v5765_v57  ;;  %v5789_v14 = vmul.f32 %v7576_v21, %v2011_v4  ;;  %v5792_v60 = vmul.f32 %v2347_v27, %v7578_v38  ;;  %v5795_v19 = vmul.f32 %v7580_v42, %v2012_v59  ;;  %v7584_v16 = vld [vmem:[#allocation61_spill] sm:$0xff]  ;;  %v7612_v42 = vld [vmem:[#allocation54_spill] sm:$0xff] }
  0xc5   :  { %7567 = vst [vmem:[#allocation33_spill] sm:$0xff] %v5768_v48  ;;  %7568 = vst [vmem:[#allocation34_spill] sm:$0xff] %v5771_v3  ;;  %v5798_v28 = vmul.f32 %v2348_v62, %v7582_v35  ;;  %v5801_v20 = vmul.f32 %v7584_v16, %v2013_v44  ;;  %v5803_v5 = vmul.f32 %v2349_v39, %v2268_v0  ;;  %v7611_v40 = vld [vmem:[#allocation53_spill] sm:$0xff] }
  0xc6   :  { %7569 = vst [vmem:[#allocation35_spill] sm:$0xff] %v5774_v54  ;;  %7570 = vst [vmem:[#allocation13_spill] sm:$0xff] %v5777_v9  ;;  %v5805_v23 = vmul.f32 %v2272_v37, %v2014_v13  ;;  %v5807_v10 = vmul.f32 %v2350_v53, %v2276_v61  ;;  %v5809_v4 = vmul.f32 %v2280_v8, %v2015_v24  ;;  %v7602_v37 = vld [vmem:[#allocation22_spill] sm:$0xff]  ;;  %v7603_v61 = vld [vmem:[#allocation11_spill] sm:$0xff] }
  0xc7   :  { %7571 = vst [vmem:[#allocation36_spill] sm:$0xff] %v5780_v58  ;;  %7573 = vst [vmem:[#allocation37_spill] sm:$0xff] %v5783_v33  ;;  %v5811_v50 = vmul.f32 %v2351_v47, %v2284_v29  ;;  %v5813_v27 = vmul.f32 %v2288_v63, %v2016_v45  ;;  %v5815_v59 = vmul.f32 %v2352_v7, %v2292_v56  ;;  %v7601_v45 = vld [vmem:[#allocation10_spill] sm:$0xff] }
  0xc8   :  { %7575 = vst [vmem:[#allocation38_spill] sm:$0xff] %v5786_v36  ;;  %7577 = vst [vmem:[#allocation16_spill] sm:$0xff] %v5789_v14  ;;  %v5817_v43 = vmul.f32 %v2296_v49, %v2017_v51  ;;  %v5819_v62 = vmul.f32 %v2353_v2, %v2300_v17  ;;  %v5821_v44 = vmul.f32 %v2304_v15, %v2018_v46  ;;  %v7604_v2 = vld [vmem:[#allocation23_spill] sm:$0xff]  ;;  %v7607_v56 = vld [vmem:[#allocation50_spill] sm:$0xff] }
  0xc9   :  { %7579 = vst [vmem:[#allocation25_spill] sm:$0xff] %v5792_v60  ;;  %7581 = vst [vmem:[#allocation26_spill] sm:$0xff] %v5795_v19  ;;  %v5823_v0 = vmul.f32 %v2354_v34, %v2308_v11  ;;  %v5825_v13 = vmul.f32 %v2312_v30, %v2019_v1  ;;  %v5827_v53 = vmul.f32 %v2355_v41, %v2316_v52  ;;  %v7605_v1 = vld [vmem:[#allocation24_spill] sm:$0xff]  ;;  %v7608_v15 = vld [vmem:[#allocation7_spill] sm:$0xff] }
  0xca   :  { %7583 = vst [vmem:[#allocation27_spill] sm:$0xff] %v5798_v28  ;;  %7585 = vst [vmem:[#allocation28_spill] sm:$0xff] %v5801_v20  ;;  %v5829_v24 = vmul.f32 %v2320_v18, %v2020_v22  ;;  %v5831_v47 = vmul.f32 %v2356_v12, %v2324_v55  ;;  %v2424_v7 = vrot.slane %v7602_v37, %v7601_v45  ;;  %v7606_v12 = vld [vmem:[#allocation2_spill] sm:$0xff]  ;;  %v7609_v52 = vld [vmem:[#allocation51_spill] sm:$0xff] }
  0xcb   :  { %7586 = vst [vmem:[#allocation29_spill] sm:$0xff] %v5803_v5  ;;  %7587 = vst [vmem:[#allocation30_spill] sm:$0xff] %v5805_v23  ;;  %v2428_v51 = vrot.slane %v7602_v37, %v7603_v61  ;;  %v2432_v8 = vrot.slane %v7604_v2, %v7601_v45  ;;  %v2436_v34 = vrot.slane %v7604_v2, %v7603_v61  ;;  %v7610_v46 = vld [vmem:[#allocation52_spill] sm:$0xff]  ;;  %v4015_v23 = vld [vmem:[%s7133_s2 + $0xc0] sm:$0xff] }
  0xcc   :  { %7588 = vst [vmem:[#allocation31_spill] sm:$0xff] %v5807_v10  ;;  %7589 = vst [vmem:[#allocation39_spill] sm:$0xff] %v5809_v4  ;;  %v2440_v41 = vrot.slane %v7605_v1, %v7601_v45  ;;  %v2444_v22 = vrot.slane %v7605_v1, %v7603_v61  ;;  %v2448_v29 = vrot.slane %v7606_v12, %v7601_v45  ;;  %v4013_v4 = vld [vmem:[%s7133_s2 + $0xb0] sm:$0xff]  ;;  %v4014_v10 = vld [vmem:[%s7133_s2 + $0xb8] sm:$0xff] }
  0xcd   :  { %7590 = vst [vmem:[#allocation40_spill] sm:$0xff] %v5811_v50  ;;  %7591 = vst [vmem:[#allocation41_spill] sm:$0xff] %v5813_v27  ;;  %v2452_v63 = vrot.slane %v7606_v12, %v7603_v61  ;;  %v2456_v49 = vrot.slane %v7607_v56, %v7601_v45  ;;  %v2460_v17 = vrot.slane %v7607_v56, %v7603_v61  ;;  %v4011_v27 = vld [vmem:[%s7133_s2 + $0xa0] sm:$0xff]  ;;  %v4012_v50 = vld [vmem:[%s7133_s2 + $0xa8] sm:$0xff] }
  0xce   :  { %7592 = vst [vmem:[#allocation42_spill] sm:$0xff] %v5815_v59  ;;  %7593 = vst [vmem:[#allocation43_spill] sm:$0xff] %v5817_v43  ;;  %v2464_v11 = vrot.slane %v7608_v15, %v7601_v45  ;;  %v2468_v30 = vrot.slane %v7608_v15, %v7603_v61  ;;  %v2472_v18 = vrot.slane %v7609_v52, %v7601_v45  ;;  %v4016_v5 = vld [vmem:[%s7133_s2 + $0xc8] sm:$0xff]  ;;  %v4017_v20 = vld [vmem:[%s7133_s2 + $0xd0] sm:$0xff] }
  0xcf   :  { %7594 = vst [vmem:[#allocation44_spill] sm:$0xff] %v5819_v62  ;;  %7595 = vst [vmem:[#allocation45_spill] sm:$0xff] %v5821_v44  ;;  %v2476_v55 = vrot.slane %v7609_v52, %v7603_v61  ;;  %v2480_v39 = vrot.slane %v7610_v46, %v7601_v45  ;;  %v2484_v31 = vrot.slane %v7610_v46, %v7603_v61  ;;  %v7614_v46 = vld [vmem:[#allocation57_spill] sm:$0xff]  ;;  %v4019_v19 = vld [vmem:[%s7133_s2 + $0xe0] sm:$0xff] }
  0xd0   :  { %7596 = vst [vmem:[#allocation46_spill] sm:$0xff] %v5823_v0  ;;  %7597 = vst [vmem:[#allocation47_spill] sm:$0xff] %v5825_v13  ;;  %v2488_v21 = vrot.slane %v7611_v40, %v7601_v45  ;;  %v2492_v38 = vrot.slane %v7611_v40, %v7603_v61  ;;  %v2496_v35 = vrot.slane %v7612_v42, %v7601_v45  ;;  %v7615_v40 = vld [vmem:[#allocation58_spill] sm:$0xff]  ;;  %v4018_v28 = vld [vmem:[%s7133_s2 + $0xd8] sm:$0xff] }
  0xd1   :  { %7598 = vst [vmem:[#allocation48_spill] sm:$0xff] %v5827_v53  ;;  %7599 = vst [vmem:[#allocation49_spill] sm:$0xff] %v5829_v24  ;;  %v2500_v16 = vrot.slane %v7612_v42, %v7603_v61  ;;  %v2512_v56 = vrot.slane %v7614_v46, %v7601_v45  ;;  %v2516_v12 = vrot.slane %v7614_v46, %v7603_v61  ;;  %v7616_v42 = vld [vmem:[#allocation59_spill] sm:$0xff]  ;;  %v7618_v46 = vld [vmem:[#allocation56_spill] sm:$0xff] }
  0xd2   :  { %7600 = vst [vmem:[#allocation3_spill] sm:$0xff] %v5831_v47  ;;  %v7613_v47 = vld [vmem:[#allocation55_spill] sm:$0xff]  ;;  %v2520_v1 = vrot.slane %v7615_v40, %v7601_v45  ;;  %v2524_v2 = vrot.slane %v7615_v40, %v7603_v61  ;;  %v2528_v37 = vrot.slane %v7616_v42, %v7601_v45  ;;  %v2532_v24 = vrot.slane %v7616_v42, %v7603_v61  ;;  %v4021_v14 = vld [vmem:[%s7133_s2 + $0xf0] sm:$0xff]  ;;  %v4022_v36 = vld [vmem:[%s7133_s2 + $0xf8] sm:$0xff] }
  0xd3   :  { %v2504_v52 = vrot.slane %v7613_v47, %v7601_v45  ;;  %v2508_v15 = vrot.slane %v7613_v47, %v7603_v61  ;;  %v7617_v47 = vld [vmem:[#allocation8_spill] sm:$0xff]  ;;  %v2544_v0 = vrot.slane %v7618_v46, %v7601_v45  ;;  %v2548_v44 = vrot.slane %v7618_v46, %v7603_v61 }
  0xd4   :  { %v2536_v53 = vrot.slane %v7617_v47, %v7601_v45  ;;  %v2540_v13 = vrot.slane %v7617_v47, %v7603_v61  ;;  %v5898_v40 = vrot.slane %v2424_v7, %v7601_v45  ;;  %v5901_v62 = vrot.slane %v2428_v51, %v7601_v45 }
  0xd5   :  { %v5904_v42 = vrot.slane %v2432_v8, %v7601_v45  ;;  %v5907_v43 = vrot.slane %v2436_v34, %v7601_v45  ;;  %v5910_v47 = vrot.slane %v2440_v41, %v7601_v45  ;;  %v5913_v59 = vrot.slane %v2444_v22, %v7601_v45 }
  0xd6   :  { %v5916_v61 = vrot.slane %v2448_v29, %v7601_v45  ;;  %v5919_v7 = vrot.slane %v2452_v63, %v7601_v45  ;;  %v5922_v51 = vrot.slane %v2456_v49, %v7601_v45  ;;  %v5925_v8 = vrot.slane %v2460_v17, %v7601_v45  ;;  %v4007_v29 = vld [vmem:[%s7133_s2 + $0x80] sm:$0xff] }
  0xd7   :  { %v5928_v34 = vrot.slane %v2464_v11, %v7601_v45  ;;  %v5931_v41 = vrot.slane %v2468_v30, %v7601_v45  ;;  %v5934_v22 = vrot.slane %v2472_v18, %v7601_v45  ;;  %v5940_v63 = vrot.slane %v2476_v55, %v7601_v45  ;;  %v4008_v30 = vld [vmem:[%s7133_s2 + $0x88] sm:$0xff]  ;;  %v4009_v18 = vld [vmem:[%s7133_s2 + $0x90] sm:$0xff]  ;;  %v4010_v55 = vld [vmem:[%s7133_s2 + $0x98] sm:$0xff] }
  0xd8   :  { %7619 = vst [vmem:[#allocation4_spill] sm:$0xff] %v5925_v8  ;;  %v5943_v49 = vrot.slane %v2480_v39, %v7601_v45  ;;  %v5946_v17 = vrot.slane %v2484_v31, %v7601_v45  ;;  %v5949_v11 = vrot.slane %v2488_v21, %v7601_v45  ;;  %v2652_v39 = vrot.slane %v2492_v38, %v7601_v45 }
  0xd9   :  { %7620 = vst [vmem:[#allocation18_spill] sm:$0xff] %v5928_v34  ;;  %7621 = vst [vmem:[#allocation5_spill] sm:$0xff] %v5931_v41  ;;  %v2656_v31 = vrot.slane %v2496_v35, %v7601_v45  ;;  %v2660_v46 = vrot.slane %v2500_v16, %v7601_v45  ;;  %v2664_v21 = vrot.slane %v2504_v52, %v7601_v45 }
  0xda   :  { %7622 = vst [vmem:[#allocation6_spill] sm:$0xff] %v5934_v22  ;;  %7623 = vst [vmem:[#allocation19_spill] sm:$0xff] %v5940_v63  ;;  %v2668_v38 = vrot.slane %v2508_v15, %v7601_v45  ;;  %v2672_v35 = vrot.slane %v2512_v56, %v7601_v45  ;;  %v2676_v16 = vrot.slane %v2516_v12, %v7601_v45 }
  0xdb   :  { %7624 = vst [vmem:[#allocation60_spill] sm:$0xff] %v5943_v49  ;;  %7625 = vst [vmem:[#allocation17_spill] sm:$0xff] %v5946_v17  ;;  %v2680_v52 = vrot.slane %v2520_v1, %v7601_v45  ;;  %v2684_v15 = vrot.slane %v2524_v2, %v7601_v45  ;;  %v2688_v56 = vrot.slane %v2528_v37, %v7601_v45 }
  0xdc   :  { %7626 = vst [vmem:[#allocation61_spill] sm:$0xff] %v5949_v11  ;;  %v2692_v12 = vrot.slane %v2532_v24, %v7601_v45  ;;  %v2696_v1 = vrot.slane %v2536_v53, %v7601_v45  ;;  %v2700_v2 = vrot.slane %v2540_v13, %v7601_v45  ;;  %v2704_v37 = vrot.slane %v2544_v0, %v7601_v45  ;;  %v4020_v53 = vld [vmem:[%s7133_s2 + $0xe8] sm:$0xff] }
  0xdd   :  { %v2708_v24 = vrot.slane %v2548_v44, %v7601_v45  ;;  %v2725_v60 = vcombine.high %v4007_v29, %v4007_v29  ;;  %v2726_v33 = vcombine.high %v4008_v30, %v4008_v30  ;;  %v2727_v58 = vcombine.high %v4009_v18, %v4009_v18 }
  0xde   :  { %v2728_v13 = vcombine.high %v4010_v55, %v4010_v55  ;;  %v2729_v9 = vcombine.high %v4011_v27, %v4011_v27  ;;  %v2730_v0 = vcombine.high %v4012_v50, %v4012_v50  ;;  %v2731_v54 = vcombine.high %v4013_v4, %v4013_v4 }
  0xdf   :  { %v2732_v44 = vcombine.high %v4014_v10, %v4014_v10  ;;  %v2733_v45 = vcombine.high %v4015_v23, %v4015_v23  ;;  %v2734_v3 = vcombine.high %v4016_v5, %v4016_v5  ;;  %v2735_v48 = vcombine.high %v4017_v20, %v4017_v20 }
  0xe0   :  { %v2736_v57 = vcombine.high %v4018_v28, %v4018_v28  ;;  %v2737_v32 = vcombine.high %v4019_v19, %v4019_v19  ;;  %v2738_v25 = vcombine.high %v4020_v53, %v4020_v53  ;;  %v2739_v26 = vcombine.high %v4021_v14, %v4021_v14 }
  0xe1   :  { %v2740_v6 = vcombine.high %v4022_v36, %v4022_v36  ;;  %v2757_v11 = vmul.f32 %v4007_v29, %v5898_v40  ;;  %v2758_v17 = vmul.f32 %v2725_v60, %v5901_v62  ;;  %v2759_v49 = vmul.f32 %v4008_v30, %v5904_v42  ;;  %v7627_v40 = vld [vmem:[#allocation4_spill] sm:$0xff]  ;;  %v7628_v62 = vld [vmem:[#allocation18_spill] sm:$0xff]  ;;  %v7629_v42 = vld [vmem:[#allocation5_spill] sm:$0xff] }
  0xe2   :  { %v2760_v63 = vmul.f32 %v2726_v33, %v5907_v43  ;;  %v2761_v22 = vmul.f32 %v4009_v18, %v5910_v47  ;;  %v2762_v41 = vmul.f32 %v2727_v58, %v5913_v59  ;;  %v2763_v34 = vmul.f32 %v4010_v55, %v5916_v61  ;;  %v7630_v43 = vld [vmem:[#allocation6_spill] sm:$0xff]  ;;  %v7631_v47 = vld [vmem:[#allocation19_spill] sm:$0xff]  ;;  %v7632_v59 = vld [vmem:[#allocation60_spill] sm:$0xff] }
  0xe3   :  { %v2764_v8 = vmul.f32 %v2728_v13, %v5919_v7  ;;  %v2765_v29 = vmul.f32 %v4011_v27, %v5922_v51  ;;  %v2766_v60 = vmul.f32 %v2729_v9, %v7627_v40  ;;  %v2767_v30 = vmul.f32 %v4012_v50, %v7628_v62  ;;  %v7633_v61 = vld [vmem:[#allocation17_spill] sm:$0xff] }
  0xe4   :  { %v2768_v33 = vmul.f32 %v2730_v0, %v7629_v42  ;;  %v2769_v18 = vmul.f32 %v4013_v4, %v7630_v43  ;;  %v2770_v58 = vmul.f32 %v2731_v54, %v7631_v47  ;;  %v2771_v55 = vmul.f32 %v4014_v10, %v7632_v59  ;;  %v7634_v13 = vld [vmem:[#allocation61_spill] sm:$0xff] }
  0xe5   :  { %v2772_v7 = vmul.f32 %v2732_v44, %v7633_v61  ;;  %v2773_v27 = vmul.f32 %v4015_v23, %v7634_v13  ;;  %v2774_v51 = vmul.f32 %v2733_v45, %v2652_v39  ;;  %v2775_v9 = vmul.f32 %v4016_v5, %v2656_v31  ;;  %v7636_v13 = vld [vmem:[#allocation9_spill] sm:$0xff]  ;;  %v7637_v39 = vld [vmem:[#allocation62_spill] sm:$0xff] }
  0xe6   :  { %v2776_v40 = vmul.f32 %v2734_v3, %v2660_v46  ;;  %v2777_v50 = vmul.f32 %v4017_v20, %v2664_v21  ;;  %v2778_v62 = vmul.f32 %v2735_v48, %v2668_v38  ;;  %v2779_v0 = vmul.f32 %v4018_v28, %v2672_v35  ;;  %v7638_v3 = vld [vmem:[#allocation63_spill] sm:$0xff]  ;;  %v7639_v48 = vld [vmem:[#allocation32_spill] sm:$0xff]  ;;  %v7647_v5 = vld [vmem:[#allocation13_spill] sm:$0xff] }
  0xe7   :  { %v2780_v42 = vmul.f32 %v2736_v57, %v2676_v16  ;;  %v2781_v4 = vmul.f32 %v4019_v19, %v2680_v52  ;;  %v2782_v43 = vmul.f32 %v2737_v32, %v2684_v15  ;;  %v2783_v47 = vmul.f32 %v4020_v53, %v2688_v56  ;;  %v7640_v32 = vld [vmem:[#allocation12_spill] sm:$0xff]  ;;  %v7661_v16 = vld [vmem:[#allocation27_spill] sm:$0xff] }
  0xe8   :  { %v2784_v54 = vmul.f32 %v2738_v25, %v2692_v12  ;;  %v2785_v10 = vmul.f32 %v4021_v14, %v2696_v1  ;;  %v2786_v59 = vmul.f32 %v2739_v26, %v2700_v2  ;;  %v2787_v44 = vmul.f32 %v4022_v36, %v2704_v37  ;;  %v7641_v25 = vld [vmem:[#allocation33_spill] sm:$0xff]  ;;  %v7645_v14 = vld [vmem:[#allocation35_spill] sm:$0xff]  ;;  %v7663_v15 = vld [vmem:[#allocation28_spill] sm:$0xff] }
  0xe9   :  { %v6028_v61 = vmul.f32 %v2740_v6, %v2708_v24  ;;  %v6031_v23 = vadd.f32 %v2757_v11, %v7636_v13  ;;  %v6034_v45 = vadd.f32 %v2758_v17, %v7637_v39  ;;  %v6037_v20 = vadd.f32 %v2759_v49, %v7638_v3  ;;  %v7643_v6 = vld [vmem:[#allocation34_spill] sm:$0xff]  ;;  %v7649_v49 = vld [vmem:[#allocation36_spill] sm:$0xff]  ;;  %v7665_v12 = vld [vmem:[#allocation29_spill] sm:$0xff] }
  0xea   :  { %v6040_v57 = vadd.f32 %v2760_v63, %v7639_v48  ;;  %v6043_v19 = vadd.f32 %v2761_v22, %v7640_v32  ;;  %v6046_v26 = vadd.f32 %v2762_v41, %v7641_v25  ;;  %v6049_v36 = vadd.f32 %v2763_v34, %v7643_v6  ;;  %v7651_v63 = vld [vmem:[#allocation37_spill] sm:$0xff]  ;;  %v7653_v22 = vld [vmem:[#allocation38_spill] sm:$0xff]  ;;  %v7655_v41 = vld [vmem:[#allocation16_spill] sm:$0xff] }
  0xeb   :  { %7635 = vst [vmem:[#allocation10_spill] sm:$0xff] %v6028_v61  ;;  %v6052_v28 = vadd.f32 %v2764_v8, %v7645_v14  ;;  %v6055_v46 = vadd.f32 %v2765_v29, %v7647_v5  ;;  %v6058_v17 = vadd.f32 %v2766_v60, %v7649_v49  ;;  %v6061_v11 = vadd.f32 %v2767_v30, %v7651_v63  ;;  %v7657_v34 = vld [vmem:[#allocation25_spill] sm:$0xff]  ;;  %v7659_v8 = vld [vmem:[#allocation26_spill] sm:$0xff]  ;;  %v7669_v24 = vld [vmem:[#allocation31_spill] sm:$0xff] }
  0xec   :  { %7642 = vst [vmem:[#allocation11_spill] sm:$0xff] %v6046_v26  ;;  %7644 = vst [vmem:[#allocation4_spill] sm:$0xff] %v6049_v36  ;;  %v6064_v31 = vadd.f32 %v2768_v33, %v7653_v22  ;;  %v6067_v21 = vadd.f32 %v2769_v18, %v7655_v41  ;;  %v6070_v38 = vadd.f32 %v2770_v58, %v7657_v34  ;;  %v7667_v2 = vld [vmem:[#allocation30_spill] sm:$0xff]  ;;  %v7671_v29 = vld [vmem:[#allocation39_spill] sm:$0xff] }
  0xed   :  { %7646 = vst [vmem:[#allocation18_spill] sm:$0xff] %v6052_v28  ;;  %7648 = vst [vmem:[#allocation5_spill] sm:$0xff] %v6055_v46  ;;  %v6073_v35 = vadd.f32 %v2771_v55, %v7659_v8  ;;  %v6076_v52 = vadd.f32 %v2772_v7, %v7661_v16  ;;  %v6079_v56 = vadd.f32 %v2773_v27, %v7663_v15  ;;  %v7673_v30 = vld [vmem:[#allocation40_spill] sm:$0xff]  ;;  %v7675_v18 = vld [vmem:[#allocation41_spill] sm:$0xff] }
  0xee   :  { %7650 = vst [vmem:[#allocation6_spill] sm:$0xff] %v6058_v17  ;;  %7652 = vst [vmem:[#allocation19_spill] sm:$0xff] %v6061_v11  ;;  %v6082_v1 = vadd.f32 %v2774_v51, %v7665_v12  ;;  %v6085_v37 = vadd.f32 %v2775_v9, %v7667_v2  ;;  %v6088_v53 = vadd.f32 %v2776_v40, %v7669_v24  ;;  %v7677_v55 = vld [vmem:[#allocation42_spill] sm:$0xff]  ;;  %v7679_v27 = vld [vmem:[#allocation43_spill] sm:$0xff] }
  0xef   :  { %7654 = vst [vmem:[#allocation60_spill] sm:$0xff] %v6064_v31  ;;  %7656 = vst [vmem:[#allocation17_spill] sm:$0xff] %v6067_v21  ;;  %v6091_v60 = vadd.f32 %v2777_v50, %v7671_v29  ;;  %v6094_v33 = vadd.f32 %v2778_v62, %v7673_v30  ;;  %v6097_v58 = vadd.f32 %v2779_v0, %v7675_v18  ;;  %v7681_v9 = vld [vmem:[#allocation44_spill] sm:$0xff]  ;;  %v7683_v40 = vld [vmem:[#allocation45_spill] sm:$0xff] }
  0xf0   :  { %7658 = vst [vmem:[#allocation61_spill] sm:$0xff] %v6070_v38  ;;  %7660 = vst [vmem:[#allocation9_spill] sm:$0xff] %v6073_v35  ;;  %v6100_v7 = vadd.f32 %v2780_v42, %v7677_v55  ;;  %v6103_v51 = vadd.f32 %v2781_v4, %v7679_v27  ;;  %v6106_v13 = vadd.f32 %v2782_v43, %v7681_v9  ;;  %v7685_v50 = vld [vmem:[#allocation46_spill] sm:$0xff]  ;;  %v7687_v62 = vld [vmem:[#allocation47_spill] sm:$0xff] }
  0xf1   :  { %7662 = vst [vmem:[#allocation62_spill] sm:$0xff] %v6076_v52  ;;  %7664 = vst [vmem:[#allocation63_spill] sm:$0xff] %v6079_v56  ;;  %v6109_v39 = vadd.f32 %v2783_v47, %v7683_v40  ;;  %v6112_v3 = vadd.f32 %v2784_v54, %v7685_v50  ;;  %v6115_v48 = vadd.f32 %v2785_v10, %v7687_v62  ;;  %v7689_v0 = vld [vmem:[#allocation48_spill] sm:$0xff]  ;;  %v7691_v42 = vld [vmem:[#allocation49_spill] sm:$0xff] }
  0xf2   :  { %7666 = vst [vmem:[#allocation32_spill] sm:$0xff] %v6082_v1  ;;  %7668 = vst [vmem:[#allocation12_spill] sm:$0xff] %v6085_v37  ;;  %v6118_v32 = vadd.f32 %v2786_v59, %v7689_v0  ;;  %v6121_v25 = vadd.f32 %v2787_v44, %v7691_v42  ;;  %v7693_v4 = vld [vmem:[#allocation14_spill] sm:$0xff]  ;;  %v7695_v43 = vld [vmem:[#allocation15_spill] sm:$0xff] }
  0xf3   :  { %7670 = vst [vmem:[#allocation33_spill] sm:$0xff] %v6088_v53  ;;  %7672 = vst [vmem:[#allocation34_spill] sm:$0xff] %v6091_v60  ;;  %v7694_v6 = vld [vmem:[#allocation22_spill] sm:$0xff]  ;;  %v7696_v47 = vld [vmem:[#allocation23_spill] sm:$0xff] }
  0xf4   :  { %7674 = vst [vmem:[#allocation35_spill] sm:$0xff] %v6094_v33  ;;  %7676 = vst [vmem:[#allocation13_spill] sm:$0xff] %v6097_v58  ;;  %v2840_v14 = vrot.slane %v7694_v6, %v7693_v4  ;;  %v2844_v5 = vrot.slane %v7694_v6, %v7695_v43  ;;  %v2848_v49 = vrot.slane %v7696_v47, %v7693_v4  ;;  %v7697_v10 = vld [vmem:[#allocation24_spill] sm:$0xff]  ;;  %v7698_v44 = vld [vmem:[#allocation2_spill] sm:$0xff] }
  0xf5   :  { %7678 = vst [vmem:[#allocation36_spill] sm:$0xff] %v6100_v7  ;;  %7680 = vst [vmem:[#allocation37_spill] sm:$0xff] %v6103_v51  ;;  %v2852_v54 = vrot.slane %v7696_v47, %v7695_v43  ;;  %v2856_v63 = vrot.slane %v7697_v10, %v7693_v4  ;;  %v2860_v59 = vrot.slane %v7697_v10, %v7695_v43  ;;  %v7699_v34 = vld [vmem:[#allocation50_spill] sm:$0xff]  ;;  %v7700_v15 = vld [vmem:[#allocation7_spill] sm:$0xff] }
  0xf6   :  { %7682 = vst [vmem:[#allocation38_spill] sm:$0xff] %v6106_v13  ;;  %7684 = vst [vmem:[#allocation16_spill] sm:$0xff] %v6109_v39  ;;  %v2864_v22 = vrot.slane %v7698_v44, %v7693_v4  ;;  %v2868_v41 = vrot.slane %v7698_v44, %v7695_v43  ;;  %v2872_v8 = vrot.slane %v7699_v34, %v7693_v4  ;;  %v7701_v24 = vld [vmem:[#allocation51_spill] sm:$0xff]  ;;  %v7702_v18 = vld [vmem:[#allocation52_spill] sm:$0xff] }
  0xf7   :  { %7686 = vst [vmem:[#allocation25_spill] sm:$0xff] %v6112_v3  ;;  %7688 = vst [vmem:[#allocation26_spill] sm:$0xff] %v6115_v48  ;;  %v2876_v16 = vrot.slane %v7699_v34, %v7695_v43  ;;  %v2880_v12 = vrot.slane %v7700_v15, %v7693_v4  ;;  %v2884_v2 = vrot.slane %v7700_v15, %v7695_v43  ;;  %v7703_v9 = vld [vmem:[#allocation53_spill] sm:$0xff]  ;;  %v7704_v62 = vld [vmem:[#allocation54_spill] sm:$0xff] }
  0xf8   :  { %7690 = vst [vmem:[#allocation27_spill] sm:$0xff] %v6118_v32  ;;  %7692 = vst [vmem:[#allocation28_spill] sm:$0xff] %v6121_v25  ;;  %v2888_v29 = vrot.slane %v7701_v24, %v7693_v4  ;;  %v2892_v30 = vrot.slane %v7701_v24, %v7695_v43  ;;  %v2896_v55 = vrot.slane %v7702_v18, %v7693_v4  ;;  %v7705_v25 = vld [vmem:[#allocation55_spill] sm:$0xff]  ;;  %v7706_v61 = vld [vmem:[#allocation57_spill] sm:$0xff] }
  0xf9   :  { %v2900_v27 = vrot.slane %v7702_v18, %v7695_v43  ;;  %v2904_v40 = vrot.slane %v7703_v9, %v7693_v4  ;;  %v2908_v50 = vrot.slane %v7703_v9, %v7695_v43  ;;  %v2912_v0 = vrot.slane %v7704_v62, %v7693_v4  ;;  %v7707_v13 = vld [vmem:[#allocation58_spill] sm:$0xff]  ;;  %v4028_v9 = vld [vmem:[%s7133_s2 + $0x128] sm:$0xff]  ;;  %v4029_v21 = vld [vmem:[%s7133_s2 + $0x130] sm:$0xff] }
  0xfa   :  { %v2916_v42 = vrot.slane %v7704_v62, %v7695_v43  ;;  %v2920_v32 = vrot.slane %v7705_v25, %v7693_v4  ;;  %v2924_v48 = vrot.slane %v7705_v25, %v7695_v43  ;;  %v2928_v3 = vrot.slane %v7706_v61, %v7693_v4  ;;  %v7708_v62 = vld [vmem:[#allocation59_spill] sm:$0xff]  ;;  %v7709_v25 = vld [vmem:[#allocation8_spill] sm:$0xff]  ;;  %v6294_v18 = vld [vmem:[%s7133_s2 + $0x140] sm:$0xff] }
  0xfb   :  { %v2932_v39 = vrot.slane %v7706_v61, %v7695_v43  ;;  %v2936_v51 = vrot.slane %v7707_v13, %v7693_v4  ;;  %v2940_v7 = vrot.slane %v7707_v13, %v7695_v43  ;;  %v2944_v58 = vrot.slane %v7708_v62, %v7693_v4  ;;  %v7710_v61 = vld [vmem:[#allocation56_spill] sm:$0xff]  ;;  %v6299_v11 = vld [vmem:[%s7133_s2 + $0x148] sm:$0xff] }
  0xfc   :  { %v2948_v33 = vrot.slane %v7708_v62, %v7695_v43  ;;  %v2952_v60 = vrot.slane %v7709_v25, %v7693_v4  ;;  %v2956_v53 = vrot.slane %v7709_v25, %v7695_v43  ;;  %v2960_v37 = vrot.slane %v7710_v61, %v7693_v4  ;;  %v7727_v36 = vld [vmem:[#allocation20_spill] sm:$0xff] }
  0xfd   :  { %v2964_v1 = vrot.slane %v7710_v61, %v7695_v43  ;;  %v6188_v13 = vrot.slane %v2840_v14, %v7693_v4  ;;  %v6191_v56 = vrot.slane %v2844_v5, %v7693_v4  ;;  %v6194_v62 = vrot.slane %v2848_v49, %v7693_v4  ;;  %v4026_v61 = vld [vmem:[%s7133_s2 + $0x118] sm:$0xff] }
  0xfe   :  { %v6197_v52 = vrot.slane %v2852_v54, %v7693_v4  ;;  %v6200_v25 = vrot.slane %v2856_v63, %v7693_v4  ;;  %v6203_v35 = vrot.slane %v2860_v59, %v7693_v4  ;;  %v6206_v43 = vrot.slane %v2864_v22, %v7693_v4 }
  0xff   :  { %v6209_v14 = vrot.slane %v2868_v41, %v7693_v4  ;;  %v6212_v5 = vrot.slane %v2872_v8, %v7693_v4  ;;  %v6215_v49 = vrot.slane %v2876_v16, %v7693_v4  ;;  %v6218_v54 = vrot.slane %v2880_v12, %v7693_v4  ;;  %v4023_v41 = vld [vmem:[%s7133_s2 + $0x100] sm:$0xff]  ;;  %v4024_v8 = vld [vmem:[%s7133_s2 + $0x108] sm:$0xff] }
 0x100   :  { %v6221_v63 = vrot.slane %v2884_v2, %v7693_v4  ;;  %v6224_v59 = vrot.slane %v2888_v29, %v7693_v4  ;;  %v6227_v22 = vrot.slane %v2892_v30, %v7693_v4  ;;  %v6236_v16 = vrot.slane %v2896_v55, %v7693_v4  ;;  %v4025_v30 = vld [vmem:[%s7133_s2 + $0x110] sm:$0xff]  ;;  %v4027_v55 = vld [vmem:[%s7133_s2 + $0x120] sm:$0xff] }
 0x101   :  { %v6239_v12 = vrot.slane %v2900_v27, %v7693_v4  ;;  %v6242_v2 = vrot.slane %v2904_v40, %v7693_v4  ;;  %v6245_v29 = vrot.slane %v2908_v50, %v7693_v4  ;;  %v6257_v27 = vrot.slane %v2912_v0, %v7693_v4  ;;  %v6277_v0 = vld [vmem:[%s7133_s2 + $0x138] sm:$0xff] }
 0x102   :  { %v6260_v40 = vrot.slane %v2916_v42, %v7693_v4  ;;  %v6263_v50 = vrot.slane %v2920_v32, %v7693_v4  ;;  %v6266_v38 = vrot.slane %v2924_v48, %v7693_v4  ;;  %v6280_v42 = vrot.slane %v2928_v3, %v7693_v4 }
 0x103   :  { %v6283_v32 = vrot.slane %v2932_v39, %v7693_v4  ;;  %v6286_v48 = vrot.slane %v2936_v51, %v7693_v4  ;;  %v6289_v31 = vrot.slane %v2940_v7, %v7693_v4  ;;  %v6304_v39 = vld [vmem:[%s7133_s2 + $0x150] sm:$0xff]  ;;  %v6307_v51 = vrot.slane %v2944_v58, %v7693_v4 }
 0x104   :  { %7711 = vst [vmem:[#allocation29_spill] sm:$0xff] %v6260_v40  ;;  %7712 = vst [vmem:[#allocation30_spill] sm:$0xff] %v6263_v50  ;;  %v6310_v7 = vrot.slane %v2948_v33, %v7693_v4  ;;  %v6313_v3 = vrot.slane %v2952_v60, %v7693_v4  ;;  %v6331_v33 = vld [vmem:[%s7133_s2 + $0x168] sm:$0xff]  ;;  %v6334_v60 = vrot.slane %v2960_v37, %v7693_v4  ;;  %v7728_v40 = vld [vmem:[#allocation21_spill] sm:$0xff] }
 0x105   :  { %7713 = vst [vmem:[#allocation31_spill] sm:$0xff] %v6266_v38  ;;  %7714 = vst [vmem:[#allocation39_spill] sm:$0xff] %v6280_v42  ;;  %v3141_v58 = vcombine.high %v4023_v41, %v4023_v41  ;;  %v3144_v42 = vcombine.high %v4026_v61, %v4026_v61  ;;  %v3145_v38 = vcombine.high %v4027_v55, %v4027_v55  ;;  %v4039_v50 = vld [vmem:[%s7133_s2 + $0x180] sm:$0xff] }
 0x106   :  { %7715 = vst [vmem:[#allocation40_spill] sm:$0xff] %v6283_v32  ;;  %7716 = vst [vmem:[#allocation41_spill] sm:$0xff] %v6286_v48  ;;  %v6321_v48 = vld [vmem:[%s7133_s2 + $0x158] sm:$0xff]  ;;  %v6326_v32 = vld [vmem:[%s7133_s2 + $0x160] sm:$0xff]  ;;  %v3146_v37 = vcombine.high %v4028_v9, %v4028_v9  ;;  %v3256_v26 = vrot.slane %v7694_v6, %v7727_v36  ;;  %v3260_v17 = vrot.slane %v7694_v6, %v7728_v40 }
 0x107   :  { %7717 = vst [vmem:[#allocation42_spill] sm:$0xff] %v6289_v31  ;;  %7718 = vst [vmem:[#allocation43_spill] sm:$0xff] %v6307_v51  ;;  %v6316_v31 = vrot.slane %v2956_v53, %v7693_v4  ;;  %v6337_v53 = vrot.slane %v2964_v1, %v7693_v4  ;;  %v3143_v51 = vcombine.high %v4025_v30, %v4025_v30 }
 0x108   :  { %7719 = vst [vmem:[#allocation44_spill] sm:$0xff] %v6310_v7  ;;  %7720 = vst [vmem:[#allocation45_spill] sm:$0xff] %v6313_v3  ;;  %v6342_v3 = vld [vmem:[%s7133_s2 + $0x170] sm:$0xff]  ;;  %v6347_v7 = vld [vmem:[%s7133_s2 + $0x178] sm:$0xff]  ;;  %v3148_v1 = vcombine.high %v6277_v0, %v6277_v0  ;;  %v3149_v4 = vcombine.high %v6294_v18, %v6294_v18  ;;  %v3173_v24 = vmul.f32 %v4023_v41, %v6188_v13 }
 0x109   :  { %7721 = vst [vmem:[#allocation46_spill] sm:$0xff] %v6316_v31  ;;  %7722 = vst [vmem:[#allocation47_spill] sm:$0xff] %v6321_v48  ;;  %v3142_v31 = vcombine.high %v4024_v8, %v4024_v8  ;;  %v3174_v48 = vmul.f32 %v3141_v58, %v6191_v56  ;;  %v3175_v46 = vmul.f32 %v4024_v8, %v6194_v62 }
 0x10a   :  { %7723 = vst [vmem:[#allocation48_spill] sm:$0xff] %v6334_v60  ;;  %7724 = vst [vmem:[#allocation49_spill] sm:$0xff] %v6337_v53  ;;  %v3147_v60 = vcombine.high %v4029_v21, %v4029_v21  ;;  %v3150_v53 = vcombine.high %v6299_v11, %v6299_v11  ;;  %v3264_v15 = vrot.slane %v7696_v47, %v7727_v36 }
 0x10b   :  { %7725 = vst [vmem:[#allocation14_spill] sm:$0xff] %v6342_v3  ;;  %7726 = vst [vmem:[#allocation22_spill] sm:$0xff] %v6347_v7  ;;  %v3176_v28 = vmul.f32 %v3142_v31, %v6197_v52  ;;  %v3177_v7 = vmul.f32 %v4025_v30, %v6200_v25  ;;  %v3178_v3 = vmul.f32 %v3143_v51, %v6203_v35  ;;  %v4040_v31 = vld [vmem:[%s7133_s2 + $0x188] sm:$0xff] }
 0x10c   :  { %v3268_v6 = vrot.slane %v7696_v47, %v7728_v40  ;;  %v3179_v56 = vmul.f32 %v4026_v61, %v6206_v43  ;;  %v3180_v13 = vmul.f32 %v3144_v42, %v6209_v14  ;;  %v6387_v62 = vmul.f32 %v4027_v55, %v6212_v5  ;;  %v7730_v51 = vld [vmem:[#allocation11_spill] sm:$0xff] }
 0x10d   :  { %v6390_v41 = vmul.f32 %v3145_v38, %v6215_v49  ;;  %v3272_v35 = vrot.slane %v7697_v10, %v7727_v36  ;;  %v3416_v52 = vrot.slane %v3256_v26, %v7727_v36  ;;  %v3420_v47 = vrot.slane %v3260_v17, %v7727_v36 }
 0x10e   :  { %v3557_v25 = vcombine.high %v4039_v50, %v4039_v50  ;;  %v6400_v43 = vmul.f32 %v4028_v9, %v6218_v54  ;;  %v6403_v14 = vmul.f32 %v3146_v37, %v6221_v63  ;;  %v6406_v38 = vmul.f32 %v4029_v21, %v6224_v59  ;;  %v4041_v63 = vld [vmem:[%s7133_s2 + $0x190] sm:$0xff] }
 0x10f   :  { %v3424_v5 = vrot.slane %v3264_v15, %v7727_v36  ;;  %v6410_v49 = vmul.f32 %v3147_v60, %v6227_v22  ;;  %v3276_v26 = vrot.slane %v7697_v10, %v7728_v40  ;;  %v3428_v17 = vrot.slane %v3268_v6, %v7727_v36  ;;  %v7732_v6 = vld [vmem:[#allocation18_spill] sm:$0xff] }
 0x110   :  { %v3558_v8 = vcombine.high %v4040_v31, %v4040_v31  ;;  %v6417_v9 = vmul.f32 %v6277_v0, %v6236_v16  ;;  %v6420_v54 = vmul.f32 %v3148_v1, %v6239_v12  ;;  %v3205_v21 = vadd.f32 %v3173_v24, %v6031_v23  ;;  %v7731_v1 = vld [vmem:[#allocation4_spill] sm:$0xff] }
 0x111   :  { %v3206_v15 = vadd.f32 %v3174_v48, %v6034_v45  ;;  %v3280_v10 = vrot.slane %v7698_v44, %v7727_v36  ;;  %v3432_v59 = vrot.slane %v3272_v35, %v7727_v36  ;;  %v3589_v22 = vmul.f32 %v4039_v50, %v3416_v52  ;;  %v7733_v35 = vld [vmem:[#allocation7_spill] sm:$0xff] }
 0x112   :  { %v3590_v30 = vmul.f32 %v3557_v25, %v3420_v47  ;;  %v6432_v16 = vmul.f32 %v6294_v18, %v6242_v2  ;;  %v3207_v12 = vadd.f32 %v3175_v46, %v6037_v20  ;;  %v3208_v23 = vadd.f32 %v3176_v28, %v6040_v57  ;;  %v4042_v20 = vld [vmem:[%s7133_s2 + $0x198] sm:$0xff] }
 0x113   :  { %v3591_v45 = vmul.f32 %v4040_v31, %v3424_v5  ;;  %v3284_v24 = vrot.slane %v7698_v44, %v7728_v40  ;;  %v3436_v61 = vrot.slane %v3276_v26, %v7727_v36  ;;  %v3559_v55 = vcombine.high %v4041_v63, %v4041_v63 }
 0x114   :  { %v3592_v0 = vmul.f32 %v3558_v8, %v3428_v17  ;;  %v6440_v42 = vmul.f32 %v3149_v4, %v6245_v29  ;;  %v6444_v50 = vmul.f32 %v6299_v11, %v6257_v27  ;;  %v3209_v18 = vadd.f32 %v3177_v7, %v6043_v19  ;;  %v7729_v29 = vld [vmem:[#allocation29_spill] sm:$0xff] }
 0x115   :  { %v3288_v57 = vrot.slane %v7699_v34, %v7727_v36  ;;  %v3440_v28 = vrot.slane %v3280_v10, %v7727_v36  ;;  %v3593_v46 = vmul.f32 %v4041_v63, %v3432_v59  ;;  %v3621_v44 = vadd.f32 %v3589_v22, %v3205_v21  ;;  %v7734_v10 = vld [vmem:[#allocation30_spill] sm:$0xff]  ;;  %v7735_v22 = vld [vmem:[#allocation5_spill] sm:$0xff] }
 0x116   :  { %v3622_v2 = vadd.f32 %v3590_v30, %v3206_v15  ;;  %v6454_v48 = vmul.f32 %v3150_v53, %v7729_v29  ;;  %v3210_v11 = vadd.f32 %v3178_v3, %v7730_v51  ;;  %v3292_v19 = vrot.slane %v7699_v34, %v7728_v40  ;;  %v4043_v53 = vld [vmem:[%s7133_s2 + $0x1a0] sm:$0xff] }
 0x117   :  { %v3623_v27 = vadd.f32 %v3591_v45, %v3207_v12  ;;  %v3444_v7 = vrot.slane %v3284_v24, %v7727_v36  ;;  %v3560_v60 = vcombine.high %v4042_v20, %v4042_v20  ;;  %v3594_v58 = vmul.f32 %v3559_v55, %v3436_v61  ;;  %v4044_v12 = vld [vmem:[%s7133_s2 + $0x1a8] sm:$0xff] }
 0x118   :  { %v3624_v37 = vadd.f32 %v3592_v0, %v3208_v23  ;;  %v3211_v4 = vadd.f32 %v3179_v56, %v7731_v1  ;;  %v3212_v31 = vadd.f32 %v3180_v13, %v7732_v6  ;;  %v3296_v3 = vrot.slane %v7733_v35, %v7727_v36  ;;  %v7736_v23 = vld [vmem:[#allocation51_spill] sm:$0xff] }
 0x119   :  { %v3448_v52 = vrot.slane %v3288_v57, %v7727_v36  ;;  %v3595_v34 = vmul.f32 %v4042_v20, %v3440_v28  ;;  %v3625_v47 = vadd.f32 %v3593_v46, %v3209_v18  ;;  %v3653_v25 = vsel %vm1701_vm0, %v3621_v44, 0.0  ;;  %v7737_v20 = vld [vmem:[#allocation6_spill] sm:$0xff] }
 0x11a   :  { %v3654_v5 = vsel %vm1701_vm0, %v3622_v2, 0.0  ;;  %v3300_v56 = vrot.slane %v7733_v35, %v7728_v40  ;;  %v3452_v13 = vrot.slane %v3292_v19, %v7727_v36  ;;  %v3656_v17 = vsel %vm1701_vm0, %v3623_v27, 0.0 }
 0x11b   :  { %v3655_v26 = vadd.f32 %v3654_v5, %v3653_v25  ;;  %v3561_v8 = vcombine.high %v4043_v53, %v4043_v53  ;;  %v3596_v21 = vmul.f32 %v3560_v60, %v3444_v7  ;;  %v3626_v15 = vadd.f32 %v3594_v58, %v3210_v11  ;;  %v7738_v11 = vld [vmem:[#allocation31_spill] sm:$0xff]  ;;  %v4045_v60 = vld [vmem:[%s7133_s2 + $0x1b0] sm:$0xff] }
 0x11c   :  { %v3658_v63 = vsel %vm1701_vm0, %v3624_v37, 0.0  ;;  %v6477_v59 = vmul.f32 %v6304_v39, %v7734_v10  ;;  %v3213_v30 = vadd.f32 %v6387_v62, %v7735_v22  ;;  %v3304_v45 = vrot.slane %v7736_v23, %v7727_v36  ;;  %v7740_v7 = vld [vmem:[#allocation19_spill] sm:$0xff]  ;;  %v7741_v58 = vld [vmem:[#allocation52_spill] sm:$0xff] }
 0x11d   :  { %v3657_v24 = vadd.f32 %v3656_v17, %v3655_v26  ;;  %v3456_v61 = vrot.slane %v3296_v3, %v7727_v36  ;;  %v3597_v55 = vmul.f32 %v4043_v53, %v3448_v52  ;;  %v3627_v0 = vadd.f32 %v3595_v34, %v3211_v4  ;;  %v7745_v17 = vld [vmem:[#allocation17_spill] sm:$0xff] }
 0x11e   :  { %v3660_v18 = vsel %vm1701_vm0, %v3625_v47, 0.0  ;;  %v3214_v57 = vadd.f32 %v6390_v41, %v7737_v20  ;;  %v3308_v62 = vrot.slane %v7736_v23, %v7728_v40  ;;  %v3460_v28 = vrot.slane %v3300_v56, %v7727_v36  ;;  %v7743_v56 = vld [vmem:[#allocation39_spill] sm:$0xff]  ;;  %v7747_v23 = vld [vmem:[#allocation61_spill] sm:$0xff] }
 0x11f   :  { %v3659_v46 = vadd.f32 %v3658_v63, %v3657_v24  ;;  %v3562_v44 = vcombine.high %v4044_v12, %v4044_v12  ;;  %v3598_v2 = vmul.f32 %v3561_v8, %v3452_v13  ;;  %v3628_v29 = vadd.f32 %v3596_v21, %v3212_v31  ;;  %v7744_v13 = vld [vmem:[#allocation47_spill] sm:$0xff]  ;;  %v7746_v21 = vld [vmem:[#allocation53_spill] sm:$0xff] }
 0x120   :  { %v3662_v51 = vsel %vm1701_vm0, %v3626_v15, 0.0  ;;  %v7739_v19 = vcombine.high %v6304_v39, %v6304_v39  ;;  %v3215_v41 = vadd.f32 %v6400_v43, %v7740_v7  ;;  %v3312_v37 = vrot.slane %v7741_v58, %v7727_v36  ;;  %v7742_v39 = vld [vmem:[#allocation60_spill] sm:$0xff] }
 0x121   :  { %v3661_v1 = vadd.f32 %v3660_v18, %v3659_v46  ;;  %v3464_v4 = vrot.slane %v3304_v45, %v7727_v36  ;;  %v3599_v6 = vmul.f32 %v4044_v12, %v3456_v61  ;;  %v3629_v31 = vadd.f32 %v3597_v55, %v3213_v30  ;;  %v7751_v46 = vld [vmem:[#allocation9_spill] sm:$0xff] }
 0x122   :  { %v6498_v27 = vmul.f32 %v7739_v19, %v7738_v11  ;;  %v3664_v53 = vsel %vm1701_vm0, %v3627_v0, 0.0  ;;  %v3216_v35 = vadd.f32 %v6403_v14, %v7742_v39  ;;  %v3316_v43 = vrot.slane %v7741_v58, %v7728_v40  ;;  %v4046_v14 = vld [vmem:[%s7133_s2 + $0x1b8] sm:$0xff] }
 0x123   :  { %v3468_v3 = vrot.slane %v3308_v62, %v7727_v36  ;;  %v3663_v52 = vadd.f32 %v3662_v51, %v3661_v1  ;;  %v3563_v34 = vcombine.high %v4045_v60, %v4045_v60  ;;  %v3600_v47 = vmul.f32 %v3562_v44, %v3460_v28  ;;  %v7749_v62 = vld [vmem:[#allocation40_spill] sm:$0xff] }
 0x124   :  { %v3630_v25 = vadd.f32 %v3598_v2, %v3214_v57  ;;  %v3666_v5 = vsel %vm1701_vm0, %v3628_v29, 0.0  ;;  %v6517_v26 = vmul.f32 %v7744_v13, %v7743_v56  ;;  %v3217_v8 = vadd.f32 %v6406_v38, %v7745_v17  ;;  %v6533_v38 = vld [vmem:[%s7132_s0 + $0xc0] sm:$0xff]  ;;  %v6553_v29 = vld [vmem:[%s7132_s0 + $0xc8] sm:$0xff] }
 0x125   :  { %v3320_v15 = vrot.slane %v7746_v21, %v7727_v36  ;;  %v3665_v63 = vadd.f32 %v3664_v53, %v3663_v52  ;;  %v3472_v10 = vrot.slane %v3312_v37, %v7727_v36  ;;  %v3601_v22 = vmul.f32 %v4045_v60, %v3464_v4  ;;  %7748 = vst [vmem:[#allocation15_spill] sm:$0xff] %v6533_v38  ;;  %v4047_v2 = vld [vmem:[%s7133_s2 + $0x1c0] sm:$0xff] }
 0x126   :  { %v3631_v30 = vadd.f32 %v3599_v6, %v3215_v41  ;;  %v3668_v12 = vsel %vm1701_vm0, %v3629_v31, 0.0  ;;  %v3218_v45 = vadd.f32 %v6410_v49, %v7747_v23  ;;  %v3324_v24 = vrot.slane %v6533_v38, %v7728_v40  ;;  %7752 = vst [vmem:[#allocation23_spill] sm:$0xff] %v6553_v29 }
 0x127   :  { %v3476_v61 = vrot.slane %v3316_v43, %v7727_v36  ;;  %v3667_v55 = vadd.f32 %v3666_v5, %v3665_v63  ;;  %v3564_v0 = vcombine.high %v4046_v14, %v4046_v14  ;;  %v3602_v18 = vmul.f32 %v3563_v34, %v3468_v3  ;;  %v7755_v3 = vld [vmem:[#allocation63_spill] sm:$0xff]  ;;  %v6577_v34 = vld [vmem:[%s7132_s0 + $0xd0] sm:$0xff] }
 0x128   :  { %v3632_v20 = vadd.f32 %v3600_v47, %v3216_v35  ;;  %v3670_v57 = vsel %vm1701_vm0, %v3630_v25, 0.0  ;;  %v7750_v49 = vcombine.high %v7744_v13, %v7744_v13  ;;  %v3219_v44 = vadd.f32 %v6417_v9, %v7751_v46  ;;  %v7753_v9 = vld [vmem:[#allocation62_spill] sm:$0xff]  ;;  %v7754_v35 = vld [vmem:[#allocation41_spill] sm:$0xff]  ;;  %7756 = vst [vmem:[#allocation24_spill] sm:$0xff] %v6577_v34 }
 0x129   :  { %v3328_v51 = vrot.slane %v6553_v29, %v7727_v36  ;;  %v3669_v11 = vadd.f32 %v3668_v12, %v3667_v55  ;;  %v3480_v19 = vrot.slane %v3320_v15, %v7727_v36  ;;  %v3603_v7 = vmul.f32 %v4046_v14, %v3472_v10  ;;  %v7758_v12 = vld [vmem:[#allocation42_spill] sm:$0xff]  ;;  %v6603_v55 = vld [vmem:[%s7132_s0 + $0xd8] sm:$0xff] }
 0x12a   :  { %v6543_v28 = vmul.f32 %v7750_v49, %v7749_v62  ;;  %v3633_v41 = vadd.f32 %v3601_v22, %v3217_v8  ;;  %v3672_v60 = vsel %vm1701_vm0, %v3631_v30, 0.0  ;;  %v3220_v58 = vadd.f32 %v6420_v54, %v7753_v9  ;;  %v4048_v54 = vld [vmem:[%s7133_s2 + $0x1c8] sm:$0xff]  ;;  %7761 = vst [vmem:[#allocation2_spill] sm:$0xff] %v6603_v55  ;;  %v7764_v9 = vld [vmem:[#allocation34_spill] sm:$0xff] }
 0x12b   :  { %v3332_v37 = vrot.slane %v6553_v29, %v7728_v40  ;;  %v3484_v1 = vrot.slane %v3324_v24, %v7727_v36  ;;  %v3671_v4 = vadd.f32 %v3670_v57, %v3669_v11  ;;  %v3565_v6 = vcombine.high %v4047_v2, %v4047_v2  ;;  %v7760_v24 = vld [vmem:[#allocation12_spill] sm:$0xff] }
 0x12c   :  { %v3604_v31 = vmul.f32 %v3564_v0, %v3476_v61  ;;  %v3634_v53 = vadd.f32 %v3602_v18, %v3218_v45  ;;  %v3674_v39 = vsel %vm1701_vm0, %v3632_v20, 0.0  ;;  %v6567_v43 = vmul.f32 %v6326_v32, %v7754_v35  ;;  %v4049_v61 = vld [vmem:[%s7133_s2 + $0x1d0] sm:$0xff] }
 0x12d   :  { %v3221_v52 = vadd.f32 %v6432_v16, %v7755_v3  ;;  %v3336_v47 = vrot.slane %v6577_v34, %v7727_v36  ;;  %v3673_v25 = vadd.f32 %v3672_v60, %v3671_v4  ;;  %v3488_v5 = vrot.slane %v3328_v51, %v7727_v36  ;;  %v7757_v16 = vld [vmem:[#allocation32_spill] sm:$0xff] }
 0x12e   :  { %v3605_v56 = vmul.f32 %v4047_v2, %v3480_v19  ;;  %v3635_v13 = vadd.f32 %v3603_v7, %v3219_v44  ;;  %v3676_v17 = vsel %vm1701_vm0, %v3633_v41, 0.0  ;;  %v3222_v8 = vadd.f32 %v6440_v42, %v7757_v16  ;;  %v7763_v41 = vld [vmem:[#allocation43_spill] sm:$0xff] }
 0x12f   :  { %v3340_v14 = vrot.slane %v6577_v34, %v7728_v40  ;;  %v3492_v21 = vrot.slane %v3332_v37, %v7727_v36  ;;  %v3675_v15 = vadd.f32 %v3674_v39, %v3673_v25  ;;  %v3566_v63 = vcombine.high %v4048_v54, %v4048_v54  ;;  %v6625_v37 = vld [vmem:[%s7132_s0 + $0xe0] sm:$0xff] }
 0x130   :  { %v3606_v10 = vmul.f32 %v3565_v6, %v3484_v1  ;;  %v3636_v22 = vadd.f32 %v3604_v31, %v3220_v58  ;;  %v3678_v30 = vsel %vm1701_vm0, %v3634_v53, 0.0  ;;  %v7759_v23 = vcombine.high %v6326_v32, %v6326_v32  ;;  %7765 = vst [vmem:[#allocation50_spill] sm:$0xff] %v6625_v37 }
 0x131   :  { %v3223_v42 = vadd.f32 %v6444_v50, %v7760_v24  ;;  %v3344_v0 = vrot.slane %v6603_v55, %v7727_v36  ;;  %v3677_v18 = vadd.f32 %v3676_v17, %v3675_v15  ;;  %v3496_v32 = vrot.slane %v3336_v47, %v7727_v36  ;;  %v7762_v50 = vld [vmem:[#allocation33_spill] sm:$0xff] }
 0x132   :  { %v6593_v45 = vmul.f32 %v7759_v23, %v7758_v12  ;;  %v3607_v20 = vmul.f32 %v4048_v54, %v3488_v5  ;;  %v3637_v57 = vadd.f32 %v3605_v56, %v3221_v52  ;;  %v3680_v62 = vsel %vm1701_vm0, %v3635_v13, 0.0  ;;  %v7767_v13 = vld [vmem:[#allocation44_spill] sm:$0xff] }
 0x133   :  { %v3224_v49 = vadd.f32 %v6454_v48, %v7762_v50  ;;  %v3348_v46 = vrot.slane %v6603_v55, %v7728_v40  ;;  %v3500_v44 = vrot.slane %v3340_v14, %v7727_v36  ;;  %v3679_v2 = vadd.f32 %v3678_v30, %v3677_v18  ;;  %v4050_v48 = vld [vmem:[%s7133_s2 + $0x1d8] sm:$0xff] }
 0x134   :  { %v3567_v51 = vcombine.high %v4049_v61, %v4049_v61  ;;  %v3608_v11 = vmul.f32 %v3566_v63, %v3492_v21  ;;  %v3638_v19 = vadd.f32 %v3606_v10, %v3222_v8  ;;  %v3682_v7 = vsel %vm1701_vm0, %v3636_v22, 0.0  ;;  %v7769_v8 = vld [vmem:[#allocation13_spill] sm:$0xff]  ;;  %v6649_v21 = vld [vmem:[%s7132_s0 + $0xe8] sm:$0xff] }
 0x135   :  { %v3199_v60 = vmul.f32 %v6331_v33, %v7763_v41  ;;  %v3225_v58 = vadd.f32 %v6477_v59, %v7764_v9  ;;  %v3352_v1 = vrot.slane %v6625_v37, %v7727_v36  ;;  %v3681_v4 = vadd.f32 %v3680_v62, %v3679_v2  ;;  %v7766_v59 = vld [vmem:[#allocation35_spill] sm:$0xff]  ;;  %7770 = vst [vmem:[#allocation54_spill] sm:$0xff] %v6649_v21  ;;  %v7774_v50 = vld [vmem:[#allocation37_spill] sm:$0xff] }
 0x136   :  { %v3504_v6 = vrot.slane %v3344_v0, %v7727_v36  ;;  %v3609_v31 = vmul.f32 %v4049_v61, %v3496_v32  ;;  %v3639_v53 = vadd.f32 %v3607_v20, %v3223_v42  ;;  %v3684_v39 = vsel %vm1701_vm0, %v3637_v57, 0.0  ;;  %v7772_v20 = vld [vmem:[#allocation45_spill] sm:$0xff]  ;;  %v7773_v57 = vld [vmem:[#allocation14_spill] sm:$0xff] }
 0x137   :  { %v3226_v35 = vadd.f32 %v6498_v27, %v7766_v59  ;;  %v3356_v3 = vrot.slane %v6625_v37, %v7728_v40  ;;  %v3508_v52 = vrot.slane %v3348_v46, %v7727_v36  ;;  %v3683_v54 = vadd.f32 %v3682_v7, %v3681_v4  ;;  %v4051_v27 = vld [vmem:[%s7133_s2 + $0x1e0] sm:$0xff]  ;;  %v6671_v46 = vld [vmem:[%s7132_s0 + $0xf0] sm:$0xff] }
 0x138   :  { %v3568_v47 = vcombine.high %v4050_v48, %v4050_v48  ;;  %v3610_v25 = vmul.f32 %v3567_v51, %v3500_v44  ;;  %v3640_v5 = vadd.f32 %v3608_v11, %v3224_v49  ;;  %v3686_v56 = vsel %vm1701_vm0, %v3638_v19, 0.0  ;;  %7775 = vst [vmem:[#allocation55_spill] sm:$0xff] %v6671_v46 }
 0x139   :  { %v7768_v17 = vcombine.high %v6331_v33, %v6331_v33  ;;  %v3227_v14 = vadd.f32 %v6517_v26, %v7769_v8  ;;  %v3360_v15 = vrot.slane %v6649_v21, %v7727_v36  ;;  %v3685_v63 = vadd.f32 %v3684_v39, %v3683_v54  ;;  %v7771_v26 = vld [vmem:[#allocation36_spill] sm:$0xff] }
 0x13a   :  { %v3512_v10 = vrot.slane %v3352_v1, %v7727_v36  ;;  %v3611_v33 = vmul.f32 %v4050_v48, %v3504_v6  ;;  %v3641_v22 = vadd.f32 %v3609_v31, %v3225_v58  ;;  %v3688_v30 = vsel %vm1701_vm0, %v3639_v53, 0.0  ;;  %v7777_v53 = vld [vmem:[#allocation46_spill] sm:$0xff] }
 0x13b   :  { %v3200_v16 = vmul.f32 %v7768_v17, %v7767_v13  ;;  %v3228_v12 = vadd.f32 %v6543_v28, %v7771_v26  ;;  %v3364_v23 = vrot.slane %v6649_v21, %v7728_v40  ;;  %v3516_v24 = vrot.slane %v3356_v3, %v7727_v36  ;;  %v4052_v28 = vld [vmem:[%s7133_s2 + $0x1e8] sm:$0xff] }
 0x13c   :  { %v3687_v42 = vadd.f32 %v3686_v56, %v3685_v63  ;;  %v3569_v61 = vcombine.high %v4051_v27, %v4051_v27  ;;  %v3612_v0 = vmul.f32 %v3568_v47, %v3508_v52  ;;  %v3642_v18 = vadd.f32 %v3610_v25, %v3226_v35  ;;  %v7779_v35 = vld [vmem:[#allocation16_spill] sm:$0xff]  ;;  %v6694_v52 = vld [vmem:[%s7132_s0 + $0xf8] sm:$0xff] }
 0x13d   :  { %v3690_v32 = vsel %vm1701_vm0, %v3640_v5, 0.0  ;;  %v3201_v62 = vmul.f32 %v7773_v57, %v7772_v20  ;;  %v3229_v49 = vadd.f32 %v6567_v43, %v7774_v50  ;;  %v3368_v44 = vrot.slane %v6671_v46, %v7727_v36  ;;  %v7776_v43 = vld [vmem:[#allocation38_spill] sm:$0xff]  ;;  %7780 = vst [vmem:[#allocation57_spill] sm:$0xff] %v6694_v52 }
 0x13e   :  { %v3689_v2 = vadd.f32 %v3688_v30, %v3687_v42  ;;  %v3520_v51 = vrot.slane %v3360_v15, %v7727_v36  ;;  %v3613_v11 = vmul.f32 %v4051_v27, %v3512_v10  ;;  %v3643_v19 = vadd.f32 %v3611_v33, %v3227_v14  ;;  %v7783_v30 = vld [vmem:[#allocation10_spill] sm:$0xff] }
 0x13f   :  { %v3692_v7 = vsel %vm1701_vm0, %v3641_v22, 0.0  ;;  %v3230_v41 = vadd.f32 %v6593_v45, %v7776_v43  ;;  %v3372_v9 = vrot.slane %v6671_v46, %v7728_v40  ;;  %v3524_v58 = vrot.slane %v3364_v23, %v7727_v36  ;;  %v4053_v45 = vld [vmem:[%s7133_s2 + $0x1f0] sm:$0xff]  ;;  %v7782_v22 = vld [vmem:[#allocation3_spill] sm:$0xff]  ;;  %v7785_v23 = vld [vmem:[#allocation22_spill] sm:$0xff] }
 0x140   :  { %v3691_v48 = vadd.f32 %v3690_v32, %v3689_v2  ;;  %v3570_v1 = vcombine.high %v4052_v28, %v4052_v28  ;;  %v3614_v4 = vmul.f32 %v3569_v61, %v3516_v24  ;;  %v3644_v6 = vadd.f32 %v3612_v0, %v3228_v12  ;;  %v7784_v12 = vld [vmem:[#allocation48_spill] sm:$0xff]  ;;  %v7786_v42 = vld [vmem:[#allocation26_spill] sm:$0xff] }
 0x141   :  { %v3694_v31 = vsel %vm1701_vm0, %v3642_v18, 0.0  ;;  %v7778_v39 = vcombine.high %v7773_v57, %v7773_v57  ;;  %v3231_v3 = vadd.f32 %v3199_v60, %v7779_v35  ;;  %v3376_v54 = vrot.slane %v6694_v52, %v7727_v36  ;;  %v7781_v60 = vld [vmem:[#allocation25_spill] sm:$0xff] }
 0x142   :  { %v3693_v47 = vadd.f32 %v3692_v7, %v3691_v48  ;;  %v3528_v25 = vrot.slane %v3368_v44, %v7727_v36  ;;  %v3615_v5 = vmul.f32 %v4052_v28, %v3520_v51  ;;  %v3645_v56 = vadd.f32 %v3613_v11, %v3229_v49  ;;  %v7787_v57 = vld [vmem:[#allocation49_spill] sm:$0xff]  ;;  %v7789_v28 = vld [vmem:[#allocation27_spill] sm:$0xff] }
 0x143   :  { %v3202_v59 = vmul.f32 %v7778_v39, %v7777_v53  ;;  %v3696_v13 = vsel %vm1701_vm0, %v3643_v19, 0.0  ;;  %v3232_v17 = vadd.f32 %v3200_v16, %v7781_v60  ;;  %v3380_v8 = vrot.slane %v6694_v52, %v7728_v40  ;;  %v4054_v40 = vld [vmem:[%s7133_s2 + $0x1f8] sm:$0xff] }
 0x144   :  { %v3532_v14 = vrot.slane %v3372_v9, %v7727_v36  ;;  %v3695_v27 = vadd.f32 %v3694_v31, %v3693_v47  ;;  %v3571_v15 = vcombine.high %v4053_v45, %v4053_v45  ;;  %v3616_v63 = vmul.f32 %v3570_v1, %v3524_v58 }
 0x145   :  { %v3646_v10 = vadd.f32 %v3614_v4, %v3230_v41  ;;  %v3698_v33 = vsel %vm1701_vm0, %v3644_v6, 0.0  ;;  %v2820_v26 = vadd.f32 %v7783_v30, %v7782_v22  ;;  %v3203_v24 = vmul.f32 %v7785_v23, %v7784_v12  ;;  %v7790_v41 = vld [vmem:[#allocation28_spill] sm:$0xff] }
 0x146   :  { %v3233_v61 = vadd.f32 %v3201_v62, %v7786_v42  ;;  %v3697_v16 = vadd.f32 %v3696_v13, %v3695_v27  ;;  %v3536_v0 = vrot.slane %v3376_v54, %v7727_v36  ;;  %v3617_v18 = vmul.f32 %v4053_v45, %v3528_v25 }
 0x147   :  { %v3647_v32 = vadd.f32 %v3615_v5, %v3231_v3  ;;  %v3700_v20 = vsel %vm1701_vm0, %v3645_v56, 0.0  ;;  %v7788_v50 = vcombine.high %v7785_v23, %v7785_v23  ;;  %v3234_v44 = vadd.f32 %v3202_v59, %v7789_v28  ;;  %v4229_v28 = vld [vmem:[%s7132_s0 + $0x10] sm:$0xff] }
 0x148   :  { %v3540_v62 = vrot.slane %v3380_v8, %v7727_v36  ;;  %v3699_v2 = vadd.f32 %v3698_v33, %v3697_v16  ;;  %v3572_v51 = vcombine.high %v4054_v40, %v4054_v40  ;;  %v3618_v11 = vmul.f32 %v3571_v15, %v3532_v14  ;;  %v17_v8 = vld [vmem:[%s7134_s3] sm:$0xf]  ;;  %v6745_v16 = vld [vmem:[%s7135_s1 + $0x10] sm:$0xff] }
 0x149   :  { %v3204_v49 = vmul.f32 %v7788_v50, %v7787_v57  ;;  %v3648_v19 = vadd.f32 %v3616_v63, %v3232_v17  ;;  %v3702_v7 = vsel %vm1701_vm0, %v3646_v10, 0.0  ;;  %v3235_v9 = vadd.f32 %v3203_v24, %v7790_v41  ;;  %v1766_v17 = vpop.xlane.xlu0 %1765  ;;  %v4228_v50 = vld [vmem:[%s7132_s0 + $0x8] sm:$0xff] }
 0x14a   :  { %v3701_v43 = vadd.f32 %v3700_v20, %v3699_v2  ;;  %v3619_v58 = vmul.f32 %v4054_v40, %v3536_v0  ;;  %v3649_v48 = vadd.f32 %v3617_v18, %v3233_v61  ;;  %v3704_v1 = vsel %vm1701_vm0, %v3647_v32, 0.0  ;;  %v6735_v61 = vld [vmem:[%s7135_s1] sm:$0xff]  ;;  %v6740_v40 = vld [vmem:[%s7135_s1 + $0x8] sm:$0xff]  ;;  %v6750_v0 = vld [vmem:[%s7135_s1 + $0x18] sm:$0xff] }
 0x14b   :  { %v3236_v6 = vadd.f32 %v3204_v49, %v2820_v26  ;;  %v3620_v31 = vmul.f32 %v3572_v51, %v3540_v62  ;;  %v3650_v53 = vadd.f32 %v3618_v11, %v3234_v44  ;;  %v3706_v39 = vsel %vm1701_vm0, %v3648_v19, 0.0  ;;  %v6755_v18 = vld [vmem:[%s7135_s1 + $0x20] sm:$0xff]  ;;  %v6760_v32 = vld [vmem:[%s7135_s1 + $0x28] sm:$0xff]  ;;  %v6777_v62 = vld [vmem:[%s7135_s1 + $0x30] sm:$0xff] }
 0x14c   :  { %v3703_v4 = vadd.f32 %v3702_v7, %v3701_v43  ;;  %v3651_v59 = vadd.f32 %v3619_v58, %v3235_v9  ;;  %v3708_v35 = vsel %vm1701_vm0, %v3649_v48, 0.0  ;;  %v1767_v14 = vadd.f32 %v1766_v17, %v17_v8  ;;  %v4227_v20 = vld [vmem:[%s7132_s0] sm:$0xff]  ;;  %v6782_v2 = vld [vmem:[%s7135_s1 + $0x38] sm:$0xff]  ;;  %v4232_v41 = vld [vmem:[%s7132_s0 + $0x28] sm:$0xff] }
 0x14d   :  { %v3652_v45 = vadd.f32 %v3620_v31, %v3236_v6  ;;  %v3710_v54 = vsel %vm1701_vm0, %v3650_v53, 0.0  ;;  %v4251_v15 = vmov 0   ;;  %v1774_v57 = vsub.f32 %v4227_v20, %v6735_v61  ;;  %v6787_v51 = vld [vmem:[%s7135_s1 + $0x40] sm:$0xff]  ;;  %v4230_v11 = vld [vmem:[%s7132_s0 + $0x18] sm:$0xff]  ;;  %v6804_v58 = vld [vmem:[%s7135_s1 + $0x48] sm:$0xff] }
 0x14e   :  { %v3705_v36 = vadd.f32 %v3704_v1, %v3703_v4  ;;  %v3712_v25 = vsel %vm1701_vm0, %v3651_v59, 0.0  ;;  %v1768_v27 = vsub.f32 0.0, %v1767_v14  ;;  %4072 = vset.pattern.permute.xlu1 %v4251_v15  ;;  %4073 = vset.pattern.permute.xlu0 %v4251_v15  ;;  %v1775_v49 = vsub.f32 %v4228_v50, %v6740_v40  ;;  %v4231_v7 = vld [vmem:[%s7132_s0 + $0x20] sm:$0xff]  ;;  %v6809_v48 = vld [vmem:[%s7135_s1 + $0x50] sm:$0xff]  ;;  %v6814_v1 = vld [vmem:[%s7135_s1 + $0x58] sm:$0xff] }
 0x14f   :  { %v3714_v56 = vsel %vm1701_vm0, %v3652_v45, 0.0  ;;  %v1776_v44 = vsub.f32 %v4229_v28, %v6745_v16  ;;  %v1777_v19 = vsub.f32 %v4230_v11, %v6750_v0  ;;  %v1778_v43 = vsub.f32 %v4231_v7, %v6755_v18  ;;  %7791 = vst [vmem:[#allocation58_spill] sm:$0xff] %v6814_v1  ;;  %v4233_v4 = vld [vmem:[%s7132_s0 + $0x30] sm:$0xff]  ;;  %v4234_v31 = vld [vmem:[%s7132_s0 + $0x38] sm:$0xff] }
 0x150   :  { %v3707_v3 = vadd.f32 %v3706_v39, %v3705_v36  ;;  %v1769_v63 = vmul.f32 1.442695, %v1768_v27  ;;  %v1779_v9 = vsub.f32 %v4232_v41, %v6760_v32  ;;  %v1780_v6 = vsub.f32 %v4233_v4, %v6777_v62  ;;  %v4235_v39 = vld [vmem:[%s7132_s0 + $0x40] sm:$0xff]  ;;  %v6841_v45 = vld [vmem:[%s7135_s1 + $0x70] sm:$0xff]  ;;  %v6858_v17 = vld [vmem:[%s7135_s1 + $0x78] sm:$0xff] }
 0x151   :  { %v1781_v53 = vsub.f32 %v4234_v31, %v6782_v2  ;;  %v1782_v36 = vsub.f32 %v4235_v39, %v6787_v51  ;;  %v1811_v59 = vcombine.high %v1774_v57, %v1774_v57  ;;  %7794 = vst [vmem:[#allocation56_spill] sm:$0xff] %v6841_v45  ;;  %7795 = vst [vmem:[#allocation20_spill] sm:$0xff] %v6858_v17  ;;  %v4240_v27 = vld [vmem:[%s7132_s0 + $0x68] sm:$0xff] }
 0x152   :  { %v3709_v47 = vadd.f32 %v3708_v35, %v3707_v3  ;;  %4202 = vpow2.f32 %v1769_v63  ;;  %v6831_v35 = vld [vmem:[%s7135_s1 + $0x60] sm:$0xff]  ;;  %v6836_v3 = vld [vmem:[%s7135_s1 + $0x68] sm:$0xff]  ;;  %v4241_v63 = vld [vmem:[%s7132_s0 + $0x70] sm:$0xff] }
 0x153   :  { %7792 = vst [vmem:[#allocation59_spill] sm:$0xff] %v6831_v35  ;;  %7793 = vst [vmem:[#allocation8_spill] sm:$0xff] %v6836_v3  ;;  %v1787_v15 = vsub.f32 %v4240_v27, %v6836_v3  ;;  %v1818_v20 = vcombine.high %v1781_v53, %v1781_v53  ;;  %v1819_v50 = vcombine.high %v1782_v36, %v1782_v36 }
 0x154   :  { %v3711_v5 = vadd.f32 %v3710_v54, %v3709_v47  ;;  %v4236_v54 = vld [vmem:[%s7132_s0 + $0x48] sm:$0xff] }
 0x155   :  { %v1783_v47 = vsub.f32 %v4236_v54, %v6804_v58  ;;  %v1824_v4 = vcombine.high %v1787_v15, %v1787_v15 }
 0x156   :  { %v3713_v13 = vadd.f32 %v3712_v25, %v3711_v5  ;;  %v4237_v25 = vld [vmem:[%s7132_s0 + $0x50] sm:$0xff] }
 0x157   :  { %v1784_v5 = vsub.f32 %v4237_v25, %v6809_v48  ;;  %v1820_v28 = vcombine.high %v1783_v47, %v1783_v47 }
 0x158   :  { %v3715_v60 = vadd.f32 %v3714_v56, %v3713_v13  ;;  %v4238_v56 = vld [vmem:[%s7132_s0 + $0x58] sm:$0xff] }
 0x159   :  { %v1785_v13 = vsub.f32 %v4238_v56, %v6814_v1  ;;  %v1821_v11 = vcombine.high %v1784_v5, %v1784_v5 }
 0x15a   :  { %3716 = vadd.xlane.f32.xlu0 %v3715_v60  ;;  %v1812_v60 = vcombine.high %v1775_v49, %v1775_v49 }
 0x15b   :  { %v1822_v7 = vcombine.high %v1785_v13, %v1785_v13 }
 0x15f   :  { %v4203_v10 = vpop.eup %4202 }
 0x160   :  { %v1771_v33 = vadd.f32 1.0, %v4203_v10  ;;  %v1788_v10 = vsub.f32 %v4241_v63, %v6841_v45 }
 0x162   :  { %4204 = vrcp.f32 %v1771_v33  ;;  %v1813_v33 = vcombine.high %v1776_v44, %v1776_v44  ;;  %v1825_v31 = vcombine.high %v1788_v10, %v1788_v10 }
 0x16f   :  { %v4205_v22 = vpop.eup %4204 }
 0x170   :  { %1792 = vperm.xlu1 %4072, %v4205_v22  }
 0x1e3   :  { %v3717_v30 = vpop.xlane.xlu0 %3716 }
 0x1e4   :  { %v3718_v26 = vadd.f32 %v3717_v30, %v17_v8  ;;  %v4239_v8 = vld [vmem:[%s7132_s0 + $0x60] sm:$0xff]  ;;  %v4242_v30 = vld [vmem:[%s7132_s0 + $0x78] sm:$0xff] }
 0x1e5   :  { %v1786_v14 = vsub.f32 %v4239_v8, %v6831_v35 }
 0x1e6   :  { %v3719_v12 = vsub.f32 0.0, %v3718_v26  ;;  %v1789_v26 = vsub.f32 %v4242_v30, %v6858_v17 }
 0x1e7   :  { %v1823_v41 = vcombine.high %v1786_v14, %v1786_v14 }
 0x1e8   :  { %v3720_v23 = vmul.f32 1.442695, %v3719_v12  ;;  %v1814_v12 = vcombine.high %v1777_v19, %v1777_v19  ;;  %v1826_v39 = vcombine.high %v1789_v26, %v1789_v26 }
 0x1ea   :  { %4206 = vpow2.f32 %v3720_v23  ;;  %v1815_v23 = vcombine.high %v1778_v43, %v1778_v43 }
 0x1eb   :  { %v1793_v22 = vpop.permute.xlu1 %1792 }
 0x1ec   :  { %v1843_v54 = vmul.f32 %v1793_v22, %v1774_v57  ;;  %v1844_v25 = vmul.f32 %v1811_v59, %v1793_v22  ;;  %v1845_v56 = vmul.f32 %v1793_v22, %v1775_v49  ;;  %v1846_v8 = vmul.f32 %v1812_v60, %v1793_v22 }
 0x1ed   :  { %v1847_v27 = vmul.f32 %v1793_v22, %v1776_v44  ;;  %v1848_v63 = vmul.f32 %v1813_v33, %v1793_v22  ;;  %v1849_v30 = vmul.f32 %v1793_v22, %v1777_v19  ;;  %v1850_v52 = vmul.f32 %v1814_v12, %v1793_v22 }
 0x1ee   :  { %v1851_v46 = vmul.f32 %v1793_v22, %v1778_v43  ;;  %v1852_v21 = vmul.f32 %v1815_v23, %v1793_v22  ;;  %v1853_v55 = vmul.f32 %v1793_v22, %v1779_v9  ;;  %v1855_v29 = vmul.f32 %v1793_v22, %v1780_v6 }
 0x1ef   :  { %v1857_v17 = vmul.f32 %v1793_v22, %v1781_v53  ;;  %v1858_v45 = vmul.f32 %v1818_v20, %v1793_v22  ;;  %v1859_v3 = vmul.f32 %v1793_v22, %v1782_v36  ;;  %v1860_v35 = vmul.f32 %v1819_v50, %v1793_v22 }
 0x1f0   :  { %v1861_v57 = vmul.f32 %v1793_v22, %v1783_v47  ;;  %v1862_v59 = vmul.f32 %v1820_v28, %v1793_v22  ;;  %v1863_v49 = vmul.f32 %v1793_v22, %v1784_v5  ;;  %v1864_v60 = vmul.f32 %v1821_v11, %v1793_v22 }
 0x1f1   :  { %v1865_v44 = vmul.f32 %v1793_v22, %v1785_v13  ;;  %v1866_v33 = vmul.f32 %v1822_v7, %v1793_v22  ;;  %v1867_v19 = vmul.f32 %v1793_v22, %v1786_v14  ;;  %v1868_v12 = vmul.f32 %v1823_v41, %v1793_v22 }
 0x1f2   :  { %v1869_v43 = vmul.f32 %v1793_v22, %v1787_v15  ;;  %v1870_v23 = vmul.f32 %v1824_v4, %v1793_v22  ;;  %v1871_v1 = vmul.f32 %v1793_v22, %v1788_v10  ;;  %v1909_v53 = vcombine.low %v1847_v27, %v1848_v63  ;;  %v6998_v27 = vld [vmem:[%s7135_s1 + $0xd8] sm:$0xff]  ;;  %v7003_v63 = vld [vmem:[%s7135_s1 + $0xe0] sm:$0xff] }
 0x1f3   :  { %v1910_v20 = vcombine.low %v1849_v30, %v1850_v52  ;;  %v1911_v36 = vcombine.low %v1851_v46, %v1852_v21  ;;  %v1914_v28 = vcombine.low %v1857_v17, %v1858_v45  ;;  %v1915_v5 = vcombine.low %v1859_v3, %v1860_v35  ;;  %v6948_v35 = vld [vmem:[%s7135_s1 + $0x88] sm:$0xff]  ;;  %v6953_v3 = vld [vmem:[%s7135_s1 + $0x90] sm:$0xff]  ;;  %v6958_v45 = vld [vmem:[%s7135_s1 + $0x98] sm:$0xff]  ;;  %7801 = vst [vmem:[#allocation21_spill] sm:$0xff] %v6998_v27 }
 0x1f4   :  { %v1916_v11 = vcombine.low %v1861_v57, %v1862_v59  ;;  %v1917_v13 = vcombine.low %v1863_v49, %v1864_v60  ;;  %v1918_v7 = vcombine.low %v1865_v44, %v1866_v33  ;;  %v1919_v14 = vcombine.low %v1867_v19, %v1868_v12  ;;  %v6963_v17 = vld [vmem:[%s7135_s1 + $0xa0] sm:$0xff]  ;;  %7802 = vst [vmem:[#allocation29_spill] sm:$0xff] %v7003_v63  ;;  %v7008_v30 = vld [vmem:[%s7135_s1 + $0xe8] sm:$0xff]  ;;  %v7013_v57 = vld [vmem:[%s7135_s1 + $0xf0] sm:$0xff] }
 0x1f5   :  { %v1920_v41 = vcombine.low %v1869_v43, %v1870_v23  ;;  %v1942_v52 = vadd.f32 %v1910_v20, %v6750_v0  ;;  %v1947_v21 = vadd.f32 %v1915_v5, %v6787_v51  ;;  %v7797_v0 = vld [vmem:[#allocation59_spill] sm:$0xff]  ;;  %7803 = vst [vmem:[#allocation11_spill] sm:$0xff] %v7008_v30  ;;  %7804 = vst [vmem:[#allocation4_spill] sm:$0xff] %v7013_v57  ;;  %v7018_v59 = vld [vmem:[%s7135_s1 + $0xf8] sm:$0xff] }
 0x1f6   :  { %v1948_v46 = vadd.f32 %v1916_v11, %v6804_v58  ;;  %v7800_v58 = vld [vmem:[#allocation20_spill] sm:$0xff]  ;;  %7805 = vst [vmem:[#allocation18_spill] sm:$0xff] %v7018_v59  ;;  %v4243_v49 = vld [vmem:[%s7132_s0 + $0x80] sm:$0xff]  ;;  %v4244_v44 = vld [vmem:[%s7132_s0 + $0x88] sm:$0xff] }
 0x1f7   :  { %v4207_v24 = vpop.eup %4206  ;;  %1958 = vst [vmem:[%s7136_s4 + $0x18] sm:$0xff] %v1942_v52  ;;  %1963 = vst [vmem:[%s7136_s4 + $0x40] sm:$0xff] %v1947_v21  ;;  %v3726_v33 = vsub.f32 %v4244_v44, %v6948_v35  ;;  %v4245_v19 = vld [vmem:[%s7132_s0 + $0x90] sm:$0xff]  ;;  %v4246_v43 = vld [vmem:[%s7132_s0 + $0x98] sm:$0xff] }
 0x1f8   :  { %v3722_v42 = vadd.f32 1.0, %v4207_v24  ;;  %v1816_v24 = vcombine.high %v1779_v9, %v1779_v9  ;;  %v1872_v9 = vmul.f32 %v1825_v31, %v1793_v22  ;;  %1964 = vst [vmem:[%s7136_s4 + $0x48] sm:$0xff] %v1948_v46  ;;  %v6968_v31 = vld [vmem:[%s7135_s1 + $0xa8] sm:$0xff]  ;;  %v3727_v12 = vsub.f32 %v4245_v19, %v6953_v3  ;;  %v4250_v20 = vld [vmem:[%s7132_s0 + $0xb8] sm:$0xff]  ;;  %v7808_v11 = vld [vmem:[#allocation24_spill] sm:$0xff] }
 0x1f9   :  { %v3728_v23 = vsub.f32 %v4246_v43, %v6958_v45  ;;  %v7813_v52 = vld [vmem:[#allocation57_spill] sm:$0xff] }
 0x1fa   :  { %4208 = vrcp.f32 %v3722_v42  ;;  %v1817_v42 = vcombine.high %v1780_v6, %v1780_v6  ;;  %v1854_v34 = vmul.f32 %v1816_v24, %v1793_v22  ;;  %v1873_v24 = vmul.f32 %v1793_v22, %v1789_v26 }
 0x1fb   :  { %v1874_v6 = vmul.f32 %v1826_v39, %v1793_v22  ;;  %v1921_v15 = vcombine.low %v1871_v1, %v1872_v9  ;;  %v1941_v26 = vadd.f32 %v1909_v53, %v6745_v16  ;;  %v6943_v1 = vld [vmem:[%s7135_s1 + $0x80] sm:$0xff]  ;;  %v6973_v39 = vld [vmem:[%s7135_s1 + $0xb0] sm:$0xff]  ;;  %v3765_v21 = vcombine.high %v3728_v23, %v3728_v23 }
 0x1fc   :  { %v1856_v38 = vmul.f32 %v1817_v42, %v1793_v22  ;;  %v1907_v42 = vcombine.low %v1843_v54, %v1844_v25  ;;  %v1912_v50 = vcombine.low %v1853_v55, %v1854_v34  ;;  %v1943_v34 = vadd.f32 %v1911_v36, %v6755_v18  ;;  %v6978_v54 = vld [vmem:[%s7135_s1 + $0xb8] sm:$0xff]  ;;  %v6983_v25 = vld [vmem:[%s7135_s1 + $0xc0] sm:$0xff] }
 0x1fd   :  { %v1922_v4 = vcombine.low %v1873_v24, %v1874_v6  ;;  %v1946_v55 = vadd.f32 %v1914_v28, %v6782_v2  ;;  %v1951_v18 = vadd.f32 %v1919_v14, %v7797_v0  ;;  %1957 = vst [vmem:[%s7136_s4 + $0x10] sm:$0xff] %v1941_v26  ;;  %v7799_v2 = vld [vmem:[#allocation56_spill] sm:$0xff]  ;;  %v3725_v60 = vsub.f32 %v4243_v49, %v6943_v1  ;;  %v4247_v9 = vld [vmem:[%s7132_s0 + $0xa0] sm:$0xff]  ;;  %v4248_v6 = vld [vmem:[%s7132_s0 + $0xa8] sm:$0xff] }
 0x1fe   :  { %v1913_v47 = vcombine.low %v1855_v29, %v1856_v38  ;;  %v1939_v10 = vadd.f32 %v1907_v42, %v6735_v61  ;;  %v1944_v38 = vadd.f32 %v1912_v50, %v6760_v32  ;;  %v1949_v61 = vadd.f32 %v1917_v13, %v6809_v48  ;;  %v7798_v32 = vld [vmem:[#allocation8_spill] sm:$0xff]  ;;  %1959 = vst [vmem:[%s7136_s4 + $0x20] sm:$0xff] %v1943_v34  ;;  %v7806_v50 = vld [vmem:[#allocation15_spill] sm:$0xff] }
 0x1ff   :  { %v1953_v51 = vadd.f32 %v1921_v15, %v7799_v2  ;;  %v1954_v48 = vadd.f32 %v1922_v4, %v7800_v58  ;;  %1962 = vst [vmem:[%s7136_s4 + $0x38] sm:$0xff] %v1946_v55  ;;  %1967 = vst [vmem:[%s7136_s4 + $0x60] sm:$0xff] %v1951_v18  ;;  %v3729_v24 = vsub.f32 %v4247_v9, %v6963_v17  ;;  %v7807_v28 = vld [vmem:[#allocation23_spill] sm:$0xff]  ;;  %v7811_v4 = vld [vmem:[#allocation54_spill] sm:$0xff] }
 0x200   :  { %v1945_v29 = vadd.f32 %v1913_v47, %v6777_v62  ;;  %1955 = vst [vmem:[%s7136_s4] sm:$0xff] %v1939_v10  ;;  %v1952_v62 = vadd.f32 %v1920_v41, %v7798_v32  ;;  %1960 = vst [vmem:[%s7136_s4 + $0x28] sm:$0xff] %v1944_v38  ;;  %v3730_v42 = vsub.f32 %v4248_v6, %v6968_v31  ;;  %v7810_v41 = vld [vmem:[#allocation50_spill] sm:$0xff] }
 0x201   :  { %1965 = vst [vmem:[%s7136_s4 + $0x50] sm:$0xff] %v1949_v61  ;;  %1969 = vst [vmem:[%s7136_s4 + $0x70] sm:$0xff] %v1953_v51  ;;  %v3732_v36 = vsub.f32 %v4250_v20, %v6978_v54  ;;  %v3733_v47 = vsub.f32 %v7806_v50, %v6983_v25  ;;  %v3737_v15 = vsub.f32 %v7810_v41, %v7003_v63 }
 0x202   :  { %1961 = vst [vmem:[%s7136_s4 + $0x30] sm:$0xff] %v1945_v29  ;;  %1968 = vst [vmem:[%s7136_s4 + $0x68] sm:$0xff] %v1952_v62  ;;  %v3738_v10 = vsub.f32 %v7811_v4, %v7008_v30  ;;  %v3740_v34 = vsub.f32 %v7813_v52, %v7018_v59  ;;  %v3762_v38 = vcombine.high %v3725_v60, %v3725_v60 }
 0x203   :  { %1970 = vst [vmem:[%s7136_s4 + $0x78] sm:$0xff] %v1954_v48  ;;  %v3763_v29 = vcombine.high %v3726_v33, %v3726_v33  ;;  %v3764_v55 = vcombine.high %v3727_v12, %v3727_v12  ;;  %v3766_v46 = vcombine.high %v3729_v24, %v3729_v24  ;;  %v3767_v61 = vcombine.high %v3730_v42, %v3730_v42 }
 0x204   :  { %v3770_v0 = vcombine.high %v3733_v47, %v3733_v47  ;;  %v3774_v51 = vcombine.high %v3737_v15, %v3737_v15  ;;  %v3775_v58 = vcombine.high %v3738_v10, %v3738_v10  ;;  %v3777_v49 = vcombine.high %v3740_v34, %v3740_v34 }
 0x207   :  { %v4209_v37 = vpop.eup %4208 }
 0x208   :  { %3743 = vperm.xlu1 %4072, %v4209_v37   ;;  %v1908_v37 = vcombine.low %v1845_v56, %v1846_v8  ;;  %v6988_v56 = vld [vmem:[%s7135_s1 + $0xc8] sm:$0xff]  ;;  %v6993_v8 = vld [vmem:[%s7135_s1 + $0xd0] sm:$0xff] }
 0x209   :  { %v3734_v5 = vsub.f32 %v7807_v28, %v6988_v56  ;;  %v3735_v13 = vsub.f32 %v7808_v11, %v6993_v8 }
 0x20a   :  { %v1940_v22 = vadd.f32 %v1908_v37, %v6740_v40  ;;  %v7796_v40 = vld [vmem:[#allocation58_spill] sm:$0xff]  ;;  %v4249_v37 = vld [vmem:[%s7132_s0 + $0xb0] sm:$0xff] }
 0x20b   :  { %v1950_v16 = vadd.f32 %v1918_v7, %v7796_v40  ;;  %v3731_v53 = vsub.f32 %v4249_v37, %v6973_v39  ;;  %v7809_v7 = vld [vmem:[#allocation2_spill] sm:$0xff]  ;;  %v3771_v18 = vcombine.high %v3734_v5, %v3734_v5  ;;  %v3772_v32 = vcombine.high %v3735_v13, %v3735_v13 }
 0x20c   :  { %1956 = vst [vmem:[%s7136_s4 + $0x8] sm:$0xff] %v1940_v22  ;;  %v3736_v14 = vsub.f32 %v7809_v7, %v6998_v27  ;;  %v7812_v22 = vld [vmem:[#allocation55_spill] sm:$0xff] }
 0x20d   :  { %1966 = vst [vmem:[%s7136_s4 + $0x58] sm:$0xff] %v1950_v16  ;;  %v3739_v26 = vsub.f32 %v7812_v22, %v7013_v57  ;;  %v3768_v40 = vcombine.high %v3731_v53, %v3731_v53  ;;  %v3769_v16 = vcombine.high %v3732_v36, %v3732_v36 }
 0x20e   :  { %v3773_v62 = vcombine.high %v3736_v14, %v3736_v14 }
 0x20f   :  { %v3776_v48 = vcombine.high %v3739_v26, %v3739_v26 }
 0x283   :  { %v3744_v2 = vpop.permute.xlu1 %3743 }
 0x284   :  { %v3794_v44 = vmul.f32 %v3744_v2, %v3725_v60  ;;  %v3795_v19 = vmul.f32 %v3762_v38, %v3744_v2  ;;  %v3796_v43 = vmul.f32 %v3744_v2, %v3726_v33  ;;  %v3797_v9 = vmul.f32 %v3763_v29, %v3744_v2 }
 0x285   :  { %v3798_v6 = vmul.f32 %v3744_v2, %v3727_v12  ;;  %v3799_v37 = vmul.f32 %v3764_v55, %v3744_v2  ;;  %v3800_v20 = vmul.f32 %v3744_v2, %v3728_v23  ;;  %v3801_v50 = vmul.f32 %v3765_v21, %v3744_v2 }
 0x286   :  { %v3802_v28 = vmul.f32 %v3744_v2, %v3729_v24  ;;  %v3803_v11 = vmul.f32 %v3766_v46, %v3744_v2  ;;  %v3804_v7 = vmul.f32 %v3744_v2, %v3730_v42  ;;  %v3805_v41 = vmul.f32 %v3767_v61, %v3744_v2 }
 0x287   :  { %v3806_v4 = vmul.f32 %v3744_v2, %v3731_v53  ;;  %v3807_v22 = vmul.f32 %v3768_v40, %v3744_v2  ;;  %v3808_v52 = vmul.f32 %v3744_v2, %v3732_v36  ;;  %v3809_v59 = vmul.f32 %v3769_v16, %v3744_v2 }
 0x288   :  { %v3810_v57 = vmul.f32 %v3744_v2, %v3733_v47  ;;  %v3811_v30 = vmul.f32 %v3770_v0, %v3744_v2  ;;  %v3812_v63 = vmul.f32 %v3744_v2, %v3734_v5  ;;  %v3813_v27 = vmul.f32 %v3771_v18, %v3744_v2 }
 0x289   :  { %v3814_v60 = vmul.f32 %v3744_v2, %v3735_v13  ;;  %v3815_v38 = vmul.f32 %v3772_v32, %v3744_v2  ;;  %v3816_v33 = vmul.f32 %v3744_v2, %v3736_v14  ;;  %v3817_v29 = vmul.f32 %v3773_v62, %v3744_v2 }
 0x28a   :  { %v3818_v12 = vmul.f32 %v3744_v2, %v3737_v15  ;;  %v3819_v55 = vmul.f32 %v3774_v51, %v3744_v2  ;;  %v3820_v23 = vmul.f32 %v3744_v2, %v3738_v10  ;;  %v3821_v21 = vmul.f32 %v3775_v58, %v3744_v2 }
 0x28b   :  { %v3822_v24 = vmul.f32 %v3744_v2, %v3739_v26  ;;  %v3823_v46 = vmul.f32 %v3776_v48, %v3744_v2  ;;  %v3824_v42 = vmul.f32 %v3744_v2, %v3740_v34  ;;  %v3825_v61 = vmul.f32 %v3777_v49, %v3744_v2 }
 0x28c   :  { %v3858_v53 = vcombine.low %v3794_v44, %v3795_v19  ;;  %v3859_v40 = vcombine.low %v3796_v43, %v3797_v9  ;;  %v3860_v36 = vcombine.low %v3798_v6, %v3799_v37  ;;  %v3861_v16 = vcombine.low %v3800_v20, %v3801_v50  ;;  %v7814_v44 = vld [vmem:[#allocation21_spill] sm:$0xff] }
 0x28d   :  { %v3862_v47 = vcombine.low %v3802_v28, %v3803_v11  ;;  %v3863_v0 = vcombine.low %v3804_v7, %v3805_v41  ;;  %v3864_v5 = vcombine.low %v3806_v4, %v3807_v22  ;;  %v3865_v18 = vcombine.low %v3808_v52, %v3809_v59 }
 0x28e   :  { %v3866_v13 = vcombine.low %v3810_v57, %v3811_v30  ;;  %v3867_v32 = vcombine.low %v3812_v63, %v3813_v27  ;;  %v3868_v14 = vcombine.low %v3814_v60, %v3815_v38  ;;  %v3869_v62 = vcombine.low %v3816_v33, %v3817_v29 }
 0x28f   :  { %v3870_v15 = vcombine.low %v3818_v12, %v3819_v55  ;;  %v3871_v51 = vcombine.low %v3820_v23, %v3821_v21  ;;  %v3872_v10 = vcombine.low %v3822_v24, %v3823_v46  ;;  %v3873_v58 = vcombine.low %v3824_v42, %v3825_v61 }
 0x290   :  { %v3890_v26 = vadd.f32 %v6943_v1, %v3858_v53  ;;  %v3891_v34 = vadd.f32 %v6948_v35, %v3859_v40  ;;  %v3892_v2 = vadd.f32 %v6953_v3, %v3860_v36  ;;  %v3893_v48 = vadd.f32 %v6958_v45, %v3861_v16  ;;  %v7815_v3 = vld [vmem:[#allocation29_spill] sm:$0xff] }
 0x291   :  { %v3894_v49 = vadd.f32 %v6963_v17, %v3862_v47  ;;  %v3895_v59 = vadd.f32 %v6968_v31, %v3863_v0  ;;  %v3896_v27 = vadd.f32 %v6973_v39, %v3864_v5  ;;  %v3897_v63 = vadd.f32 %v6978_v54, %v3865_v18  ;;  %v7816_v17 = vld [vmem:[#allocation11_spill] sm:$0xff]  ;;  %v7817_v39 = vld [vmem:[#allocation4_spill] sm:$0xff] }
 0x292   :  { %v3898_v30 = vadd.f32 %v6983_v25, %v3866_v13  ;;  %v3899_v57 = vadd.f32 %v6988_v56, %v3867_v32  ;;  %v3900_v1 = vadd.f32 %v6993_v8, %v3868_v14  ;;  %v3901_v35 = vadd.f32 %v7814_v44, %v3869_v62  ;;  %4055 = vst [vmem:[%s7136_s4 + $0x80] sm:$0xff] %v3890_v26  ;;  %v7818_v25 = vld [vmem:[#allocation18_spill] sm:$0xff] }
 0x293   :  { %4056 = vst [vmem:[%s7136_s4 + $0x88] sm:$0xff] %v3891_v34  ;;  %4057 = vst [vmem:[%s7136_s4 + $0x90] sm:$0xff] %v3892_v2  ;;  %v3902_v45 = vadd.f32 %v7815_v3, %v3870_v15  ;;  %v3903_v31 = vadd.f32 %v7816_v17, %v3871_v51  ;;  %v3904_v54 = vadd.f32 %v7817_v39, %v3872_v10 }
 0x294   :  { %4058 = vst [vmem:[%s7136_s4 + $0x98] sm:$0xff] %v3893_v48  ;;  %v3905_v56 = vadd.f32 %v7818_v25, %v3873_v58  ;;  %4059 = vst [vmem:[%s7136_s4 + $0xa0] sm:$0xff] %v3894_v49 }
 0x295   :  { %4060 = vst [vmem:[%s7136_s4 + $0xa8] sm:$0xff] %v3895_v59  ;;  %4061 = vst [vmem:[%s7136_s4 + $0xb0] sm:$0xff] %v3896_v27 }
 0x296   :  { %4062 = vst [vmem:[%s7136_s4 + $0xb8] sm:$0xff] %v3897_v63  ;;  %4063 = vst [vmem:[%s7136_s4 + $0xc0] sm:$0xff] %v3898_v30 }
 0x297   :  { %4064 = vst [vmem:[%s7136_s4 + $0xc8] sm:$0xff] %v3899_v57  ;;  %4065 = vst [vmem:[%s7136_s4 + $0xd0] sm:$0xff] %v3900_v1 }
 0x298   :  { %4066 = vst [vmem:[%s7136_s4 + $0xd8] sm:$0xff] %v3901_v35  ;;  %4067 = vst [vmem:[%s7136_s4 + $0xe0] sm:$0xff] %v3902_v45 }
 0x299   :  { %4068 = vst [vmem:[%s7136_s4 + $0xe8] sm:$0xff] %v3903_v31  ;;  %4069 = vst [vmem:[%s7136_s4 + $0xf0] sm:$0xff] %v3904_v54 }
 0x29a   :  { %4070 = vst [vmem:[%s7136_s4 + $0xf8] sm:$0xff] %v3905_v56 }

</bundles_post_ra>
